<compile_context>
chip_gen: v7x
topology: tpu7x:2x2x1
jax: 0.10.0
libtpu: 0.0.40
codegen_flags: <defaults>
</compile_context>

<pallas_src>
import functools

import jax
import jax.numpy as jnp
from jax.experimental import pallas as pl
from jax.experimental.pallas import tpu as pltpu


# ---------------------------------------------------------------------------
# Fused Pallas kernel: one (batch n, low-res depth plane a = D-1-t) step
# ---------------------------------------------------------------------------
def _upconv_block_kernel(x_ref, s_ref, wt_ref, bt_ref, wc_ref, bc_ref, a_ref,
                         o_ref, ub_ref, *, W, P):
    # x_ref:  (P, Cin)          bf16  low-res cell plane a
    # s_ref:  (8, P, Cout)      bf16  skip, parity-blocked (pd,ph,pw), plane a
    # wt_ref: (8, Cin, Cout)    bf16  ConvTranspose3d weight per parity
    # bt_ref: (1, Cout)         f32
    # wc_ref: (8, Cout, Cout)   bf16  Conv3d weight per tap (kd,kh,kw), (ci,co)
    # bc_ref, a_ref: (1, Cout)  f32   conv bias / PReLU alpha
    # o_ref:  (8, P, Cout)      bf16  output, parity-blocked (qd,qh,qw)
    # ub_ref: (2, 8, P+W+1, Cout) bf16 scratch: upsampled+bias+skip planes
    Cout = s_ref.shape[-1]
    t = pl.program_id(1)
    cur = t % 2                           # slot for plane a (written this step)
    prv = jnp.where(t == 0, cur, 1 - cur)  # slot for plane a+1 (carried);
                                           # first step: clamp a+1 -> a

    # ---- transposed conv (pointwise per low-res voxel) + bias + skip -------
    x = x_ref[...]                                        # (P, Cin) bf16
    btb = jnp.broadcast_to(bt_ref[...], (P, Cout))        # hoisted broadcast
    for par in range(8):                                  # parity (pd,ph,pw)
        u = jnp.dot(x, wt_ref[par], preferred_element_type=jnp.float32)
        u = u + btb + s_ref[par].astype(jnp.float32)      # f32 accumulate
        ub = u.astype(jnp.bfloat16)                       # (P, Cout)
        ub_ref[cur, par, :P, :] = ub
        # wrap rows (read only by taps whose outputs are cropped)
        ub_ref[cur, par, P:, :] = ub[:W + 1, :]

    # ---- 2x2x2 valid conv over the upsampled volume + PReLU ----------------
    bcb = jnp.broadcast_to(bc_ref[...], (P, Cout))        # hoisted broadcasts
    alb = jnp.broadcast_to(a_ref[...], (P, Cout))
    wcs = [wc_ref[k] for k in range(8)]                   # (Cout, Cout) each

    for qd in range(2):                                   # output parity
        for qh in range(2):
            for qw in range(2):
                q = (qd * 2 + qh) * 2 + qw
                acc = bcb                                 # (P, Cout) f32
                for kd in range(2):                       # conv tap
                    for kh in range(2):
                        for kw in range(2):
                            k = (kd * 2 + kh) * 2 + kw
                            sd, pd = divmod(qd + kd, 2)
                            sh, ph = divmod(qh + kh, 2)
                            sw, pw = divmod(qw + kw, 2)
                            par = (pd * 2 + ph) * 2 + pw
                            shift = sh * W + sw
                            slot = cur if sd == 0 else prv
                            tap = ub_ref[slot, par, shift:shift + P, :]
                            acc = acc + jnp.dot(
                                tap, wcs[k],
                                preferred_element_type=jnp.float32)
                yq = jnp.where(acc >= 0.0, acc, alb * acc)     # PReLU
                o_ref[q, :, :] = yq.astype(o_ref.dtype)        # direct store


# ---------------------------------------------------------------------------
# Wrapper: PyTorch-style NCDHW in / NCDHW out
# ---------------------------------------------------------------------------
def upconv_block_forward(x, skip, params):
    """x: (N, Cin, D, H, W), skip: (N, Cout, 2D, 2H, 2W)
       -> (N, Cout, 2D-1, 2H-1, 2W-1) float32."""
    wt, bt, wc, bc, alpha = params
    N, Cin, D, H, W = x.shape
    Cout = wt.shape[1]
    P = H * W

    # ---- boundary layout plumbing (each a single fused XLA copy) -----------
    x_cells = (jnp.transpose(x, (0, 2, 3, 4, 1))
               .reshape(N, D, P, Cin).astype(jnp.bfloat16))
    # skip NCDHW -> (N, D, parity(pd,ph,pw), H*W, Cout)
    skipb = (skip.reshape(N, Cout, D, 2, H, 2, W, 2)
             .transpose(0, 2, 3, 5, 7, 4, 6, 1)
             .reshape(N, D, 8, P, Cout).astype(jnp.bfloat16))

    # ConvTranspose3d weight (Cin, Cout, 2,2,2) -> (parity, Cin, Cout)
    wt_b = (jnp.transpose(wt, (2, 3, 4, 0, 1))
            .reshape(8, Cin, Cout).astype(jnp.bfloat16))
    # Conv3d weight (Cout, Cout, 2,2,2) -> (tap, ci, co)
    wc_b = (jnp.transpose(wc, (2, 3, 4, 1, 0))
            .reshape(8, Cout, Cout).astype(jnp.bfloat16))
    bt2 = bt.reshape(1, Cout).astype(jnp.float32)
    bc2 = bc.reshape(1, Cout).astype(jnp.float32)
    al2 = alpha.reshape(1, Cout).astype(jnp.float32)

    # reverse depth walk so each step only needs plane a (a+1 is carried)
    def xs_map(n, t):
        return (n, D - 1 - t, 0, 0)

    def sk_map(n, t):
        return (n, D - 1 - t, 0, 0, 0)

    def w3_map(n, t):
        return (0, 0, 0)

    def w2_map(n, t):
        return (0, 0)

    # generation-aware VMEM limit (~48 MiB on v7x, ~96 MiB on v5e/v6e)
    try:
        vmem_cap = pltpu.get_tpu_info().vmem_capacity_bytes
    except Exception:
        vmem_cap = 64 * 1024 * 1024
    vmem_limit = max(32 * 1024 * 1024,
                     min(vmem_cap * 3 // 4, 96 * 1024 * 1024))

    flops = N * D * (8 * 2 * P * Cin * Cout + 64 * 2 * P * Cout * Cout)
    bytes_accessed = (x_cells.size * 2 + skipb.size * 2          # bf16 reads
                      + N * D * 8 * P * Cout * 2                 # bf16 write
                      + (wt_b.size + wc_b.size) * 2
                      + (bt2.size + bc2.size + al2.size) * 4)

    y_blk = pl.pallas_call(
        functools.partial(_upconv_block_kernel, W=W, P=P),
        grid=(N, D),
        in_specs=[
            pl.BlockSpec((None, None, P, Cin), xs_map),      # x plane a
            pl.BlockSpec((None, None, 8, P, Cout), sk_map),  # skip plane a
            pl.BlockSpec((8, Cin, Cout), w3_map),            # wt (VMEM-resident)
            pl.BlockSpec((1, Cout), w2_map),                 # bt
            pl.BlockSpec((8, Cout, Cout), w3_map),           # wc
            pl.BlockSpec((1, Cout), w2_map),                 # bc
            pl.BlockSpec((1, Cout), w2_map),                 # alpha
        ],
        out_specs=pl.BlockSpec((None, None, 8, P, Cout), sk_map),
        out_shape=jax.ShapeDtypeStruct((N, D, 8, P, Cout), jnp.bfloat16),
        scratch_shapes=[pltpu.VMEM((2, 8, P + W + 1, Cout), jnp.bfloat16)],
        compiler_params=pltpu.CompilerParams(
            dimension_semantics=("parallel", "arbitrary"),
            vmem_limit_bytes=int(vmem_limit),
        ),
        cost_estimate=pl.CostEstimate(flops=flops, transcendentals=0,
                                      bytes_accessed=bytes_accessed),
    )(x_cells, skipb, wt_b, bt2, wc_b, bc2, al2)

    # de-interleave parities + crop + back to NCDHW (one boundary copy)
    y = y_blk.astype(jnp.float32).reshape(N, D, 2, 2, 2, H, W, Cout)
    y = jnp.transpose(y, (0, 7, 1, 2, 5, 3, 6, 4)).reshape(
        N, Cout, 2 * D, 2 * H, 2 * W)
    return y[:, :, : 2 * D - 1, : 2 * H - 1, : 2 * W - 1]


# ---------------------------------------------------------------------------
# Pure-JAX f32 reference (matches the PyTorch module) for a tolerance check
# ---------------------------------------------------------------------------
def upconv_block_reference(x, skip, params):
    wt, bt, wc, bc, alpha = params
    N, Cin, D, H, W = x.shape
    Cout = wt.shape[1]
    # ConvTranspose3d(kernel=2, stride=2): one source voxel per output voxel
    t = jnp.einsum('ncdhw,cokij->ndkhiwjo', x, wt)
    u = jnp.transpose(t, (0, 7, 1, 2, 3, 4, 5, 6)).reshape(
        N, Cout, 2 * D, 2 * H, 2 * W)
    v = u + bt[None, :, None, None, None] + skip
    # Conv3d(kernel=2, padding=0)
    Do, Ho, Wo = 2 * D - 1, 2 * H - 1, 2 * W - 1
    y = jnp.broadcast_to(bc[None, :, None, None, None], (N, Cout, Do, Ho, Wo))
    for kd in range(2):
        for kh in range(2):
            for kw in range(2):
                y = y + jnp.einsum(
                    'ncdhw,oc->nodhw',
                    v[:, :, kd:kd + Do, kh:kh + Ho, kw:kw + Wo],
                    wc[:, :, kd, kh, kw])
    return jnp.where(y >= 0, y, alpha[None, :, None, None, None] * y)


def init_params(key, in_channels, out_channels):
    k1, k2, k3, k4 = jax.random.split(key, 4)
    wt = jax.random.uniform(k1, (in_channels, out_channels, 2, 2, 2),
                            jnp.float32, -0.1, 0.1)     # ConvTranspose3d.weight
    bt = jax.random.uniform(k2, (out_channels,), jnp.float32, -0.1, 0.1)
    wc = jax.random.uniform(k3, (out_channels, out_channels, 2, 2, 2),
                            jnp.float32, -0.1, 0.1)     # Conv3d.weight
    bc = jax.random.uniform(k4, (out_channels,), jnp.float32, -0.1, 0.1)
    alpha = jnp.full((out_channels,), 0.25, jnp.float32)  # PReLU default
    return wt, bt, wc, bc, alpha


if __name__ == "__main__":
    key = jax.random.PRNGKey(0)
    kx, ks, kp = jax.random.split(key, 3)

    N, Cin, Cout = 2, 8, 4
    D = H = W = 4

    x = jax.random.normal(kx, (N, Cin, D, H, W), jnp.float32)
    skip = jax.random.normal(ks, (N, Cout, 2 * D, 2 * H, 2 * W), jnp.float32)
    params = init_params(kp, Cin, Cout)

    out = jax.jit(upconv_block_forward)(x, skip, params)
    out = jax.block_until_ready(out)

    assert out.shape == (N, Cout, 2 * D - 1, 2 * H - 1, 2 * W - 1), out.shape
    assert bool(jnp.all(jnp.isfinite(out)))

    ref = upconv_block_reference(x, skip, params)
    max_err = float(jnp.max(jnp.abs(out - ref)))
    assert max_err < 5e-2, f"max abs error vs reference: {max_err}"

    print("KERNEL_OK")
</pallas_src>

<mosaic_0001>
module attributes {stable_mosaic.version = 11 : i64} {
  func.func @_upconv_block_kernel(%arg0: i32, %arg1: i32, %arg2: memref<1x1x16x8xbf16, #tpu.memory_space<vmem>>, %arg3: memref<1x1x8x16x4xbf16, #tpu.memory_space<vmem>>, %arg4: memref<8x8x4xbf16, #tpu.memory_space<vmem>>, %arg5: memref<1x4xf32, #tpu.memory_space<vmem>>, %arg6: memref<8x4x4xbf16, #tpu.memory_space<vmem>>, %arg7: memref<1x4xf32, #tpu.memory_space<vmem>>, %arg8: memref<1x4xf32, #tpu.memory_space<vmem>>, %arg9: memref<1x1x8x16x4xbf16, #tpu.memory_space<vmem>>, %arg10: memref<2x8x21x4xbf16, #tpu.memory_space<vmem>>) attributes {dimension_semantics = [#tpu.dimension_semantics<parallel>, #tpu.dimension_semantics<arbitrary>], iteration_bounds = array<i64: 2, 4>, scalar_prefetch = 0 : i64, scratch_operands = 1 : i64, tpu.core_type = #tpu.core_type<tc>, window_params = [{transform_indices = @transform_0, window_bounds = array<i64: 1, 1, 16, 8>}, {transform_indices = @transform_1, window_bounds = array<i64: 1, 1, 8, 16, 4>}, {pipeline_mode = #tpu.pipeline_mode<synchronous>, transform_indices = @transform_2, window_bounds = array<i64: 8, 8, 4>}, {pipeline_mode = #tpu.pipeline_mode<synchronous>, transform_indices = @transform_3, window_bounds = array<i64: 1, 4>}, {pipeline_mode = #tpu.pipeline_mode<synchronous>, transform_indices = @transform_4, window_bounds = array<i64: 8, 4, 4>}, {pipeline_mode = #tpu.pipeline_mode<synchronous>, transform_indices = @transform_5, window_bounds = array<i64: 1, 4>}, {pipeline_mode = #tpu.pipeline_mode<synchronous>, transform_indices = @transform_6, window_bounds = array<i64: 1, 4>}, {transform_indices = @transform_7, window_bounds = array<i64: 1, 1, 8, 16, 4>}]} {
    %c2_i32 = arith.constant 2 : i32
    %c0_i32 = arith.constant 0 : i32
    %0 = arith.cmpi eq, %c2_i32, %c0_i32 : i32
    %c1_i32 = arith.constant 1 : i32
    %1 = arith.select %0, %c1_i32, %c2_i32 : i32
    %2 = arith.remsi %arg1, %1 : i32
    %c0_i32_0 = arith.constant 0 : i32
    %3 = arith.cmpi ne, %2, %c0_i32_0 : i32
    %c0_i32_1 = arith.constant 0 : i32
    %4 = arith.cmpi slt, %2, %c0_i32_1 : i32
    %c0_i32_2 = arith.constant 0 : i32
    %5 = arith.cmpi slt, %1, %c0_i32_2 : i32
    %6 = arith.xori %4, %5 : i1
    %7 = arith.andi %6, %3 : i1
    %8 = arith.addi %2, %1 : i32
    %9 = arith.select %7, %8, %2 : i32
    %c0_i32_3 = arith.constant 0 : i32
    %10 = arith.cmpi eq, %arg1, %c0_i32_3 : i32
    %c1_i32_4 = arith.constant 1 : i32
    %11 = arith.subi %c1_i32_4, %9 : i32
    %12 = arith.select %10, %9, %11 : i32
    %c0 = arith.constant 0 : index
    %c0_5 = arith.constant 0 : index
    %c0_6 = arith.constant 0 : index
    %c0_7 = arith.constant 0 : index
    %13 = vector.load %arg2[%c0, %c0_5, %c0_6, %c0_7] : memref<1x1x16x8xbf16, #tpu.memory_space<vmem>>, vector<1x1x16x8xbf16>
    %14 = vector.shape_cast %13 : vector<1x1x16x8xbf16> to vector<16x8xbf16>
    %c0_8 = arith.constant 0 : index
    %c0_9 = arith.constant 0 : index
    %15 = vector.load %arg5[%c0_8, %c0_9] : memref<1x4xf32, #tpu.memory_space<vmem>>, vector<1x4xf32>
    %16 = vector.shape_cast %15 : vector<1x4xf32> to vector<1x4xf32>
    %17 = vector.broadcast %16 : vector<1x4xf32> to vector<16x4xf32>
    %c0_10 = arith.constant 0 : index
    %c0_11 = arith.constant 0 : index
    %c0_12 = arith.constant 0 : index
    %18 = vector.load %arg4[%c0_10, %c0_11, %c0_12] : memref<8x8x4xbf16, #tpu.memory_space<vmem>>, vector<1x8x4xbf16>
    %19 = vector.shape_cast %18 : vector<1x8x4xbf16> to vector<8x4xbf16>
    %cst = arith.constant dense<0.000000e+00> : vector<16x4xf32>
    %20 = tpu.matmul %14, %19, %cst {dimension_numbers = #tpu.dot_dimension_numbers<[1], [0], [0], [1], [0, 0, 1, 1], [], []>} : vector<16x8xbf16>, vector<8x4xbf16>, vector<16x4xf32> -> vector<16x4xf32>
    %21 = arith.addf %20, %17 : vector<16x4xf32>
    %c0_13 = arith.constant 0 : index
    %c0_14 = arith.constant 0 : index
    %c0_15 = arith.constant 0 : index
    %c0_16 = arith.constant 0 : index
    %c0_17 = arith.constant 0 : index
    %22 = vector.load %arg3[%c0_13, %c0_14, %c0_15, %c0_16, %c0_17] : memref<1x1x8x16x4xbf16, #tpu.memory_space<vmem>>, vector<1x1x1x16x4xbf16>
    %23 = vector.shape_cast %22 : vector<1x1x1x16x4xbf16> to vector<16x4xbf16>
    %24 = arith.extf %23 : vector<16x4xbf16> to vector<16x4xf32>
    %25 = arith.addf %21, %24 : vector<16x4xf32>
    %26 = arith.truncf %25 : vector<16x4xf32> to vector<16x4xbf16>
    %27 = arith.index_cast %9 : i32 to index
    %c0_18 = arith.constant 0 : index
    %c0_19 = arith.constant 0 : index
    %c0_20 = arith.constant 0 : index
    %28 = vector.load %arg10[%27, %c0_18, %c0_19, %c0_20] : memref<2x8x21x4xbf16, #tpu.memory_space<vmem>>, vector<1x1x16x4xbf16>
    %29 = vector.shape_cast %28 : vector<1x1x16x4xbf16> to vector<16x4xbf16>
    %30 = vector.shape_cast %26 : vector<16x4xbf16> to vector<1x1x16x4xbf16>
    tpu.vector_store %arg10[%27, %c0_18, %c0_19, %c0_20], %30 {strides = array<i32>} : memref<2x8x21x4xbf16, #tpu.memory_space<vmem>>, vector<1x1x16x4xbf16>,
    %31 = vector.extract_strided_slice %26 {offsets = [0, 0], sizes = [5, 4], strides = [1, 1]} : vector<16x4xbf16> to vector<5x4xbf16>
    %32 = arith.index_cast %9 : i32 to index
    %c0_21 = arith.constant 0 : index
    %c16 = arith.constant 16 : index
    %c0_22 = arith.constant 0 : index
    %33 = vector.load %arg10[%32, %c0_21, %c16, %c0_22] : memref<2x8x21x4xbf16, #tpu.memory_space<vmem>>, vector<1x1x5x4xbf16>
    %34 = vector.shape_cast %33 : vector<1x1x5x4xbf16> to vector<5x4xbf16>
    %35 = vector.shape_cast %31 : vector<5x4xbf16> to vector<1x1x5x4xbf16>
    tpu.vector_store %arg10[%32, %c0_21, %c16, %c0_22], %35 {strides = array<i32>} : memref<2x8x21x4xbf16, #tpu.memory_space<vmem>>, vector<1x1x5x4xbf16>,
    %c1 = arith.constant 1 : index
    %c0_23 = arith.constant 0 : index
    %c0_24 = arith.constant 0 : index
    %36 = vector.load %arg4[%c1, %c0_23, %c0_24] : memref<8x8x4xbf16, #tpu.memory_space<vmem>>, vector<1x8x4xbf16>
    %37 = vector.shape_cast %36 : vector<1x8x4xbf16> to vector<8x4xbf16>
    %cst_25 = arith.constant dense<0.000000e+00> : vector<16x4xf32>
    %38 = tpu.matmul %14, %37, %cst_25 {dimension_numbers = #tpu.dot_dimension_numbers<[1], [0], [0], [1], [0, 0, 1, 1], [], []>} : vector<16x8xbf16>, vector<8x4xbf16>, vector<16x4xf32> -> vector<16x4xf32>
    %39 = arith.addf %38, %17 : vector<16x4xf32>
    %c0_26 = arith.constant 0 : index
    %c0_27 = arith.constant 0 : index
    %c1_28 = arith.constant 1 : index
    %c0_29 = arith.constant 0 : index
    %c0_30 = arith.constant 0 : index
    %40 = vector.load %arg3[%c0_26, %c0_27, %c1_28, %c0_29, %c0_30] : memref<1x1x8x16x4xbf16, #tpu.memory_space<vmem>>, vector<1x1x1x16x4xbf16>
    %41 = vector.shape_cast %40 : vector<1x1x1x16x4xbf16> to vector<16x4xbf16>
    %42 = arith.extf %41 : vector<16x4xbf16> to vector<16x4xf32>
    %43 = arith.addf %39, %42 : vector<16x4xf32>
    %44 = arith.truncf %43 : vector<16x4xf32> to vector<16x4xbf16>
    %45 = arith.index_cast %9 : i32 to index
    %c1_31 = arith.constant 1 : index
    %c0_32 = arith.constant 0 : index
    %c0_33 = arith.constant 0 : index
    %46 = vector.load %arg10[%45, %c1_31, %c0_32, %c0_33] : memref<2x8x21x4xbf16, #tpu.memory_space<vmem>>, vector<1x1x16x4xbf16>
    %47 = vector.shape_cast %46 : vector<1x1x16x4xbf16> to vector<16x4xbf16>
    %48 = vector.shape_cast %44 : vector<16x4xbf16> to vector<1x1x16x4xbf16>
    tpu.vector_store %arg10[%45, %c1_31, %c0_32, %c0_33], %48 {strides = array<i32>} : memref<2x8x21x4xbf16, #tpu.memory_space<vmem>>, vector<1x1x16x4xbf16>,
    %49 = vector.extract_strided_slice %44 {offsets = [0, 0], sizes = [5, 4], strides = [1, 1]} : vector<16x4xbf16> to vector<5x4xbf16>
    %50 = arith.index_cast %9 : i32 to index
    %c1_34 = arith.constant 1 : index
    %c16_35 = arith.constant 16 : index
    %c0_36 = arith.constant 0 : index
    %51 = vector.load %arg10[%50, %c1_34, %c16_35, %c0_36] : memref<2x8x21x4xbf16, #tpu.memory_space<vmem>>, vector<1x1x5x4xbf16>
    %52 = vector.shape_cast %51 : vector<1x1x5x4xbf16> to vector<5x4xbf16>
    %53 = vector.shape_cast %49 : vector<5x4xbf16> to vector<1x1x5x4xbf16>
    tpu.vector_store %arg10[%50, %c1_34, %c16_35, %c0_36], %53 {strides = array<i32>} : memref<2x8x21x4xbf16, #tpu.memory_space<vmem>>, vector<1x1x5x4xbf16>,
    %c2 = arith.constant 2 : index
    %c0_37 = arith.constant 0 : index
    %c0_38 = arith.constant 0 : index
    %54 = vector.load %arg4[%c2, %c0_37, %c0_38] : memref<8x8x4xbf16, #tpu.memory_space<vmem>>, vector<1x8x4xbf16>
    %55 = vector.shape_cast %54 : vector<1x8x4xbf16> to vector<8x4xbf16>
    %cst_39 = arith.constant dense<0.000000e+00> : vector<16x4xf32>
    %56 = tpu.matmul %14, %55, %cst_39 {dimension_numbers = #tpu.dot_dimension_numbers<[1], [0], [0], [1], [0, 0, 1, 1], [], []>} : vector<16x8xbf16>, vector<8x4xbf16>, vector<16x4xf32> -> vector<16x4xf32>
    %57 = arith.addf %56, %17 : vector<16x4xf32>
    %c0_40 = arith.constant 0 : index
    %c0_41 = arith.constant 0 : index
    %c2_42 = arith.constant 2 : index
    %c0_43 = arith.constant 0 : index
    %c0_44 = arith.constant 0 : index
    %58 = vector.load %arg3[%c0_40, %c0_41, %c2_42, %c0_43, %c0_44] : memref<1x1x8x16x4xbf16, #tpu.memory_space<vmem>>, vector<1x1x1x16x4xbf16>
    %59 = vector.shape_cast %58 : vector<1x1x1x16x4xbf16> to vector<16x4xbf16>
    %60 = arith.extf %59 : vector<16x4xbf16> to vector<16x4xf32>
    %61 = arith.addf %57, %60 : vector<16x4xf32>
    %62 = arith.truncf %61 : vector<16x4xf32> to vector<16x4xbf16>
    %63 = arith.index_cast %9 : i32 to index
    %c2_45 = arith.constant 2 : index
    %c0_46 = arith.constant 0 : index
    %c0_47 = arith.constant 0 : index
    %64 = vector.load %arg10[%63, %c2_45, %c0_46, %c0_47] : memref<2x8x21x4xbf16, #tpu.memory_space<vmem>>, vector<1x1x16x4xbf16>
    %65 = vector.shape_cast %64 : vector<1x1x16x4xbf16> to vector<16x4xbf16>
    %66 = vector.shape_cast %62 : vector<16x4xbf16> to vector<1x1x16x4xbf16>
    tpu.vector_store %arg10[%63, %c2_45, %c0_46, %c0_47], %66 {strides = array<i32>} : memref<2x8x21x4xbf16, #tpu.memory_space<vmem>>, vector<1x1x16x4xbf16>,
    %67 = vector.extract_strided_slice %62 {offsets = [0, 0], sizes = [5, 4], strides = [1, 1]} : vector<16x4xbf16> to vector<5x4xbf16>
    %68 = arith.index_cast %9 : i32 to index
    %c2_48 = arith.constant 2 : index
    %c16_49 = arith.constant 16 : index
    %c0_50 = arith.constant 0 : index
    %69 = vector.load %arg10[%68, %c2_48, %c16_49, %c0_50] : memref<2x8x21x4xbf16, #tpu.memory_space<vmem>>, vector<1x1x5x4xbf16>
    %70 = vector.shape_cast %69 : vector<1x1x5x4xbf16> to vector<5x4xbf16>
    %71 = vector.shape_cast %67 : vector<5x4xbf16> to vector<1x1x5x4xbf16>
    tpu.vector_store %arg10[%68, %c2_48, %c16_49, %c0_50], %71 {strides = array<i32>} : memref<2x8x21x4xbf16, #tpu.memory_space<vmem>>, vector<1x1x5x4xbf16>,
    %c3 = arith.constant 3 : index
    %c0_51 = arith.constant 0 : index
    %c0_52 = arith.constant 0 : index
    %72 = vector.load %arg4[%c3, %c0_51, %c0_52] : memref<8x8x4xbf16, #tpu.memory_space<vmem>>, vector<1x8x4xbf16>
    %73 = vector.shape_cast %72 : vector<1x8x4xbf16> to vector<8x4xbf16>
    %cst_53 = arith.constant dense<0.000000e+00> : vector<16x4xf32>
    %74 = tpu.matmul %14, %73, %cst_53 {dimension_numbers = #tpu.dot_dimension_numbers<[1], [0], [0], [1], [0, 0, 1, 1], [], []>} : vector<16x8xbf16>, vector<8x4xbf16>, vector<16x4xf32> -> vector<16x4xf32>
    %75 = arith.addf %74, %17 : vector<16x4xf32>
    %c0_54 = arith.constant 0 : index
    %c0_55 = arith.constant 0 : index
    %c3_56 = arith.constant 3 : index
    %c0_57 = arith.constant 0 : index
    %c0_58 = arith.constant 0 : index
    %76 = vector.load %arg3[%c0_54, %c0_55, %c3_56, %c0_57, %c0_58] : memref<1x1x8x16x4xbf16, #tpu.memory_space<vmem>>, vector<1x1x1x16x4xbf16>
    %77 = vector.shape_cast %76 : vector<1x1x1x16x4xbf16> to vector<16x4xbf16>
    %78 = arith.extf %77 : vector<16x4xbf16> to vector<16x4xf32>
    %79 = arith.addf %75, %78 : vector<16x4xf32>
    %80 = arith.truncf %79 : vector<16x4xf32> to vector<16x4xbf16>
    %81 = arith.index_cast %9 : i32 to index
    %c3_59 = arith.constant 3 : index
    %c0_60 = arith.constant 0 : index
    %c0_61 = arith.constant 0 : index
    %82 = vector.load %arg10[%81, %c3_59, %c0_60, %c0_61] : memref<2x8x21x4xbf16, #tpu.memory_space<vmem>>, vector<1x1x16x4xbf16>
    %83 = vector.shape_cast %82 : vector<1x1x16x4xbf16> to vector<16x4xbf16>
    %84 = vector.shape_cast %80 : vector<16x4xbf16> to vector<1x1x16x4xbf16>
    tpu.vector_store %arg10[%81, %c3_59, %c0_60, %c0_61], %84 {strides = array<i32>} : memref<2x8x21x4xbf16, #tpu.memory_space<vmem>>, vector<1x1x16x4xbf16>,
    %85 = vector.extract_strided_slice %80 {offsets = [0, 0], sizes = [5, 4], strides = [1, 1]} : vector<16x4xbf16> to vector<5x4xbf16>
    %86 = arith.index_cast %9 : i32 to index
    %c3_62 = arith.constant 3 : index
    %c16_63 = arith.constant 16 : index
    %c0_64 = arith.constant 0 : index
    %87 = vector.load %arg10[%86, %c3_62, %c16_63, %c0_64] : memref<2x8x21x4xbf16, #tpu.memory_space<vmem>>, vector<1x1x5x4xbf16>
    %88 = vector.shape_cast %87 : vector<1x1x5x4xbf16> to vector<5x4xbf16>
    %89 = vector.shape_cast %85 : vector<5x4xbf16> to vector<1x1x5x4xbf16>
    tpu.vector_store %arg10[%86, %c3_62, %c16_63, %c0_64], %89 {strides = array<i32>} : memref<2x8x21x4xbf16, #tpu.memory_space<vmem>>, vector<1x1x5x4xbf16>,
    %c4 = arith.constant 4 : index
    %c0_65 = arith.constant 0 : index
    %c0_66 = arith.constant 0 : index
    %90 = vector.load %arg4[%c4, %c0_65, %c0_66] : memref<8x8x4xbf16, #tpu.memory_space<vmem>>, vector<1x8x4xbf16>
    %91 = vector.shape_cast %90 : vector<1x8x4xbf16> to vector<8x4xbf16>
    %cst_67 = arith.constant dense<0.000000e+00> : vector<16x4xf32>
    %92 = tpu.matmul %14, %91, %cst_67 {dimension_numbers = #tpu.dot_dimension_numbers<[1], [0], [0], [1], [0, 0, 1, 1], [], []>} : vector<16x8xbf16>, vector<8x4xbf16>, vector<16x4xf32> -> vector<16x4xf32>
    %93 = arith.addf %92, %17 : vector<16x4xf32>
    %c0_68 = arith.constant 0 : index
    %c0_69 = arith.constant 0 : index
    %c4_70 = arith.constant 4 : index
    %c0_71 = arith.constant 0 : index
    %c0_72 = arith.constant 0 : index
    %94 = vector.load %arg3[%c0_68, %c0_69, %c4_70, %c0_71, %c0_72] : memref<1x1x8x16x4xbf16, #tpu.memory_space<vmem>>, vector<1x1x1x16x4xbf16>
    %95 = vector.shape_cast %94 : vector<1x1x1x16x4xbf16> to vector<16x4xbf16>
    %96 = arith.extf %95 : vector<16x4xbf16> to vector<16x4xf32>
    %97 = arith.addf %93, %96 : vector<16x4xf32>
    %98 = arith.truncf %97 : vector<16x4xf32> to vector<16x4xbf16>
    %99 = arith.index_cast %9 : i32 to index
    %c4_73 = arith.constant 4 : index
    %c0_74 = arith.constant 0 : index
    %c0_75 = arith.constant 0 : index
    %100 = vector.load %arg10[%99, %c4_73, %c0_74, %c0_75] : memref<2x8x21x4xbf16, #tpu.memory_space<vmem>>, vector<1x1x16x4xbf16>
    %101 = vector.shape_cast %100 : vector<1x1x16x4xbf16> to vector<16x4xbf16>
    %102 = vector.shape_cast %98 : vector<16x4xbf16> to vector<1x1x16x4xbf16>
    tpu.vector_store %arg10[%99, %c4_73, %c0_74, %c0_75], %102 {strides = array<i32>} : memref<2x8x21x4xbf16, #tpu.memory_space<vmem>>, vector<1x1x16x4xbf16>,
    %103 = vector.extract_strided_slice %98 {offsets = [0, 0], sizes = [5, 4], strides = [1, 1]} : vector<16x4xbf16> to vector<5x4xbf16>
    %104 = arith.index_cast %9 : i32 to index
    %c4_76 = arith.constant 4 : index
    %c16_77 = arith.constant 16 : index
    %c0_78 = arith.constant 0 : index
    %105 = vector.load %arg10[%104, %c4_76, %c16_77, %c0_78] : memref<2x8x21x4xbf16, #tpu.memory_space<vmem>>, vector<1x1x5x4xbf16>
    %106 = vector.shape_cast %105 : vector<1x1x5x4xbf16> to vector<5x4xbf16>
    %107 = vector.shape_cast %103 : vector<5x4xbf16> to vector<1x1x5x4xbf16>
    tpu.vector_store %arg10[%104, %c4_76, %c16_77, %c0_78], %107 {strides = array<i32>} : memref<2x8x21x4xbf16, #tpu.memory_space<vmem>>, vector<1x1x5x4xbf16>,
    %c5 = arith.constant 5 : index
    %c0_79 = arith.constant 0 : index
    %c0_80 = arith.constant 0 : index
    %108 = vector.load %arg4[%c5, %c0_79, %c0_80] : memref<8x8x4xbf16, #tpu.memory_space<vmem>>, vector<1x8x4xbf16>
    %109 = vector.shape_cast %108 : vector<1x8x4xbf16> to vector<8x4xbf16>
    %cst_81 = arith.constant dense<0.000000e+00> : vector<16x4xf32>
    %110 = tpu.matmul %14, %109, %cst_81 {dimension_numbers = #tpu.dot_dimension_numbers<[1], [0], [0], [1], [0, 0, 1, 1], [], []>} : vector<16x8xbf16>, vector<8x4xbf16>, vector<16x4xf32> -> vector<16x4xf32>
    %111 = arith.addf %110, %17 : vector<16x4xf32>
    %c0_82 = arith.constant 0 : index
    %c0_83 = arith.constant 0 : index
    %c5_84 = arith.constant 5 : index
    %c0_85 = arith.constant 0 : index
    %c0_86 = arith.constant 0 : index
    %112 = vector.load %arg3[%c0_82, %c0_83, %c5_84, %c0_85, %c0_86] : memref<1x1x8x16x4xbf16, #tpu.memory_space<vmem>>, vector<1x1x1x16x4xbf16>
    %113 = vector.shape_cast %112 : vector<1x1x1x16x4xbf16> to vector<16x4xbf16>
    %114 = arith.extf %113 : vector<16x4xbf16> to vector<16x4xf32>
    %115 = arith.addf %111, %114 : vector<16x4xf32>
    %116 = arith.truncf %115 : vector<16x4xf32> to vector<16x4xbf16>
    %117 = arith.index_cast %9 : i32 to index
    %c5_87 = arith.constant 5 : index
    %c0_88 = arith.constant 0 : index
    %c0_89 = arith.constant 0 : index
    %118 = vector.load %arg10[%117, %c5_87, %c0_88, %c0_89] : memref<2x8x21x4xbf16, #tpu.memory_space<vmem>>, vector<1x1x16x4xbf16>
    %119 = vector.shape_cast %118 : vector<1x1x16x4xbf16> to vector<16x4xbf16>
    %120 = vector.shape_cast %116 : vector<16x4xbf16> to vector<1x1x16x4xbf16>
    tpu.vector_store %arg10[%117, %c5_87, %c0_88, %c0_89], %120 {strides = array<i32>} : memref<2x8x21x4xbf16, #tpu.memory_space<vmem>>, vector<1x1x16x4xbf16>,
    %121 = vector.extract_strided_slice %116 {offsets = [0, 0], sizes = [5, 4], strides = [1, 1]} : vector<16x4xbf16> to vector<5x4xbf16>
    %122 = arith.index_cast %9 : i32 to index
    %c5_90 = arith.constant 5 : index
    %c16_91 = arith.constant 16 : index
    %c0_92 = arith.constant 0 : index
    %123 = vector.load %arg10[%122, %c5_90, %c16_91, %c0_92] : memref<2x8x21x4xbf16, #tpu.memory_space<vmem>>, vector<1x1x5x4xbf16>
    %124 = vector.shape_cast %123 : vector<1x1x5x4xbf16> to vector<5x4xbf16>
    %125 = vector.shape_cast %121 : vector<5x4xbf16> to vector<1x1x5x4xbf16>
    tpu.vector_store %arg10[%122, %c5_90, %c16_91, %c0_92], %125 {strides = array<i32>} : memref<2x8x21x4xbf16, #tpu.memory_space<vmem>>, vector<1x1x5x4xbf16>,
    %c6 = arith.constant 6 : index
    %c0_93 = arith.constant 0 : index
    %c0_94 = arith.constant 0 : index
    %126 = vector.load %arg4[%c6, %c0_93, %c0_94] : memref<8x8x4xbf16, #tpu.memory_space<vmem>>, vector<1x8x4xbf16>
    %127 = vector.shape_cast %126 : vector<1x8x4xbf16> to vector<8x4xbf16>
    %cst_95 = arith.constant dense<0.000000e+00> : vector<16x4xf32>
    %128 = tpu.matmul %14, %127, %cst_95 {dimension_numbers = #tpu.dot_dimension_numbers<[1], [0], [0], [1], [0, 0, 1, 1], [], []>} : vector<16x8xbf16>, vector<8x4xbf16>, vector<16x4xf32> -> vector<16x4xf32>
    %129 = arith.addf %128, %17 : vector<16x4xf32>
    %c0_96 = arith.constant 0 : index
    %c0_97 = arith.constant 0 : index
    %c6_98 = arith.constant 6 : index
    %c0_99 = arith.constant 0 : index
    %c0_100 = arith.constant 0 : index
    %130 = vector.load %arg3[%c0_96, %c0_97, %c6_98, %c0_99, %c0_100] : memref<1x1x8x16x4xbf16, #tpu.memory_space<vmem>>, vector<1x1x1x16x4xbf16>
    %131 = vector.shape_cast %130 : vector<1x1x1x16x4xbf16> to vector<16x4xbf16>
    %132 = arith.extf %131 : vector<16x4xbf16> to vector<16x4xf32>
    %133 = arith.addf %129, %132 : vector<16x4xf32>
    %134 = arith.truncf %133 : vector<16x4xf32> to vector<16x4xbf16>
    %135 = arith.index_cast %9 : i32 to index
    %c6_101 = arith.constant 6 : index
    %c0_102 = arith.constant 0 : index
    %c0_103 = arith.constant 0 : index
    %136 = vector.load %arg10[%135, %c6_101, %c0_102, %c0_103] : memref<2x8x21x4xbf16, #tpu.memory_space<vmem>>, vector<1x1x16x4xbf16>
    %137 = vector.shape_cast %136 : vector<1x1x16x4xbf16> to vector<16x4xbf16>
    %138 = vector.shape_cast %134 : vector<16x4xbf16> to vector<1x1x16x4xbf16>
    tpu.vector_store %arg10[%135, %c6_101, %c0_102, %c0_103], %138 {strides = array<i32>} : memref<2x8x21x4xbf16, #tpu.memory_space<vmem>>, vector<1x1x16x4xbf16>,
    %139 = vector.extract_strided_slice %134 {offsets = [0, 0], sizes = [5, 4], strides = [1, 1]} : vector<16x4xbf16> to vector<5x4xbf16>
    %140 = arith.index_cast %9 : i32 to index
    %c6_104 = arith.constant 6 : index
    %c16_105 = arith.constant 16 : index
    %c0_106 = arith.constant 0 : index
    %141 = vector.load %arg10[%140, %c6_104, %c16_105, %c0_106] : memref<2x8x21x4xbf16, #tpu.memory_space<vmem>>, vector<1x1x5x4xbf16>
    %142 = vector.shape_cast %141 : vector<1x1x5x4xbf16> to vector<5x4xbf16>
    %143 = vector.shape_cast %139 : vector<5x4xbf16> to vector<1x1x5x4xbf16>
    tpu.vector_store %arg10[%140, %c6_104, %c16_105, %c0_106], %143 {strides = array<i32>} : memref<2x8x21x4xbf16, #tpu.memory_space<vmem>>, vector<1x1x5x4xbf16>,
    %c7 = arith.constant 7 : index
    %c0_107 = arith.constant 0 : index
    %c0_108 = arith.constant 0 : index
    %144 = vector.load %arg4[%c7, %c0_107, %c0_108] : memref<8x8x4xbf16, #tpu.memory_space<vmem>>, vector<1x8x4xbf16>
    %145 = vector.shape_cast %144 : vector<1x8x4xbf16> to vector<8x4xbf16>
    %cst_109 = arith.constant dense<0.000000e+00> : vector<16x4xf32>
    %146 = tpu.matmul %14, %145, %cst_109 {dimension_numbers = #tpu.dot_dimension_numbers<[1], [0], [0], [1], [0, 0, 1, 1], [], []>} : vector<16x8xbf16>, vector<8x4xbf16>, vector<16x4xf32> -> vector<16x4xf32>
    %147 = arith.addf %146, %17 : vector<16x4xf32>
    %c0_110 = arith.constant 0 : index
    %c0_111 = arith.constant 0 : index
    %c7_112 = arith.constant 7 : index
    %c0_113 = arith.constant 0 : index
    %c0_114 = arith.constant 0 : index
    %148 = vector.load %arg3[%c0_110, %c0_111, %c7_112, %c0_113, %c0_114] : memref<1x1x8x16x4xbf16, #tpu.memory_space<vmem>>, vector<1x1x1x16x4xbf16>
    %149 = vector.shape_cast %148 : vector<1x1x1x16x4xbf16> to vector<16x4xbf16>
    %150 = arith.extf %149 : vector<16x4xbf16> to vector<16x4xf32>
    %151 = arith.addf %147, %150 : vector<16x4xf32>
    %152 = arith.truncf %151 : vector<16x4xf32> to vector<16x4xbf16>
    %153 = arith.index_cast %9 : i32 to index
    %c7_115 = arith.constant 7 : index
    %c0_116 = arith.constant 0 : index
    %c0_117 = arith.constant 0 : index
    %154 = vector.load %arg10[%153, %c7_115, %c0_116, %c0_117] : memref<2x8x21x4xbf16, #tpu.memory_space<vmem>>, vector<1x1x16x4xbf16>
    %155 = vector.shape_cast %154 : vector<1x1x16x4xbf16> to vector<16x4xbf16>
    %156 = vector.shape_cast %152 : vector<16x4xbf16> to vector<1x1x16x4xbf16>
    tpu.vector_store %arg10[%153, %c7_115, %c0_116, %c0_117], %156 {strides = array<i32>} : memref<2x8x21x4xbf16, #tpu.memory_space<vmem>>, vector<1x1x16x4xbf16>,
    %157 = vector.extract_strided_slice %152 {offsets = [0, 0], sizes = [5, 4], strides = [1, 1]} : vector<16x4xbf16> to vector<5x4xbf16>
    %158 = arith.index_cast %9 : i32 to index
    %c7_118 = arith.constant 7 : index
    %c16_119 = arith.constant 16 : index
    %c0_120 = arith.constant 0 : index
    %159 = vector.load %arg10[%158, %c7_118, %c16_119, %c0_120] : memref<2x8x21x4xbf16, #tpu.memory_space<vmem>>, vector<1x1x5x4xbf16>
    %160 = vector.shape_cast %159 : vector<1x1x5x4xbf16> to vector<5x4xbf16>
    %161 = vector.shape_cast %157 : vector<5x4xbf16> to vector<1x1x5x4xbf16>
    tpu.vector_store %arg10[%158, %c7_118, %c16_119, %c0_120], %161 {strides = array<i32>} : memref<2x8x21x4xbf16, #tpu.memory_space<vmem>>, vector<1x1x5x4xbf16>,
    %c0_121 = arith.constant 0 : index
    %c0_122 = arith.constant 0 : index
    %162 = vector.load %arg7[%c0_121, %c0_122] : memref<1x4xf32, #tpu.memory_space<vmem>>, vector<1x4xf32>
    %163 = vector.shape_cast %162 : vector<1x4xf32> to vector<1x4xf32>
    %164 = vector.broadcast %163 : vector<1x4xf32> to vector<16x4xf32>
    %c0_123 = arith.constant 0 : index
    %c0_124 = arith.constant 0 : index
    %165 = vector.load %arg8[%c0_123, %c0_124] : memref<1x4xf32, #tpu.memory_space<vmem>>, vector<1x4xf32>
    %166 = vector.shape_cast %165 : vector<1x4xf32> to vector<1x4xf32>
    %167 = vector.broadcast %166 : vector<1x4xf32> to vector<16x4xf32>
    %c0_125 = arith.constant 0 : index
    %c0_126 = arith.constant 0 : index
    %c0_127 = arith.constant 0 : index
    %168 = vector.load %arg6[%c0_125, %c0_126, %c0_127] : memref<8x4x4xbf16, #tpu.memory_space<vmem>>, vector<1x4x4xbf16>
    %169 = vector.shape_cast %168 : vector<1x4x4xbf16> to vector<4x4xbf16>
    %c1_128 = arith.constant 1 : index
    %c0_129 = arith.constant 0 : index
    %c0_130 = arith.constant 0 : index
    %170 = vector.load %arg6[%c1_128, %c0_129, %c0_130] : memref<8x4x4xbf16, #tpu.memory_space<vmem>>, vector<1x4x4xbf16>
    %171 = vector.shape_cast %170 : vector<1x4x4xbf16> to vector<4x4xbf16>
    %c2_131 = arith.constant 2 : index
    %c0_132 = arith.constant 0 : index
    %c0_133 = arith.constant 0 : index
    %172 = vector.load %arg6[%c2_131, %c0_132, %c0_133] : memref<8x4x4xbf16, #tpu.memory_space<vmem>>, vector<1x4x4xbf16>
    %173 = vector.shape_cast %172 : vector<1x4x4xbf16> to vector<4x4xbf16>
    %c3_134 = arith.constant 3 : index
    %c0_135 = arith.constant 0 : index
    %c0_136 = arith.constant 0 : index
    %174 = vector.load %arg6[%c3_134, %c0_135, %c0_136] : memref<8x4x4xbf16, #tpu.memory_space<vmem>>, vector<1x4x4xbf16>
    %175 = vector.shape_cast %174 : vector<1x4x4xbf16> to vector<4x4xbf16>
    %c4_137 = arith.constant 4 : index
    %c0_138 = arith.constant 0 : index
    %c0_139 = arith.constant 0 : index
    %176 = vector.load %arg6[%c4_137, %c0_138, %c0_139] : memref<8x4x4xbf16, #tpu.memory_space<vmem>>, vector<1x4x4xbf16>
    %177 = vector.shape_cast %176 : vector<1x4x4xbf16> to vector<4x4xbf16>
    %c5_140 = arith.constant 5 : index
    %c0_141 = arith.constant 0 : index
    %c0_142 = arith.constant 0 : index
    %178 = vector.load %arg6[%c5_140, %c0_141, %c0_142] : memref<8x4x4xbf16, #tpu.memory_space<vmem>>, vector<1x4x4xbf16>
    %179 = vector.shape_cast %178 : vector<1x4x4xbf16> to vector<4x4xbf16>
    %c6_143 = arith.constant 6 : index
    %c0_144 = arith.constant 0 : index
    %c0_145 = arith.constant 0 : index
    %180 = vector.load %arg6[%c6_143, %c0_144, %c0_145] : memref<8x4x4xbf16, #tpu.memory_space<vmem>>, vector<1x4x4xbf16>
    %181 = vector.shape_cast %180 : vector<1x4x4xbf16> to vector<4x4xbf16>
    %c7_146 = arith.constant 7 : index
    %c0_147 = arith.constant 0 : index
    %c0_148 = arith.constant 0 : index
    %182 = vector.load %arg6[%c7_146, %c0_147, %c0_148] : memref<8x4x4xbf16, #tpu.memory_space<vmem>>, vector<1x4x4xbf16>
    %183 = vector.shape_cast %182 : vector<1x4x4xbf16> to vector<4x4xbf16>
    %184 = arith.index_cast %9 : i32 to index
    %c0_149 = arith.constant 0 : index
    %c0_150 = arith.constant 0 : index
    %c0_151 = arith.constant 0 : index
    %185 = vector.load %arg10[%184, %c0_149, %c0_150, %c0_151] : memref<2x8x21x4xbf16, #tpu.memory_space<vmem>>, vector<1x1x16x4xbf16>
    %186 = vector.shape_cast %185 : vector<1x1x16x4xbf16> to vector<16x4xbf16>
    %cst_152 = arith.constant dense<0.000000e+00> : vector<16x4xf32>
    %187 = tpu.matmul %186, %169, %cst_152 {dimension_numbers = #tpu.dot_dimension_numbers<[1], [0], [0], [1], [0, 0, 1, 1], [], []>} : vector<16x4xbf16>, vector<4x4xbf16>, vector<16x4xf32> -> vector<16x4xf32>
    %188 = arith.addf %164, %187 : vector<16x4xf32>
    %189 = arith.index_cast %9 : i32 to index
    %c1_153 = arith.constant 1 : index
    %c0_154 = arith.constant 0 : index
    %c0_155 = arith.constant 0 : index
    %190 = vector.load %arg10[%189, %c1_153, %c0_154, %c0_155] : memref<2x8x21x4xbf16, #tpu.memory_space<vmem>>, vector<1x1x16x4xbf16>
    %191 = vector.shape_cast %190 : vector<1x1x16x4xbf16> to vector<16x4xbf16>
    %cst_156 = arith.constant dense<0.000000e+00> : vector<16x4xf32>
    %192 = tpu.matmul %191, %171, %cst_156 {dimension_numbers = #tpu.dot_dimension_numbers<[1], [0], [0], [1], [0, 0, 1, 1], [], []>} : vector<16x4xbf16>, vector<4x4xbf16>, vector<16x4xf32> -> vector<16x4xf32>
    %193 = arith.addf %188, %192 : vector<16x4xf32>
    %194 = arith.index_cast %9 : i32 to index
    %c2_157 = arith.constant 2 : index
    %c0_158 = arith.constant 0 : index
    %c0_159 = arith.constant 0 : index
    %195 = vector.load %arg10[%194, %c2_157, %c0_158, %c0_159] : memref<2x8x21x4xbf16, #tpu.memory_space<vmem>>, vector<1x1x16x4xbf16>
    %196 = vector.shape_cast %195 : vector<1x1x16x4xbf16> to vector<16x4xbf16>
    %cst_160 = arith.constant dense<0.000000e+00> : vector<16x4xf32>
    %197 = tpu.matmul %196, %173, %cst_160 {dimension_numbers = #tpu.dot_dimension_numbers<[1], [0], [0], [1], [0, 0, 1, 1], [], []>} : vector<16x4xbf16>, vector<4x4xbf16>, vector<16x4xf32> -> vector<16x4xf32>
    %198 = arith.addf %193, %197 : vector<16x4xf32>
    %199 = arith.index_cast %9 : i32 to index
    %c3_161 = arith.constant 3 : index
    %c0_162 = arith.constant 0 : index
    %c0_163 = arith.constant 0 : index
    %200 = vector.load %arg10[%199, %c3_161, %c0_162, %c0_163] : memref<2x8x21x4xbf16, #tpu.memory_space<vmem>>, vector<1x1x16x4xbf16>
    %201 = vector.shape_cast %200 : vector<1x1x16x4xbf16> to vector<16x4xbf16>
    %cst_164 = arith.constant dense<0.000000e+00> : vector<16x4xf32>
    %202 = tpu.matmul %201, %175, %cst_164 {dimension_numbers = #tpu.dot_dimension_numbers<[1], [0], [0], [1], [0, 0, 1, 1], [], []>} : vector<16x4xbf16>, vector<4x4xbf16>, vector<16x4xf32> -> vector<16x4xf32>
    %203 = arith.addf %198, %202 : vector<16x4xf32>
    %204 = arith.index_cast %9 : i32 to index
    %c4_165 = arith.constant 4 : index
    %c0_166 = arith.constant 0 : index
    %c0_167 = arith.constant 0 : index
    %205 = vector.load %arg10[%204, %c4_165, %c0_166, %c0_167] : memref<2x8x21x4xbf16, #tpu.memory_space<vmem>>, vector<1x1x16x4xbf16>
    %206 = vector.shape_cast %205 : vector<1x1x16x4xbf16> to vector<16x4xbf16>
    %cst_168 = arith.constant dense<0.000000e+00> : vector<16x4xf32>
    %207 = tpu.matmul %206, %177, %cst_168 {dimension_numbers = #tpu.dot_dimension_numbers<[1], [0], [0], [1], [0, 0, 1, 1], [], []>} : vector<16x4xbf16>, vector<4x4xbf16>, vector<16x4xf32> -> vector<16x4xf32>
    %208 = arith.addf %203, %207 : vector<16x4xf32>
    %209 = arith.index_cast %9 : i32 to index
    %c5_169 = arith.constant 5 : index
    %c0_170 = arith.constant 0 : index
    %c0_171 = arith.constant 0 : index
    %210 = vector.load %arg10[%209, %c5_169, %c0_170, %c0_171] : memref<2x8x21x4xbf16, #tpu.memory_space<vmem>>, vector<1x1x16x4xbf16>
    %211 = vector.shape_cast %210 : vector<1x1x16x4xbf16> to vector<16x4xbf16>
    %cst_172 = arith.constant dense<0.000000e+00> : vector<16x4xf32>
    %212 = tpu.matmul %211, %179, %cst_172 {dimension_numbers = #tpu.dot_dimension_numbers<[1], [0], [0], [1], [0, 0, 1, 1], [], []>} : vector<16x4xbf16>, vector<4x4xbf16>, vector<16x4xf32> -> vector<16x4xf32>
    %213 = arith.addf %208, %212 : vector<16x4xf32>
    %214 = arith.index_cast %9 : i32 to index
    %c6_173 = arith.constant 6 : index
    %c0_174 = arith.constant 0 : index
    %c0_175 = arith.constant 0 : index
    %215 = vector.load %arg10[%214, %c6_173, %c0_174, %c0_175] : memref<2x8x21x4xbf16, #tpu.memory_space<vmem>>, vector<1x1x16x4xbf16>
    %216 = vector.shape_cast %215 : vector<1x1x16x4xbf16> to vector<16x4xbf16>
    %cst_176 = arith.constant dense<0.000000e+00> : vector<16x4xf32>
    %217 = tpu.matmul %216, %181, %cst_176 {dimension_numbers = #tpu.dot_dimension_numbers<[1], [0], [0], [1], [0, 0, 1, 1], [], []>} : vector<16x4xbf16>, vector<4x4xbf16>, vector<16x4xf32> -> vector<16x4xf32>
    %218 = arith.addf %213, %217 : vector<16x4xf32>
    %219 = arith.index_cast %9 : i32 to index
    %c7_177 = arith.constant 7 : index
    %c0_178 = arith.constant 0 : index
    %c0_179 = arith.constant 0 : index
    %220 = vector.load %arg10[%219, %c7_177, %c0_178, %c0_179] : memref<2x8x21x4xbf16, #tpu.memory_space<vmem>>, vector<1x1x16x4xbf16>
    %221 = vector.shape_cast %220 : vector<1x1x16x4xbf16> to vector<16x4xbf16>
    %cst_180 = arith.constant dense<0.000000e+00> : vector<16x4xf32>
    %222 = tpu.matmul %221, %183, %cst_180 {dimension_numbers = #tpu.dot_dimension_numbers<[1], [0], [0], [1], [0, 0, 1, 1], [], []>} : vector<16x4xbf16>, vector<4x4xbf16>, vector<16x4xf32> -> vector<16x4xf32>
    %223 = arith.addf %218, %222 : vector<16x4xf32>
    %cst_181 = arith.constant 0.000000e+00 : f32
    %224 = vector.broadcast %cst_181 : f32 to vector<16x4xf32>
    %225 = arith.cmpf oge, %223, %224 : vector<16x4xf32>
    %226 = arith.mulf %167, %223 : vector<16x4xf32>
    %227 = arith.select %225, %223, %226 : vector<16x4xi1>, vector<16x4xf32>
    %228 = arith.truncf %227 : vector<16x4xf32> to vector<16x4xbf16>
    %c0_182 = arith.constant 0 : index
    %c0_183 = arith.constant 0 : index
    %c0_184 = arith.constant 0 : index
    %c0_185 = arith.constant 0 : index
    %c0_186 = arith.constant 0 : index
    %229 = vector.load %arg9[%c0_182, %c0_183, %c0_184, %c0_185, %c0_186] : memref<1x1x8x16x4xbf16, #tpu.memory_space<vmem>>, vector<1x1x1x16x4xbf16>
    %230 = vector.shape_cast %229 : vector<1x1x1x16x4xbf16> to vector<16x4xbf16>
    %231 = vector.shape_cast %228 : vector<16x4xbf16> to vector<1x1x1x16x4xbf16>
    tpu.vector_store %arg9[%c0_182, %c0_183, %c0_184, %c0_185, %c0_186], %231 {strides = array<i32>} : memref<1x1x8x16x4xbf16, #tpu.memory_space<vmem>>, vector<1x1x1x16x4xbf16>,
    %232 = arith.index_cast %9 : i32 to index
    %c1_187 = arith.constant 1 : index
    %c0_188 = arith.constant 0 : index
    %c0_189 = arith.constant 0 : index
    %233 = vector.load %arg10[%232, %c1_187, %c0_188, %c0_189] : memref<2x8x21x4xbf16, #tpu.memory_space<vmem>>, vector<1x1x16x4xbf16>
    %234 = vector.shape_cast %233 : vector<1x1x16x4xbf16> to vector<16x4xbf16>
    %cst_190 = arith.constant dense<0.000000e+00> : vector<16x4xf32>
    %235 = tpu.matmul %234, %169, %cst_190 {dimension_numbers = #tpu.dot_dimension_numbers<[1], [0], [0], [1], [0, 0, 1, 1], [], []>} : vector<16x4xbf16>, vector<4x4xbf16>, vector<16x4xf32> -> vector<16x4xf32>
    %236 = arith.addf %164, %235 : vector<16x4xf32>
    %237 = arith.index_cast %9 : i32 to index
    %c0_191 = arith.constant 0 : index
    %c1_192 = arith.constant 1 : index
    %c0_193 = arith.constant 0 : index
    %238 = vector.load %arg10[%237, %c0_191, %c1_192, %c0_193] : memref<2x8x21x4xbf16, #tpu.memory_space<vmem>>, vector<1x1x16x4xbf16>
    %239 = vector.shape_cast %238 : vector<1x1x16x4xbf16> to vector<16x4xbf16>
    %cst_194 = arith.constant dense<0.000000e+00> : vector<16x4xf32>
    %240 = tpu.matmul %239, %171, %cst_194 {dimension_numbers = #tpu.dot_dimension_numbers<[1], [0], [0], [1], [0, 0, 1, 1], [], []>} : vector<16x4xbf16>, vector<4x4xbf16>, vector<16x4xf32> -> vector<16x4xf32>
    %241 = arith.addf %236, %240 : vector<16x4xf32>
    %242 = arith.index_cast %9 : i32 to index
    %c3_195 = arith.constant 3 : index
    %c0_196 = arith.constant 0 : index
    %c0_197 = arith.constant 0 : index
    %243 = vector.load %arg10[%242, %c3_195, %c0_196, %c0_197] : memref<2x8x21x4xbf16, #tpu.memory_space<vmem>>, vector<1x1x16x4xbf16>
    %244 = vector.shape_cast %243 : vector<1x1x16x4xbf16> to vector<16x4xbf16>
    %cst_198 = arith.constant dense<0.000000e+00> : vector<16x4xf32>
    %245 = tpu.matmul %244, %173, %cst_198 {dimension_numbers = #tpu.dot_dimension_numbers<[1], [0], [0], [1], [0, 0, 1, 1], [], []>} : vector<16x4xbf16>, vector<4x4xbf16>, vector<16x4xf32> -> vector<16x4xf32>
    %246 = arith.addf %241, %245 : vector<16x4xf32>
    %247 = arith.index_cast %9 : i32 to index
    %c2_199 = arith.constant 2 : index
    %c1_200 = arith.constant 1 : index
    %c0_201 = arith.constant 0 : index
    %248 = vector.load %arg10[%247, %c2_199, %c1_200, %c0_201] : memref<2x8x21x4xbf16, #tpu.memory_space<vmem>>, vector<1x1x16x4xbf16>
    %249 = vector.shape_cast %248 : vector<1x1x16x4xbf16> to vector<16x4xbf16>
    %cst_202 = arith.constant dense<0.000000e+00> : vector<16x4xf32>
    %250 = tpu.matmul %249, %175, %cst_202 {dimension_numbers = #tpu.dot_dimension_numbers<[1], [0], [0], [1], [0, 0, 1, 1], [], []>} : vector<16x4xbf16>, vector<4x4xbf16>, vector<16x4xf32> -> vector<16x4xf32>
    %251 = arith.addf %246, %250 : vector<16x4xf32>
    %252 = arith.index_cast %9 : i32 to index
    %c5_203 = arith.constant 5 : index
    %c0_204 = arith.constant 0 : index
    %c0_205 = arith.constant 0 : index
    %253 = vector.load %arg10[%252, %c5_203, %c0_204, %c0_205] : memref<2x8x21x4xbf16, #tpu.memory_space<vmem>>, vector<1x1x16x4xbf16>
    %254 = vector.shape_cast %253 : vector<1x1x16x4xbf16> to vector<16x4xbf16>
    %cst_206 = arith.constant dense<0.000000e+00> : vector<16x4xf32>
    %255 = tpu.matmul %254, %177, %cst_206 {dimension_numbers = #tpu.dot_dimension_numbers<[1], [0], [0], [1], [0, 0, 1, 1], [], []>} : vector<16x4xbf16>, vector<4x4xbf16>, vector<16x4xf32> -> vector<16x4xf32>
    %256 = arith.addf %251, %255 : vector<16x4xf32>
    %257 = arith.index_cast %9 : i32 to index
    %c4_207 = arith.constant 4 : index
    %c1_208 = arith.constant 1 : index
    %c0_209 = arith.constant 0 : index
    %258 = vector.load %arg10[%257, %c4_207, %c1_208, %c0_209] : memref<2x8x21x4xbf16, #tpu.memory_space<vmem>>, vector<1x1x16x4xbf16>
    %259 = vector.shape_cast %258 : vector<1x1x16x4xbf16> to vector<16x4xbf16>
    %cst_210 = arith.constant dense<0.000000e+00> : vector<16x4xf32>
    %260 = tpu.matmul %259, %179, %cst_210 {dimension_numbers = #tpu.dot_dimension_numbers<[1], [0], [0], [1], [0, 0, 1, 1], [], []>} : vector<16x4xbf16>, vector<4x4xbf16>, vector<16x4xf32> -> vector<16x4xf32>
    %261 = arith.addf %256, %260 : vector<16x4xf32>
    %262 = arith.index_cast %9 : i32 to index
    %c7_211 = arith.constant 7 : index
    %c0_212 = arith.constant 0 : index
    %c0_213 = arith.constant 0 : index
    %263 = vector.load %arg10[%262, %c7_211, %c0_212, %c0_213] : memref<2x8x21x4xbf16, #tpu.memory_space<vmem>>, vector<1x1x16x4xbf16>
    %264 = vector.shape_cast %263 : vector<1x1x16x4xbf16> to vector<16x4xbf16>
    %cst_214 = arith.constant dense<0.000000e+00> : vector<16x4xf32>
    %265 = tpu.matmul %264, %181, %cst_214 {dimension_numbers = #tpu.dot_dimension_numbers<[1], [0], [0], [1], [0, 0, 1, 1], [], []>} : vector<16x4xbf16>, vector<4x4xbf16>, vector<16x4xf32> -> vector<16x4xf32>
    %266 = arith.addf %261, %265 : vector<16x4xf32>
    %267 = arith.index_cast %9 : i32 to index
    %c6_215 = arith.constant 6 : index
    %c1_216 = arith.constant 1 : index
    %c0_217 = arith.constant 0 : index
    %268 = vector.load %arg10[%267, %c6_215, %c1_216, %c0_217] : memref<2x8x21x4xbf16, #tpu.memory_space<vmem>>, vector<1x1x16x4xbf16>
    %269 = vector.shape_cast %268 : vector<1x1x16x4xbf16> to vector<16x4xbf16>
    %cst_218 = arith.constant dense<0.000000e+00> : vector<16x4xf32>
    %270 = tpu.matmul %269, %183, %cst_218 {dimension_numbers = #tpu.dot_dimension_numbers<[1], [0], [0], [1], [0, 0, 1, 1], [], []>} : vector<16x4xbf16>, vector<4x4xbf16>, vector<16x4xf32> -> vector<16x4xf32>
    %271 = arith.addf %266, %270 : vector<16x4xf32>
    %cst_219 = arith.constant 0.000000e+00 : f32
    %272 = vector.broadcast %cst_219 : f32 to vector<16x4xf32>
    %273 = arith.cmpf oge, %271, %272 : vector<16x4xf32>
    %274 = arith.mulf %167, %271 : vector<16x4xf32>
    %275 = arith.select %273, %271, %274 : vector<16x4xi1>, vector<16x4xf32>
    %276 = arith.truncf %275 : vector<16x4xf32> to vector<16x4xbf16>
    %c0_220 = arith.constant 0 : index
    %c0_221 = arith.constant 0 : index
    %c1_222 = arith.constant 1 : index
    %c0_223 = arith.constant 0 : index
    %c0_224 = arith.constant 0 : index
    %277 = vector.load %arg9[%c0_220, %c0_221, %c1_222, %c0_223, %c0_224] : memref<1x1x8x16x4xbf16, #tpu.memory_space<vmem>>, vector<1x1x1x16x4xbf16>
    %278 = vector.shape_cast %277 : vector<1x1x1x16x4xbf16> to vector<16x4xbf16>
    %279 = vector.shape_cast %276 : vector<16x4xbf16> to vector<1x1x1x16x4xbf16>
    tpu.vector_store %arg9[%c0_220, %c0_221, %c1_222, %c0_223, %c0_224], %279 {strides = array<i32>} : memref<1x1x8x16x4xbf16, #tpu.memory_space<vmem>>, vector<1x1x1x16x4xbf16>,
    %280 = arith.index_cast %9 : i32 to index
    %c2_225 = arith.constant 2 : index
    %c0_226 = arith.constant 0 : index
    %c0_227 = arith.constant 0 : index
    %281 = vector.load %arg10[%280, %c2_225, %c0_226, %c0_227] : memref<2x8x21x4xbf16, #tpu.memory_space<vmem>>, vector<1x1x16x4xbf16>
    %282 = vector.shape_cast %281 : vector<1x1x16x4xbf16> to vector<16x4xbf16>
    %cst_228 = arith.constant dense<0.000000e+00> : vector<16x4xf32>
    %283 = tpu.matmul %282, %169, %cst_228 {dimension_numbers = #tpu.dot_dimension_numbers<[1], [0], [0], [1], [0, 0, 1, 1], [], []>} : vector<16x4xbf16>, vector<4x4xbf16>, vector<16x4xf32> -> vector<16x4xf32>
    %284 = arith.addf %164, %283 : vector<16x4xf32>
    %285 = arith.index_cast %9 : i32 to index
    %c3_229 = arith.constant 3 : index
    %c0_230 = arith.constant 0 : index
    %c0_231 = arith.constant 0 : index
    %286 = vector.load %arg10[%285, %c3_229, %c0_230, %c0_231] : memref<2x8x21x4xbf16, #tpu.memory_space<vmem>>, vector<1x1x16x4xbf16>
    %287 = vector.shape_cast %286 : vector<1x1x16x4xbf16> to vector<16x4xbf16>
    %cst_232 = arith.constant dense<0.000000e+00> : vector<16x4xf32>
    %288 = tpu.matmul %287, %171, %cst_232 {dimension_numbers = #tpu.dot_dimension_numbers<[1], [0], [0], [1], [0, 0, 1, 1], [], []>} : vector<16x4xbf16>, vector<4x4xbf16>, vector<16x4xf32> -> vector<16x4xf32>
    %289 = arith.addf %284, %288 : vector<16x4xf32>
    %290 = arith.index_cast %9 : i32 to index
    %c0_233 = arith.constant 0 : index
    %c4_234 = arith.constant 4 : index
    %c0_235 = arith.constant 0 : index
    %291 = vector.load %arg10[%290, %c0_233, %c4_234, %c0_235] : memref<2x8x21x4xbf16, #tpu.memory_space<vmem>>, vector<1x1x16x4xbf16>
    %292 = vector.shape_cast %291 : vector<1x1x16x4xbf16> to vector<16x4xbf16>
    %cst_236 = arith.constant dense<0.000000e+00> : vector<16x4xf32>
    %293 = tpu.matmul %292, %173, %cst_236 {dimension_numbers = #tpu.dot_dimension_numbers<[1], [0], [0], [1], [0, 0, 1, 1], [], []>} : vector<16x4xbf16>, vector<4x4xbf16>, vector<16x4xf32> -> vector<16x4xf32>
    %294 = arith.addf %289, %293 : vector<16x4xf32>
    %295 = arith.index_cast %9 : i32 to index
    %c1_237 = arith.constant 1 : index
    %c4_238 = arith.constant 4 : index
    %c0_239 = arith.constant 0 : index
    %296 = vector.load %arg10[%295, %c1_237, %c4_238, %c0_239] : memref<2x8x21x4xbf16, #tpu.memory_space<vmem>>, vector<1x1x16x4xbf16>
    %297 = vector.shape_cast %296 : vector<1x1x16x4xbf16> to vector<16x4xbf16>
    %cst_240 = arith.constant dense<0.000000e+00> : vector<16x4xf32>
    %298 = tpu.matmul %297, %175, %cst_240 {dimension_numbers = #tpu.dot_dimension_numbers<[1], [0], [0], [1], [0, 0, 1, 1], [], []>} : vector<16x4xbf16>, vector<4x4xbf16>, vector<16x4xf32> -> vector<16x4xf32>
    %299 = arith.addf %294, %298 : vector<16x4xf32>
    %300 = arith.index_cast %9 : i32 to index
    %c6_241 = arith.constant 6 : index
    %c0_242 = arith.constant 0 : index
    %c0_243 = arith.constant 0 : index
    %301 = vector.load %arg10[%300, %c6_241, %c0_242, %c0_243] : memref<2x8x21x4xbf16, #tpu.memory_space<vmem>>, vector<1x1x16x4xbf16>
    %302 = vector.shape_cast %301 : vector<1x1x16x4xbf16> to vector<16x4xbf16>
    %cst_244 = arith.constant dense<0.000000e+00> : vector<16x4xf32>
    %303 = tpu.matmul %302, %177, %cst_244 {dimension_numbers = #tpu.dot_dimension_numbers<[1], [0], [0], [1], [0, 0, 1, 1], [], []>} : vector<16x4xbf16>, vector<4x4xbf16>, vector<16x4xf32> -> vector<16x4xf32>
    %304 = arith.addf %299, %303 : vector<16x4xf32>
    %305 = arith.index_cast %9 : i32 to index
    %c7_245 = arith.constant 7 : index
    %c0_246 = arith.constant 0 : index
    %c0_247 = arith.constant 0 : index
    %306 = vector.load %arg10[%305, %c7_245, %c0_246, %c0_247] : memref<2x8x21x4xbf16, #tpu.memory_space<vmem>>, vector<1x1x16x4xbf16>
    %307 = vector.shape_cast %306 : vector<1x1x16x4xbf16> to vector<16x4xbf16>
    %cst_248 = arith.constant dense<0.000000e+00> : vector<16x4xf32>
    %308 = tpu.matmul %307, %179, %cst_248 {dimension_numbers = #tpu.dot_dimension_numbers<[1], [0], [0], [1], [0, 0, 1, 1], [], []>} : vector<16x4xbf16>, vector<4x4xbf16>, vector<16x4xf32> -> vector<16x4xf32>
    %309 = arith.addf %304, %308 : vector<16x4xf32>
    %310 = arith.index_cast %9 : i32 to index
    %c4_249 = arith.constant 4 : index
    %c4_250 = arith.constant 4 : index
    %c0_251 = arith.constant 0 : index
    %311 = vector.load %arg10[%310, %c4_249, %c4_250, %c0_251] : memref<2x8x21x4xbf16, #tpu.memory_space<vmem>>, vector<1x1x16x4xbf16>
    %312 = vector.shape_cast %311 : vector<1x1x16x4xbf16> to vector<16x4xbf16>
    %cst_252 = arith.constant dense<0.000000e+00> : vector<16x4xf32>
    %313 = tpu.matmul %312, %181, %cst_252 {dimension_numbers = #tpu.dot_dimension_numbers<[1], [0], [0], [1], [0, 0, 1, 1], [], []>} : vector<16x4xbf16>, vector<4x4xbf16>, vector<16x4xf32> -> vector<16x4xf32>
    %314 = arith.addf %309, %313 : vector<16x4xf32>
    %315 = arith.index_cast %9 : i32 to index
    %c5_253 = arith.constant 5 : index
    %c4_254 = arith.constant 4 : index
    %c0_255 = arith.constant 0 : index
    %316 = vector.load %arg10[%315, %c5_253, %c4_254, %c0_255] : memref<2x8x21x4xbf16, #tpu.memory_space<vmem>>, vector<1x1x16x4xbf16>
    %317 = vector.shape_cast %316 : vector<1x1x16x4xbf16> to vector<16x4xbf16>
    %cst_256 = arith.constant dense<0.000000e+00> : vector<16x4xf32>
    %318 = tpu.matmul %317, %183, %cst_256 {dimension_numbers = #tpu.dot_dimension_numbers<[1], [0], [0], [1], [0, 0, 1, 1], [], []>} : vector<16x4xbf16>, vector<4x4xbf16>, vector<16x4xf32> -> vector<16x4xf32>
    %319 = arith.addf %314, %318 : vector<16x4xf32>
    %cst_257 = arith.constant 0.000000e+00 : f32
    %320 = vector.broadcast %cst_257 : f32 to vector<16x4xf32>
    %321 = arith.cmpf oge, %319, %320 : vector<16x4xf32>
    %322 = arith.mulf %167, %319 : vector<16x4xf32>
    %323 = arith.select %321, %319, %322 : vector<16x4xi1>, vector<16x4xf32>
    %324 = arith.truncf %323 : vector<16x4xf32> to vector<16x4xbf16>
    %c0_258 = arith.constant 0 : index
    %c0_259 = arith.constant 0 : index
    %c2_260 = arith.constant 2 : index
    %c0_261 = arith.constant 0 : index
    %c0_262 = arith.constant 0 : index
    %325 = vector.load %arg9[%c0_258, %c0_259, %c2_260, %c0_261, %c0_262] : memref<1x1x8x16x4xbf16, #tpu.memory_space<vmem>>, vector<1x1x1x16x4xbf16>
    %326 = vector.shape_cast %325 : vector<1x1x1x16x4xbf16> to vector<16x4xbf16>
    %327 = vector.shape_cast %324 : vector<16x4xbf16> to vector<1x1x1x16x4xbf16>
    tpu.vector_store %arg9[%c0_258, %c0_259, %c2_260, %c0_261, %c0_262], %327 {strides = array<i32>} : memref<1x1x8x16x4xbf16, #tpu.memory_space<vmem>>, vector<1x1x1x16x4xbf16>,
    %328 = arith.index_cast %9 : i32 to index
    %c3_263 = arith.constant 3 : index
    %c0_264 = arith.constant 0 : index
    %c0_265 = arith.constant 0 : index
    %329 = vector.load %arg10[%328, %c3_263, %c0_264, %c0_265] : memref<2x8x21x4xbf16, #tpu.memory_space<vmem>>, vector<1x1x16x4xbf16>
    %330 = vector.shape_cast %329 : vector<1x1x16x4xbf16> to vector<16x4xbf16>
    %cst_266 = arith.constant dense<0.000000e+00> : vector<16x4xf32>
    %331 = tpu.matmul %330, %169, %cst_266 {dimension_numbers = #tpu.dot_dimension_numbers<[1], [0], [0], [1], [0, 0, 1, 1], [], []>} : vector<16x4xbf16>, vector<4x4xbf16>, vector<16x4xf32> -> vector<16x4xf32>
    %332 = arith.addf %164, %331 : vector<16x4xf32>
    %333 = arith.index_cast %9 : i32 to index
    %c2_267 = arith.constant 2 : index
    %c1_268 = arith.constant 1 : index
    %c0_269 = arith.constant 0 : index
    %334 = vector.load %arg10[%333, %c2_267, %c1_268, %c0_269] : memref<2x8x21x4xbf16, #tpu.memory_space<vmem>>, vector<1x1x16x4xbf16>
    %335 = vector.shape_cast %334 : vector<1x1x16x4xbf16> to vector<16x4xbf16>
    %cst_270 = arith.constant dense<0.000000e+00> : vector<16x4xf32>
    %336 = tpu.matmul %335, %171, %cst_270 {dimension_numbers = #tpu.dot_dimension_numbers<[1], [0], [0], [1], [0, 0, 1, 1], [], []>} : vector<16x4xbf16>, vector<4x4xbf16>, vector<16x4xf32> -> vector<16x4xf32>
    %337 = arith.addf %332, %336 : vector<16x4xf32>
    %338 = arith.index_cast %9 : i32 to index
    %c1_271 = arith.constant 1 : index
    %c4_272 = arith.constant 4 : index
    %c0_273 = arith.constant 0 : index
    %339 = vector.load %arg10[%338, %c1_271, %c4_272, %c0_273] : memref<2x8x21x4xbf16, #tpu.memory_space<vmem>>, vector<1x1x16x4xbf16>
    %340 = vector.shape_cast %339 : vector<1x1x16x4xbf16> to vector<16x4xbf16>
    %cst_274 = arith.constant dense<0.000000e+00> : vector<16x4xf32>
    %341 = tpu.matmul %340, %173, %cst_274 {dimension_numbers = #tpu.dot_dimension_numbers<[1], [0], [0], [1], [0, 0, 1, 1], [], []>} : vector<16x4xbf16>, vector<4x4xbf16>, vector<16x4xf32> -> vector<16x4xf32>
    %342 = arith.addf %337, %341 : vector<16x4xf32>
    %343 = arith.index_cast %9 : i32 to index
    %c0_275 = arith.constant 0 : index
    %c5_276 = arith.constant 5 : index
    %c0_277 = arith.constant 0 : index
    %344 = vector.load %arg10[%343, %c0_275, %c5_276, %c0_277] : memref<2x8x21x4xbf16, #tpu.memory_space<vmem>>, vector<1x1x16x4xbf16>
    %345 = vector.shape_cast %344 : vector<1x1x16x4xbf16> to vector<16x4xbf16>
    %cst_278 = arith.constant dense<0.000000e+00> : vector<16x4xf32>
    %346 = tpu.matmul %345, %175, %cst_278 {dimension_numbers = #tpu.dot_dimension_numbers<[1], [0], [0], [1], [0, 0, 1, 1], [], []>} : vector<16x4xbf16>, vector<4x4xbf16>, vector<16x4xf32> -> vector<16x4xf32>
    %347 = arith.addf %342, %346 : vector<16x4xf32>
    %348 = arith.index_cast %9 : i32 to index
    %c7_279 = arith.constant 7 : index
    %c0_280 = arith.constant 0 : index
    %c0_281 = arith.constant 0 : index
    %349 = vector.load %arg10[%348, %c7_279, %c0_280, %c0_281] : memref<2x8x21x4xbf16, #tpu.memory_space<vmem>>, vector<1x1x16x4xbf16>
    %350 = vector.shape_cast %349 : vector<1x1x16x4xbf16> to vector<16x4xbf16>
    %cst_282 = arith.constant dense<0.000000e+00> : vector<16x4xf32>
    %351 = tpu.matmul %350, %177, %cst_282 {dimension_numbers = #tpu.dot_dimension_numbers<[1], [0], [0], [1], [0, 0, 1, 1], [], []>} : vector<16x4xbf16>, vector<4x4xbf16>, vector<16x4xf32> -> vector<16x4xf32>
    %352 = arith.addf %347, %351 : vector<16x4xf32>
    %353 = arith.index_cast %9 : i32 to index
    %c6_283 = arith.constant 6 : index
    %c1_284 = arith.constant 1 : index
    %c0_285 = arith.constant 0 : index
    %354 = vector.load %arg10[%353, %c6_283, %c1_284, %c0_285] : memref<2x8x21x4xbf16, #tpu.memory_space<vmem>>, vector<1x1x16x4xbf16>
    %355 = vector.shape_cast %354 : vector<1x1x16x4xbf16> to vector<16x4xbf16>
    %cst_286 = arith.constant dense<0.000000e+00> : vector<16x4xf32>
    %356 = tpu.matmul %355, %179, %cst_286 {dimension_numbers = #tpu.dot_dimension_numbers<[1], [0], [0], [1], [0, 0, 1, 1], [], []>} : vector<16x4xbf16>, vector<4x4xbf16>, vector<16x4xf32> -> vector<16x4xf32>
    %357 = arith.addf %352, %356 : vector<16x4xf32>
    %358 = arith.index_cast %9 : i32 to index
    %c5_287 = arith.constant 5 : index
    %c4_288 = arith.constant 4 : index
    %c0_289 = arith.constant 0 : index
    %359 = vector.load %arg10[%358, %c5_287, %c4_288, %c0_289] : memref<2x8x21x4xbf16, #tpu.memory_space<vmem>>, vector<1x1x16x4xbf16>
    %360 = vector.shape_cast %359 : vector<1x1x16x4xbf16> to vector<16x4xbf16>
    %cst_290 = arith.constant dense<0.000000e+00> : vector<16x4xf32>
    %361 = tpu.matmul %360, %181, %cst_290 {dimension_numbers = #tpu.dot_dimension_numbers<[1], [0], [0], [1], [0, 0, 1, 1], [], []>} : vector<16x4xbf16>, vector<4x4xbf16>, vector<16x4xf32> -> vector<16x4xf32>
    %362 = arith.addf %357, %361 : vector<16x4xf32>
    %363 = arith.index_cast %9 : i32 to index
    %c4_291 = arith.constant 4 : index
    %c5_292 = arith.constant 5 : index
    %c0_293 = arith.constant 0 : index
    %364 = vector.load %arg10[%363, %c4_291, %c5_292, %c0_293] : memref<2x8x21x4xbf16, #tpu.memory_space<vmem>>, vector<1x1x16x4xbf16>
    %365 = vector.shape_cast %364 : vector<1x1x16x4xbf16> to vector<16x4xbf16>
    %cst_294 = arith.constant dense<0.000000e+00> : vector<16x4xf32>
    %366 = tpu.matmul %365, %183, %cst_294 {dimension_numbers = #tpu.dot_dimension_numbers<[1], [0], [0], [1], [0, 0, 1, 1], [], []>} : vector<16x4xbf16>, vector<4x4xbf16>, vector<16x4xf32> -> vector<16x4xf32>
    %367 = arith.addf %362, %366 : vector<16x4xf32>
    %cst_295 = arith.constant 0.000000e+00 : f32
    %368 = vector.broadcast %cst_295 : f32 to vector<16x4xf32>
    %369 = arith.cmpf oge, %367, %368 : vector<16x4xf32>
    %370 = arith.mulf %167, %367 : vector<16x4xf32>
    %371 = arith.select %369, %367, %370 : vector<16x4xi1>, vector<16x4xf32>
    %372 = arith.truncf %371 : vector<16x4xf32> to vector<16x4xbf16>
    %c0_296 = arith.constant 0 : index
    %c0_297 = arith.constant 0 : index
    %c3_298 = arith.constant 3 : index
    %c0_299 = arith.constant 0 : index
    %c0_300 = arith.constant 0 : index
    %373 = vector.load %arg9[%c0_296, %c0_297, %c3_298, %c0_299, %c0_300] : memref<1x1x8x16x4xbf16, #tpu.memory_space<vmem>>, vector<1x1x1x16x4xbf16>
    %374 = vector.shape_cast %373 : vector<1x1x1x16x4xbf16> to vector<16x4xbf16>
    %375 = vector.shape_cast %372 : vector<16x4xbf16> to vector<1x1x1x16x4xbf16>
    tpu.vector_store %arg9[%c0_296, %c0_297, %c3_298, %c0_299, %c0_300], %375 {strides = array<i32>} : memref<1x1x8x16x4xbf16, #tpu.memory_space<vmem>>, vector<1x1x1x16x4xbf16>,
    %376 = arith.index_cast %9 : i32 to index
    %c4_301 = arith.constant 4 : index
    %c0_302 = arith.constant 0 : index
    %c0_303 = arith.constant 0 : index
    %377 = vector.load %arg10[%376, %c4_301, %c0_302, %c0_303] : memref<2x8x21x4xbf16, #tpu.memory_space<vmem>>, vector<1x1x16x4xbf16>
    %378 = vector.shape_cast %377 : vector<1x1x16x4xbf16> to vector<16x4xbf16>
    %cst_304 = arith.constant dense<0.000000e+00> : vector<16x4xf32>
    %379 = tpu.matmul %378, %169, %cst_304 {dimension_numbers = #tpu.dot_dimension_numbers<[1], [0], [0], [1], [0, 0, 1, 1], [], []>} : vector<16x4xbf16>, vector<4x4xbf16>, vector<16x4xf32> -> vector<16x4xf32>
    %380 = arith.addf %164, %379 : vector<16x4xf32>
    %381 = arith.index_cast %9 : i32 to index
    %c5_305 = arith.constant 5 : index
    %c0_306 = arith.constant 0 : index
    %c0_307 = arith.constant 0 : index
    %382 = vector.load %arg10[%381, %c5_305, %c0_306, %c0_307] : memref<2x8x21x4xbf16, #tpu.memory_space<vmem>>, vector<1x1x16x4xbf16>
    %383 = vector.shape_cast %382 : vector<1x1x16x4xbf16> to vector<16x4xbf16>
    %cst_308 = arith.constant dense<0.000000e+00> : vector<16x4xf32>
    %384 = tpu.matmul %383, %171, %cst_308 {dimension_numbers = #tpu.dot_dimension_numbers<[1], [0], [0], [1], [0, 0, 1, 1], [], []>} : vector<16x4xbf16>, vector<4x4xbf16>, vector<16x4xf32> -> vector<16x4xf32>
    %385 = arith.addf %380, %384 : vector<16x4xf32>
    %386 = arith.index_cast %9 : i32 to index
    %c6_309 = arith.constant 6 : index
    %c0_310 = arith.constant 0 : index
    %c0_311 = arith.constant 0 : index
    %387 = vector.load %arg10[%386, %c6_309, %c0_310, %c0_311] : memref<2x8x21x4xbf16, #tpu.memory_space<vmem>>, vector<1x1x16x4xbf16>
    %388 = vector.shape_cast %387 : vector<1x1x16x4xbf16> to vector<16x4xbf16>
    %cst_312 = arith.constant dense<0.000000e+00> : vector<16x4xf32>
    %389 = tpu.matmul %388, %173, %cst_312 {dimension_numbers = #tpu.dot_dimension_numbers<[1], [0], [0], [1], [0, 0, 1, 1], [], []>} : vector<16x4xbf16>, vector<4x4xbf16>, vector<16x4xf32> -> vector<16x4xf32>
    %390 = arith.addf %385, %389 : vector<16x4xf32>
    %391 = arith.index_cast %9 : i32 to index
    %c7_313 = arith.constant 7 : index
    %c0_314 = arith.constant 0 : index
    %c0_315 = arith.constant 0 : index
    %392 = vector.load %arg10[%391, %c7_313, %c0_314, %c0_315] : memref<2x8x21x4xbf16, #tpu.memory_space<vmem>>, vector<1x1x16x4xbf16>
    %393 = vector.shape_cast %392 : vector<1x1x16x4xbf16> to vector<16x4xbf16>
    %cst_316 = arith.constant dense<0.000000e+00> : vector<16x4xf32>
    %394 = tpu.matmul %393, %175, %cst_316 {dimension_numbers = #tpu.dot_dimension_numbers<[1], [0], [0], [1], [0, 0, 1, 1], [], []>} : vector<16x4xbf16>, vector<4x4xbf16>, vector<16x4xf32> -> vector<16x4xf32>
    %395 = arith.addf %390, %394 : vector<16x4xf32>
    %396 = arith.index_cast %12 : i32 to index
    %c0_317 = arith.constant 0 : index
    %c0_318 = arith.constant 0 : index
    %c0_319 = arith.constant 0 : index
    %397 = vector.load %arg10[%396, %c0_317, %c0_318, %c0_319] : memref<2x8x21x4xbf16, #tpu.memory_space<vmem>>, vector<1x1x16x4xbf16>
    %398 = vector.shape_cast %397 : vector<1x1x16x4xbf16> to vector<16x4xbf16>
    %cst_320 = arith.constant dense<0.000000e+00> : vector<16x4xf32>
    %399 = tpu.matmul %398, %177, %cst_320 {dimension_numbers = #tpu.dot_dimension_numbers<[1], [0], [0], [1], [0, 0, 1, 1], [], []>} : vector<16x4xbf16>, vector<4x4xbf16>, vector<16x4xf32> -> vector<16x4xf32>
    %400 = arith.addf %395, %399 : vector<16x4xf32>
    %401 = arith.index_cast %12 : i32 to index
    %c1_321 = arith.constant 1 : index
    %c0_322 = arith.constant 0 : index
    %c0_323 = arith.constant 0 : index
    %402 = vector.load %arg10[%401, %c1_321, %c0_322, %c0_323] : memref<2x8x21x4xbf16, #tpu.memory_space<vmem>>, vector<1x1x16x4xbf16>
    %403 = vector.shape_cast %402 : vector<1x1x16x4xbf16> to vector<16x4xbf16>
    %cst_324 = arith.constant dense<0.000000e+00> : vector<16x4xf32>
    %404 = tpu.matmul %403, %179, %cst_324 {dimension_numbers = #tpu.dot_dimension_numbers<[1], [0], [0], [1], [0, 0, 1, 1], [], []>} : vector<16x4xbf16>, vector<4x4xbf16>, vector<16x4xf32> -> vector<16x4xf32>
    %405 = arith.addf %400, %404 : vector<16x4xf32>
    %406 = arith.index_cast %12 : i32 to index
    %c2_325 = arith.constant 2 : index
    %c0_326 = arith.constant 0 : index
    %c0_327 = arith.constant 0 : index
    %407 = vector.load %arg10[%406, %c2_325, %c0_326, %c0_327] : memref<2x8x21x4xbf16, #tpu.memory_space<vmem>>, vector<1x1x16x4xbf16>
    %408 = vector.shape_cast %407 : vector<1x1x16x4xbf16> to vector<16x4xbf16>
    %cst_328 = arith.constant dense<0.000000e+00> : vector<16x4xf32>
    %409 = tpu.matmul %408, %181, %cst_328 {dimension_numbers = #tpu.dot_dimension_numbers<[1], [0], [0], [1], [0, 0, 1, 1], [], []>} : vector<16x4xbf16>, vector<4x4xbf16>, vector<16x4xf32> -> vector<16x4xf32>
    %410 = arith.addf %405, %409 : vector<16x4xf32>
    %411 = arith.index_cast %12 : i32 to index
    %c3_329 = arith.constant 3 : index
    %c0_330 = arith.constant 0 : index
    %c0_331 = arith.constant 0 : index
    %412 = vector.load %arg10[%411, %c3_329, %c0_330, %c0_331] : memref<2x8x21x4xbf16, #tpu.memory_space<vmem>>, vector<1x1x16x4xbf16>
    %413 = vector.shape_cast %412 : vector<1x1x16x4xbf16> to vector<16x4xbf16>
    %cst_332 = arith.constant dense<0.000000e+00> : vector<16x4xf32>
    %414 = tpu.matmul %413, %183, %cst_332 {dimension_numbers = #tpu.dot_dimension_numbers<[1], [0], [0], [1], [0, 0, 1, 1], [], []>} : vector<16x4xbf16>, vector<4x4xbf16>, vector<16x4xf32> -> vector<16x4xf32>
    %415 = arith.addf %410, %414 : vector<16x4xf32>
    %cst_333 = arith.constant 0.000000e+00 : f32
    %416 = vector.broadcast %cst_333 : f32 to vector<16x4xf32>
    %417 = arith.cmpf oge, %415, %416 : vector<16x4xf32>
    %418 = arith.mulf %167, %415 : vector<16x4xf32>
    %419 = arith.select %417, %415, %418 : vector<16x4xi1>, vector<16x4xf32>
    %420 = arith.truncf %419 : vector<16x4xf32> to vector<16x4xbf16>
    %c0_334 = arith.constant 0 : index
    %c0_335 = arith.constant 0 : index
    %c4_336 = arith.constant 4 : index
    %c0_337 = arith.constant 0 : index
    %c0_338 = arith.constant 0 : index
    %421 = vector.load %arg9[%c0_334, %c0_335, %c4_336, %c0_337, %c0_338] : memref<1x1x8x16x4xbf16, #tpu.memory_space<vmem>>, vector<1x1x1x16x4xbf16>
    %422 = vector.shape_cast %421 : vector<1x1x1x16x4xbf16> to vector<16x4xbf16>
    %423 = vector.shape_cast %420 : vector<16x4xbf16> to vector<1x1x1x16x4xbf16>
    tpu.vector_store %arg9[%c0_334, %c0_335, %c4_336, %c0_337, %c0_338], %423 {strides = array<i32>} : memref<1x1x8x16x4xbf16, #tpu.memory_space<vmem>>, vector<1x1x1x16x4xbf16>,
    %424 = arith.index_cast %9 : i32 to index
    %c5_339 = arith.constant 5 : index
    %c0_340 = arith.constant 0 : index
    %c0_341 = arith.constant 0 : index
    %425 = vector.load %arg10[%424, %c5_339, %c0_340, %c0_341] : memref<2x8x21x4xbf16, #tpu.memory_space<vmem>>, vector<1x1x16x4xbf16>
    %426 = vector.shape_cast %425 : vector<1x1x16x4xbf16> to vector<16x4xbf16>
    %cst_342 = arith.constant dense<0.000000e+00> : vector<16x4xf32>
    %427 = tpu.matmul %426, %169, %cst_342 {dimension_numbers = #tpu.dot_dimension_numbers<[1], [0], [0], [1], [0, 0, 1, 1], [], []>} : vector<16x4xbf16>, vector<4x4xbf16>, vector<16x4xf32> -> vector<16x4xf32>
    %428 = arith.addf %164, %427 : vector<16x4xf32>
    %429 = arith.index_cast %9 : i32 to index
    %c4_343 = arith.constant 4 : index
    %c1_344 = arith.constant 1 : index
    %c0_345 = arith.constant 0 : index
    %430 = vector.load %arg10[%429, %c4_343, %c1_344, %c0_345] : memref<2x8x21x4xbf16, #tpu.memory_space<vmem>>, vector<1x1x16x4xbf16>
    %431 = vector.shape_cast %430 : vector<1x1x16x4xbf16> to vector<16x4xbf16>
    %cst_346 = arith.constant dense<0.000000e+00> : vector<16x4xf32>
    %432 = tpu.matmul %431, %171, %cst_346 {dimension_numbers = #tpu.dot_dimension_numbers<[1], [0], [0], [1], [0, 0, 1, 1], [], []>} : vector<16x4xbf16>, vector<4x4xbf16>, vector<16x4xf32> -> vector<16x4xf32>
    %433 = arith.addf %428, %432 : vector<16x4xf32>
    %434 = arith.index_cast %9 : i32 to index
    %c7_347 = arith.constant 7 : index
    %c0_348 = arith.constant 0 : index
    %c0_349 = arith.constant 0 : index
    %435 = vector.load %arg10[%434, %c7_347, %c0_348, %c0_349] : memref<2x8x21x4xbf16, #tpu.memory_space<vmem>>, vector<1x1x16x4xbf16>
    %436 = vector.shape_cast %435 : vector<1x1x16x4xbf16> to vector<16x4xbf16>
    %cst_350 = arith.constant dense<0.000000e+00> : vector<16x4xf32>
    %437 = tpu.matmul %436, %173, %cst_350 {dimension_numbers = #tpu.dot_dimension_numbers<[1], [0], [0], [1], [0, 0, 1, 1], [], []>} : vector<16x4xbf16>, vector<4x4xbf16>, vector<16x4xf32> -> vector<16x4xf32>
    %438 = arith.addf %433, %437 : vector<16x4xf32>
    %439 = arith.index_cast %9 : i32 to index
    %c6_351 = arith.constant 6 : index
    %c1_352 = arith.constant 1 : index
    %c0_353 = arith.constant 0 : index
    %440 = vector.load %arg10[%439, %c6_351, %c1_352, %c0_353] : memref<2x8x21x4xbf16, #tpu.memory_space<vmem>>, vector<1x1x16x4xbf16>
    %441 = vector.shape_cast %440 : vector<1x1x16x4xbf16> to vector<16x4xbf16>
    %cst_354 = arith.constant dense<0.000000e+00> : vector<16x4xf32>
    %442 = tpu.matmul %441, %175, %cst_354 {dimension_numbers = #tpu.dot_dimension_numbers<[1], [0], [0], [1], [0, 0, 1, 1], [], []>} : vector<16x4xbf16>, vector<4x4xbf16>, vector<16x4xf32> -> vector<16x4xf32>
    %443 = arith.addf %438, %442 : vector<16x4xf32>
    %444 = arith.index_cast %12 : i32 to index
    %c1_355 = arith.constant 1 : index
    %c0_356 = arith.constant 0 : index
    %c0_357 = arith.constant 0 : index
    %445 = vector.load %arg10[%444, %c1_355, %c0_356, %c0_357] : memref<2x8x21x4xbf16, #tpu.memory_space<vmem>>, vector<1x1x16x4xbf16>
    %446 = vector.shape_cast %445 : vector<1x1x16x4xbf16> to vector<16x4xbf16>
    %cst_358 = arith.constant dense<0.000000e+00> : vector<16x4xf32>
    %447 = tpu.matmul %446, %177, %cst_358 {dimension_numbers = #tpu.dot_dimension_numbers<[1], [0], [0], [1], [0, 0, 1, 1], [], []>} : vector<16x4xbf16>, vector<4x4xbf16>, vector<16x4xf32> -> vector<16x4xf32>
    %448 = arith.addf %443, %447 : vector<16x4xf32>
    %449 = arith.index_cast %12 : i32 to index
    %c0_359 = arith.constant 0 : index
    %c1_360 = arith.constant 1 : index
    %c0_361 = arith.constant 0 : index
    %450 = vector.load %arg10[%449, %c0_359, %c1_360, %c0_361] : memref<2x8x21x4xbf16, #tpu.memory_space<vmem>>, vector<1x1x16x4xbf16>
    %451 = vector.shape_cast %450 : vector<1x1x16x4xbf16> to vector<16x4xbf16>
    %cst_362 = arith.constant dense<0.000000e+00> : vector<16x4xf32>
    %452 = tpu.matmul %451, %179, %cst_362 {dimension_numbers = #tpu.dot_dimension_numbers<[1], [0], [0], [1], [0, 0, 1, 1], [], []>} : vector<16x4xbf16>, vector<4x4xbf16>, vector<16x4xf32> -> vector<16x4xf32>
    %453 = arith.addf %448, %452 : vector<16x4xf32>
    %454 = arith.index_cast %12 : i32 to index
    %c3_363 = arith.constant 3 : index
    %c0_364 = arith.constant 0 : index
    %c0_365 = arith.constant 0 : index
    %455 = vector.load %arg10[%454, %c3_363, %c0_364, %c0_365] : memref<2x8x21x4xbf16, #tpu.memory_space<vmem>>, vector<1x1x16x4xbf16>
    %456 = vector.shape_cast %455 : vector<1x1x16x4xbf16> to vector<16x4xbf16>
    %cst_366 = arith.constant dense<0.000000e+00> : vector<16x4xf32>
    %457 = tpu.matmul %456, %181, %cst_366 {dimension_numbers = #tpu.dot_dimension_numbers<[1], [0], [0], [1], [0, 0, 1, 1], [], []>} : vector<16x4xbf16>, vector<4x4xbf16>, vector<16x4xf32> -> vector<16x4xf32>
    %458 = arith.addf %453, %457 : vector<16x4xf32>
    %459 = arith.index_cast %12 : i32 to index
    %c2_367 = arith.constant 2 : index
    %c1_368 = arith.constant 1 : index
    %c0_369 = arith.constant 0 : index
    %460 = vector.load %arg10[%459, %c2_367, %c1_368, %c0_369] : memref<2x8x21x4xbf16, #tpu.memory_space<vmem>>, vector<1x1x16x4xbf16>
    %461 = vector.shape_cast %460 : vector<1x1x16x4xbf16> to vector<16x4xbf16>
    %cst_370 = arith.constant dense<0.000000e+00> : vector<16x4xf32>
    %462 = tpu.matmul %461, %183, %cst_370 {dimension_numbers = #tpu.dot_dimension_numbers<[1], [0], [0], [1], [0, 0, 1, 1], [], []>} : vector<16x4xbf16>, vector<4x4xbf16>, vector<16x4xf32> -> vector<16x4xf32>
    %463 = arith.addf %458, %462 : vector<16x4xf32>
    %cst_371 = arith.constant 0.000000e+00 : f32
    %464 = vector.broadcast %cst_371 : f32 to vector<16x4xf32>
    %465 = arith.cmpf oge, %463, %464 : vector<16x4xf32>
    %466 = arith.mulf %167, %463 : vector<16x4xf32>
    %467 = arith.select %465, %463, %466 : vector<16x4xi1>, vector<16x4xf32>
    %468 = arith.truncf %467 : vector<16x4xf32> to vector<16x4xbf16>
    %c0_372 = arith.constant 0 : index
    %c0_373 = arith.constant 0 : index
    %c5_374 = arith.constant 5 : index
    %c0_375 = arith.constant 0 : index
    %c0_376 = arith.constant 0 : index
    %469 = vector.load %arg9[%c0_372, %c0_373, %c5_374, %c0_375, %c0_376] : memref<1x1x8x16x4xbf16, #tpu.memory_space<vmem>>, vector<1x1x1x16x4xbf16>
    %470 = vector.shape_cast %469 : vector<1x1x1x16x4xbf16> to vector<16x4xbf16>
    %471 = vector.shape_cast %468 : vector<16x4xbf16> to vector<1x1x1x16x4xbf16>
    tpu.vector_store %arg9[%c0_372, %c0_373, %c5_374, %c0_375, %c0_376], %471 {strides = array<i32>} : memref<1x1x8x16x4xbf16, #tpu.memory_space<vmem>>, vector<1x1x1x16x4xbf16>,
    %472 = arith.index_cast %9 : i32 to index
    %c6_377 = arith.constant 6 : index
    %c0_378 = arith.constant 0 : index
    %c0_379 = arith.constant 0 : index
    %473 = vector.load %arg10[%472, %c6_377, %c0_378, %c0_379] : memref<2x8x21x4xbf16, #tpu.memory_space<vmem>>, vector<1x1x16x4xbf16>
    %474 = vector.shape_cast %473 : vector<1x1x16x4xbf16> to vector<16x4xbf16>
    %cst_380 = arith.constant dense<0.000000e+00> : vector<16x4xf32>
    %475 = tpu.matmul %474, %169, %cst_380 {dimension_numbers = #tpu.dot_dimension_numbers<[1], [0], [0], [1], [0, 0, 1, 1], [], []>} : vector<16x4xbf16>, vector<4x4xbf16>, vector<16x4xf32> -> vector<16x4xf32>
    %476 = arith.addf %164, %475 : vector<16x4xf32>
    %477 = arith.index_cast %9 : i32 to index
    %c7_381 = arith.constant 7 : index
    %c0_382 = arith.constant 0 : index
    %c0_383 = arith.constant 0 : index
    %478 = vector.load %arg10[%477, %c7_381, %c0_382, %c0_383] : memref<2x8x21x4xbf16, #tpu.memory_space<vmem>>, vector<1x1x16x4xbf16>
    %479 = vector.shape_cast %478 : vector<1x1x16x4xbf16> to vector<16x4xbf16>
    %cst_384 = arith.constant dense<0.000000e+00> : vector<16x4xf32>
    %480 = tpu.matmul %479, %171, %cst_384 {dimension_numbers = #tpu.dot_dimension_numbers<[1], [0], [0], [1], [0, 0, 1, 1], [], []>} : vector<16x4xbf16>, vector<4x4xbf16>, vector<16x4xf32> -> vector<16x4xf32>
    %481 = arith.addf %476, %480 : vector<16x4xf32>
    %482 = arith.index_cast %9 : i32 to index
    %c4_385 = arith.constant 4 : index
    %c4_386 = arith.constant 4 : index
    %c0_387 = arith.constant 0 : index
    %483 = vector.load %arg10[%482, %c4_385, %c4_386, %c0_387] : memref<2x8x21x4xbf16, #tpu.memory_space<vmem>>, vector<1x1x16x4xbf16>
    %484 = vector.shape_cast %483 : vector<1x1x16x4xbf16> to vector<16x4xbf16>
    %cst_388 = arith.constant dense<0.000000e+00> : vector<16x4xf32>
    %485 = tpu.matmul %484, %173, %cst_388 {dimension_numbers = #tpu.dot_dimension_numbers<[1], [0], [0], [1], [0, 0, 1, 1], [], []>} : vector<16x4xbf16>, vector<4x4xbf16>, vector<16x4xf32> -> vector<16x4xf32>
    %486 = arith.addf %481, %485 : vector<16x4xf32>
    %487 = arith.index_cast %9 : i32 to index
    %c5_389 = arith.constant 5 : index
    %c4_390 = arith.constant 4 : index
    %c0_391 = arith.constant 0 : index
    %488 = vector.load %arg10[%487, %c5_389, %c4_390, %c0_391] : memref<2x8x21x4xbf16, #tpu.memory_space<vmem>>, vector<1x1x16x4xbf16>
    %489 = vector.shape_cast %488 : vector<1x1x16x4xbf16> to vector<16x4xbf16>
    %cst_392 = arith.constant dense<0.000000e+00> : vector<16x4xf32>
    %490 = tpu.matmul %489, %175, %cst_392 {dimension_numbers = #tpu.dot_dimension_numbers<[1], [0], [0], [1], [0, 0, 1, 1], [], []>} : vector<16x4xbf16>, vector<4x4xbf16>, vector<16x4xf32> -> vector<16x4xf32>
    %491 = arith.addf %486, %490 : vector<16x4xf32>
    %492 = arith.index_cast %12 : i32 to index
    %c2_393 = arith.constant 2 : index
    %c0_394 = arith.constant 0 : index
    %c0_395 = arith.constant 0 : index
    %493 = vector.load %arg10[%492, %c2_393, %c0_394, %c0_395] : memref<2x8x21x4xbf16, #tpu.memory_space<vmem>>, vector<1x1x16x4xbf16>
    %494 = vector.shape_cast %493 : vector<1x1x16x4xbf16> to vector<16x4xbf16>
    %cst_396 = arith.constant dense<0.000000e+00> : vector<16x4xf32>
    %495 = tpu.matmul %494, %177, %cst_396 {dimension_numbers = #tpu.dot_dimension_numbers<[1], [0], [0], [1], [0, 0, 1, 1], [], []>} : vector<16x4xbf16>, vector<4x4xbf16>, vector<16x4xf32> -> vector<16x4xf32>
    %496 = arith.addf %491, %495 : vector<16x4xf32>
    %497 = arith.index_cast %12 : i32 to index
    %c3_397 = arith.constant 3 : index
    %c0_398 = arith.constant 0 : index
    %c0_399 = arith.constant 0 : index
    %498 = vector.load %arg10[%497, %c3_397, %c0_398, %c0_399] : memref<2x8x21x4xbf16, #tpu.memory_space<vmem>>, vector<1x1x16x4xbf16>
    %499 = vector.shape_cast %498 : vector<1x1x16x4xbf16> to vector<16x4xbf16>
    %cst_400 = arith.constant dense<0.000000e+00> : vector<16x4xf32>
    %500 = tpu.matmul %499, %179, %cst_400 {dimension_numbers = #tpu.dot_dimension_numbers<[1], [0], [0], [1], [0, 0, 1, 1], [], []>} : vector<16x4xbf16>, vector<4x4xbf16>, vector<16x4xf32> -> vector<16x4xf32>
    %501 = arith.addf %496, %500 : vector<16x4xf32>
    %502 = arith.index_cast %12 : i32 to index
    %c0_401 = arith.constant 0 : index
    %c4_402 = arith.constant 4 : index
    %c0_403 = arith.constant 0 : index
    %503 = vector.load %arg10[%502, %c0_401, %c4_402, %c0_403] : memref<2x8x21x4xbf16, #tpu.memory_space<vmem>>, vector<1x1x16x4xbf16>
    %504 = vector.shape_cast %503 : vector<1x1x16x4xbf16> to vector<16x4xbf16>
    %cst_404 = arith.constant dense<0.000000e+00> : vector<16x4xf32>
    %505 = tpu.matmul %504, %181, %cst_404 {dimension_numbers = #tpu.dot_dimension_numbers<[1], [0], [0], [1], [0, 0, 1, 1], [], []>} : vector<16x4xbf16>, vector<4x4xbf16>, vector<16x4xf32> -> vector<16x4xf32>
    %506 = arith.addf %501, %505 : vector<16x4xf32>
    %507 = arith.index_cast %12 : i32 to index
    %c1_405 = arith.constant 1 : index
    %c4_406 = arith.constant 4 : index
    %c0_407 = arith.constant 0 : index
    %508 = vector.load %arg10[%507, %c1_405, %c4_406, %c0_407] : memref<2x8x21x4xbf16, #tpu.memory_space<vmem>>, vector<1x1x16x4xbf16>
    %509 = vector.shape_cast %508 : vector<1x1x16x4xbf16> to vector<16x4xbf16>
    %cst_408 = arith.constant dense<0.000000e+00> : vector<16x4xf32>
    %510 = tpu.matmul %509, %183, %cst_408 {dimension_numbers = #tpu.dot_dimension_numbers<[1], [0], [0], [1], [0, 0, 1, 1], [], []>} : vector<16x4xbf16>, vector<4x4xbf16>, vector<16x4xf32> -> vector<16x4xf32>
    %511 = arith.addf %506, %510 : vector<16x4xf32>
    %cst_409 = arith.constant 0.000000e+00 : f32
    %512 = vector.broadcast %cst_409 : f32 to vector<16x4xf32>
    %513 = arith.cmpf oge, %511, %512 : vector<16x4xf32>
    %514 = arith.mulf %167, %511 : vector<16x4xf32>
    %515 = arith.select %513, %511, %514 : vector<16x4xi1>, vector<16x4xf32>
    %516 = arith.truncf %515 : vector<16x4xf32> to vector<16x4xbf16>
    %c0_410 = arith.constant 0 : index
    %c0_411 = arith.constant 0 : index
    %c6_412 = arith.constant 6 : index
    %c0_413 = arith.constant 0 : index
    %c0_414 = arith.constant 0 : index
    %517 = vector.load %arg9[%c0_410, %c0_411, %c6_412, %c0_413, %c0_414] : memref<1x1x8x16x4xbf16, #tpu.memory_space<vmem>>, vector<1x1x1x16x4xbf16>
    %518 = vector.shape_cast %517 : vector<1x1x1x16x4xbf16> to vector<16x4xbf16>
    %519 = vector.shape_cast %516 : vector<16x4xbf16> to vector<1x1x1x16x4xbf16>
    tpu.vector_store %arg9[%c0_410, %c0_411, %c6_412, %c0_413, %c0_414], %519 {strides = array<i32>} : memref<1x1x8x16x4xbf16, #tpu.memory_space<vmem>>, vector<1x1x1x16x4xbf16>,
    %520 = arith.index_cast %9 : i32 to index
    %c7_415 = arith.constant 7 : index
    %c0_416 = arith.constant 0 : index
    %c0_417 = arith.constant 0 : index
    %521 = vector.load %arg10[%520, %c7_415, %c0_416, %c0_417] : memref<2x8x21x4xbf16, #tpu.memory_space<vmem>>, vector<1x1x16x4xbf16>
    %522 = vector.shape_cast %521 : vector<1x1x16x4xbf16> to vector<16x4xbf16>
    %cst_418 = arith.constant dense<0.000000e+00> : vector<16x4xf32>
    %523 = tpu.matmul %522, %169, %cst_418 {dimension_numbers = #tpu.dot_dimension_numbers<[1], [0], [0], [1], [0, 0, 1, 1], [], []>} : vector<16x4xbf16>, vector<4x4xbf16>, vector<16x4xf32> -> vector<16x4xf32>
    %524 = arith.addf %164, %523 : vector<16x4xf32>
    %525 = arith.index_cast %9 : i32 to index
    %c6_419 = arith.constant 6 : index
    %c1_420 = arith.constant 1 : index
    %c0_421 = arith.constant 0 : index
    %526 = vector.load %arg10[%525, %c6_419, %c1_420, %c0_421] : memref<2x8x21x4xbf16, #tpu.memory_space<vmem>>, vector<1x1x16x4xbf16>
    %527 = vector.shape_cast %526 : vector<1x1x16x4xbf16> to vector<16x4xbf16>
    %cst_422 = arith.constant dense<0.000000e+00> : vector<16x4xf32>
    %528 = tpu.matmul %527, %171, %cst_422 {dimension_numbers = #tpu.dot_dimension_numbers<[1], [0], [0], [1], [0, 0, 1, 1], [], []>} : vector<16x4xbf16>, vector<4x4xbf16>, vector<16x4xf32> -> vector<16x4xf32>
    %529 = arith.addf %524, %528 : vector<16x4xf32>
    %530 = arith.index_cast %9 : i32 to index
    %c5_423 = arith.constant 5 : index
    %c4_424 = arith.constant 4 : index
    %c0_425 = arith.constant 0 : index
    %531 = vector.load %arg10[%530, %c5_423, %c4_424, %c0_425] : memref<2x8x21x4xbf16, #tpu.memory_space<vmem>>, vector<1x1x16x4xbf16>
    %532 = vector.shape_cast %531 : vector<1x1x16x4xbf16> to vector<16x4xbf16>
    %cst_426 = arith.constant dense<0.000000e+00> : vector<16x4xf32>
    %533 = tpu.matmul %532, %173, %cst_426 {dimension_numbers = #tpu.dot_dimension_numbers<[1], [0], [0], [1], [0, 0, 1, 1], [], []>} : vector<16x4xbf16>, vector<4x4xbf16>, vector<16x4xf32> -> vector<16x4xf32>
    %534 = arith.addf %529, %533 : vector<16x4xf32>
    %535 = arith.index_cast %9 : i32 to index
    %c4_427 = arith.constant 4 : index
    %c5_428 = arith.constant 5 : index
    %c0_429 = arith.constant 0 : index
    %536 = vector.load %arg10[%535, %c4_427, %c5_428, %c0_429] : memref<2x8x21x4xbf16, #tpu.memory_space<vmem>>, vector<1x1x16x4xbf16>
    %537 = vector.shape_cast %536 : vector<1x1x16x4xbf16> to vector<16x4xbf16>
    %cst_430 = arith.constant dense<0.000000e+00> : vector<16x4xf32>
    %538 = tpu.matmul %537, %175, %cst_430 {dimension_numbers = #tpu.dot_dimension_numbers<[1], [0], [0], [1], [0, 0, 1, 1], [], []>} : vector<16x4xbf16>, vector<4x4xbf16>, vector<16x4xf32> -> vector<16x4xf32>
    %539 = arith.addf %534, %538 : vector<16x4xf32>
    %540 = arith.index_cast %12 : i32 to index
    %c3_431 = arith.constant 3 : index
    %c0_432 = arith.constant 0 : index
    %c0_433 = arith.constant 0 : index
    %541 = vector.load %arg10[%540, %c3_431, %c0_432, %c0_433] : memref<2x8x21x4xbf16, #tpu.memory_space<vmem>>, vector<1x1x16x4xbf16>
    %542 = vector.shape_cast %541 : vector<1x1x16x4xbf16> to vector<16x4xbf16>
    %cst_434 = arith.constant dense<0.000000e+00> : vector<16x4xf32>
    %543 = tpu.matmul %542, %177, %cst_434 {dimension_numbers = #tpu.dot_dimension_numbers<[1], [0], [0], [1], [0, 0, 1, 1], [], []>} : vector<16x4xbf16>, vector<4x4xbf16>, vector<16x4xf32> -> vector<16x4xf32>
    %544 = arith.addf %539, %543 : vector<16x4xf32>
    %545 = arith.index_cast %12 : i32 to index
    %c2_435 = arith.constant 2 : index
    %c1_436 = arith.constant 1 : index
    %c0_437 = arith.constant 0 : index
    %546 = vector.load %arg10[%545, %c2_435, %c1_436, %c0_437] : memref<2x8x21x4xbf16, #tpu.memory_space<vmem>>, vector<1x1x16x4xbf16>
    %547 = vector.shape_cast %546 : vector<1x1x16x4xbf16> to vector<16x4xbf16>
    %cst_438 = arith.constant dense<0.000000e+00> : vector<16x4xf32>
    %548 = tpu.matmul %547, %179, %cst_438 {dimension_numbers = #tpu.dot_dimension_numbers<[1], [0], [0], [1], [0, 0, 1, 1], [], []>} : vector<16x4xbf16>, vector<4x4xbf16>, vector<16x4xf32> -> vector<16x4xf32>
    %549 = arith.addf %544, %548 : vector<16x4xf32>
    %550 = arith.index_cast %12 : i32 to index
    %c1_439 = arith.constant 1 : index
    %c4_440 = arith.constant 4 : index
    %c0_441 = arith.constant 0 : index
    %551 = vector.load %arg10[%550, %c1_439, %c4_440, %c0_441] : memref<2x8x21x4xbf16, #tpu.memory_space<vmem>>, vector<1x1x16x4xbf16>
    %552 = vector.shape_cast %551 : vector<1x1x16x4xbf16> to vector<16x4xbf16>
    %cst_442 = arith.constant dense<0.000000e+00> : vector<16x4xf32>
    %553 = tpu.matmul %552, %181, %cst_442 {dimension_numbers = #tpu.dot_dimension_numbers<[1], [0], [0], [1], [0, 0, 1, 1], [], []>} : vector<16x4xbf16>, vector<4x4xbf16>, vector<16x4xf32> -> vector<16x4xf32>
    %554 = arith.addf %549, %553 : vector<16x4xf32>
    %555 = arith.index_cast %12 : i32 to index
    %c0_443 = arith.constant 0 : index
    %c5_444 = arith.constant 5 : index
    %c0_445 = arith.constant 0 : index
    %556 = vector.load %arg10[%555, %c0_443, %c5_444, %c0_445] : memref<2x8x21x4xbf16, #tpu.memory_space<vmem>>, vector<1x1x16x4xbf16>
    %557 = vector.shape_cast %556 : vector<1x1x16x4xbf16> to vector<16x4xbf16>
    %cst_446 = arith.constant dense<0.000000e+00> : vector<16x4xf32>
    %558 = tpu.matmul %557, %183, %cst_446 {dimension_numbers = #tpu.dot_dimension_numbers<[1], [0], [0], [1], [0, 0, 1, 1], [], []>} : vector<16x4xbf16>, vector<4x4xbf16>, vector<16x4xf32> -> vector<16x4xf32>
    %559 = arith.addf %554, %558 : vector<16x4xf32>
    %cst_447 = arith.constant 0.000000e+00 : f32
    %560 = vector.broadcast %cst_447 : f32 to vector<16x4xf32>
    %561 = arith.cmpf oge, %559, %560 : vector<16x4xf32>
    %562 = arith.mulf %167, %559 : vector<16x4xf32>
    %563 = arith.select %561, %559, %562 : vector<16x4xi1>, vector<16x4xf32>
    %564 = arith.truncf %563 : vector<16x4xf32> to vector<16x4xbf16>
    %c0_448 = arith.constant 0 : index
    %c0_449 = arith.constant 0 : index
    %c7_450 = arith.constant 7 : index
    %c0_451 = arith.constant 0 : index
    %c0_452 = arith.constant 0 : index
    %565 = vector.load %arg9[%c0_448, %c0_449, %c7_450, %c0_451, %c0_452] : memref<1x1x8x16x4xbf16, #tpu.memory_space<vmem>>, vector<1x1x1x16x4xbf16>
    %566 = vector.shape_cast %565 : vector<1x1x1x16x4xbf16> to vector<16x4xbf16>
    %567 = vector.shape_cast %564 : vector<16x4xbf16> to vector<1x1x1x16x4xbf16>
    tpu.vector_store %arg9[%c0_448, %c0_449, %c7_450, %c0_451, %c0_452], %567 {strides = array<i32>} : memref<1x1x8x16x4xbf16, #tpu.memory_space<vmem>>, vector<1x1x1x16x4xbf16>,
    return
  }
  func.func @transform_0(%arg0: i32, %arg1: i32) -> (i32, i32, i32, i32) {
    %c3_i32 = arith.constant 3 : i32
    %0 = arith.subi %c3_i32, %arg1 : i32
    %c0_i32 = arith.constant 0 : i32
    %c0_i32_0 = arith.constant 0 : i32
    %c0_i32_1 = arith.constant 0 : i32
    return %arg0, %0, %c0_i32, %c0_i32_0 : i32, i32, i32, i32
  }
  func.func @transform_1(%arg0: i32, %arg1: i32) -> (i32, i32, i32, i32, i32) {
    %c3_i32 = arith.constant 3 : i32
    %0 = arith.subi %c3_i32, %arg1 : i32
    %c0_i32 = arith.constant 0 : i32
    %c0_i32_0 = arith.constant 0 : i32
    %c0_i32_1 = arith.constant 0 : i32
    %c0_i32_2 = arith.constant 0 : i32
    return %arg0, %0, %c0_i32, %c0_i32_0, %c0_i32_1 : i32, i32, i32, i32, i32
  }
  func.func @transform_2(%arg0: i32, %arg1: i32) -> (i32, i32, i32) {
    %c0_i32 = arith.constant 0 : i32
    %c0_i32_0 = arith.constant 0 : i32
    %c0_i32_1 = arith.constant 0 : i32
    %c0_i32_2 = arith.constant 0 : i32
    return %c0_i32, %c0_i32_0, %c0_i32_1 : i32, i32, i32
  }
  func.func @transform_3(%arg0: i32, %arg1: i32) -> (i32, i32) {
    %c0_i32 = arith.constant 0 : i32
    %c0_i32_0 = arith.constant 0 : i32
    %c0_i32_1 = arith.constant 0 : i32
    return %c0_i32, %c0_i32_0 : i32, i32
  }
  func.func @transform_4(%arg0: i32, %arg1: i32) -> (i32, i32, i32) {
    %c0_i32 = arith.constant 0 : i32
    %c0_i32_0 = arith.constant 0 : i32
    %c0_i32_1 = arith.constant 0 : i32
    %c0_i32_2 = arith.constant 0 : i32
    return %c0_i32, %c0_i32_0, %c0_i32_1 : i32, i32, i32
  }
  func.func @transform_5(%arg0: i32, %arg1: i32) -> (i32, i32) {
    %c0_i32 = arith.constant 0 : i32
    %c0_i32_0 = arith.constant 0 : i32
    %c0_i32_1 = arith.constant 0 : i32
    return %c0_i32, %c0_i32_0 : i32, i32
  }
  func.func @transform_6(%arg0: i32, %arg1: i32) -> (i32, i32) {
    %c0_i32 = arith.constant 0 : i32
    %c0_i32_0 = arith.constant 0 : i32
    %c0_i32_1 = arith.constant 0 : i32
    return %c0_i32, %c0_i32_0 : i32, i32
  }
  func.func @transform_7(%arg0: i32, %arg1: i32) -> (i32, i32, i32, i32, i32) {
    %c3_i32 = arith.constant 3 : i32
    %0 = arith.subi %c3_i32, %arg1 : i32
    %c0_i32 = arith.constant 0 : i32
    %c0_i32_0 = arith.constant 0 : i32
    %c0_i32_1 = arith.constant 0 : i32
    %c0_i32_2 = arith.constant 0 : i32
    return %arg0, %0, %c0_i32, %c0_i32_0, %c0_i32_1 : i32, i32, i32, i32, i32
  }
}

</mosaic_0001>

<bundles_post_ra>
// kernel: upconv_block_forward.1
= control target key start
LH: loop header
LB: loop body
LE: loop exit
PB: predicated region body
PF: predicated region fallthrough
CT: control target
= control target key end

     0   :  { %s6619_s24 = smov 0   ;;  %s6621_s25 = smov 0   ;;  %s7429_s0 = inlined_call_operand.vmem [shape: bf16[2,4,16,8], index: 0, kind: input, shape index: {}]   ;;  %s7430_s1 = inlined_call_operand.vmem [shape: bf16[2,4,8,16,4], index: 1, kind: input, shape index: {}]   ;;  %s7431_s2 = inlined_call_operand.vmem [shape: bf16[8,8,4], index: 2, kind: input, shape index: {}]   ;;  %s7432_s3 = inlined_call_operand.vmem [shape: f32[1,4], index: 3, kind: input, shape index: {}]   ;;  %s7433_s4 = inlined_call_operand.vmem [shape: bf16[8,4,4], index: 4, kind: input, shape index: {}]   ;;  %s7434_s5 = inlined_call_operand.vmem [shape: f32[1,4], index: 5, kind: input, shape index: {}]   ;;  %s7435_s6 = inlined_call_operand.vmem [shape: f32[1,4], index: 6, kind: input, shape index: {}]   ;;  %s7436_s7 = inlined_call_operand.vmem [shape: bf16[2,4,8,16,4], index: 7, kind: output, shape index: {}]  }
   0x1   :  { %s6623_s26 = smov 0   ;;  %s6625_s27 = smov 0  }
   0x2   :  { %s6627_s28 = smov 0  }
   0x3 LB: > { %s26_s29 = sadd.s32 1, %s6567_s26  ;;  %s29_s30 = sadd.s32 1, %s6571_s27  ;;  %s6575_s28 = sphi %s6627_s28, %s17_s28   ;;  %s6571_s27 = sphi %s6625_s27, %s7442_s27   ;;  %s6567_s26 = sphi %s6623_s26, %s7441_s26   ;;  %s6563_s25 = sphi %s6621_s25, %s7440_s25   ;;  %s6559_s24 = sphi %s6619_s24, %s7439_s24  }
   0x4   : > { %p27_p0 = scmp.ge.s32.totalorder %s26_s29, 4  ;;  %p5082_p1 = scmp.ge.s32.totalorder %s6575_s28, 1 }
   0x5   : > { %p283_p2 = scmp.lt.s32.totalorder %s6575_s28, 9 }
   0x6   : > { %s7444_s29 = smov (%p27_p0, %s26_s29), 0  ;;  %s7446_s30 = smov (!%p27_p0, %s29_s30), %s6571_s27 }
   0x7   : > { %p284_p3 = pnand %p5082_p1, %p283_p2  ;;  %p31_p4 = scmp.ge.s32.totalorder %s7446_s30, 2 }
   0x8   : > { %v393_v0 = vld [vmem:[%s7431_s2] sm:$0xf] (!%p284_p3)  ;;  %vm403_vm0 = vcmask (!%p284_p3), 1043456   ;;  %v5101_v1 = vld [vmem:[%s7431_s2 + $0x4] sm:$0xf] (!%p284_p3)  ;;  %v6577_v2 = vmov (!%p284_p3), 0.0  }
   0x9   : > { %s7448_s30 = smov (%p31_p4, %s7446_s30), 0  ;;  %287 = sbr.rel (%p284_p3) target bundleno = 834 (0x342), region = 48 }
   0xa   : > { %5730 = vmatprep.subr.bf16.mxu0 (!%p284_p3), %v6577_v2  ;;  %5736 = vmatprep.subr.bf16.mxu1 (!%p284_p3), %v6577_v2  ;;  %v405_v3 = vsel (!%p284_p3), %vm403_vm0, %v393_v0, 0  ;;  %v477_v4 = vsel (!%p284_p3), %vm403_vm0, %v5101_v1, 0  ;;  %s335_s12 = ssub.s32 (!%p284_p3), 3, %s6559_s24  ;;  %p336_p5 = scmp.lt.s32.totalorder (!%p284_p3), %s6563_s25, 1  ;;  %vm6578_vm1 = vmmov (!%p284_p3), 0   ;;  %vm399_vm2 = vcmask (!%p284_p3), 64512  }
   0xb   : > { %5731 = vmatpush3.bf16.msra.mxu0 (!%p284_p3), %v405_v3  ;;  %5737 = vmatpush3.bf16.msra.mxu1 (!%p284_p3), %v477_v4  ;;  %p338_p6 = scmp.lt.s32.totalorder (!%p284_p3), %s335_s12, 3  ;;  %v5112_v5 = vld [vmem:[%s7431_s2 + $0x8] sm:$0xf] (!%p284_p3)  ;;  %v5123_v6 = vld [vmem:[%s7431_s2 + $0xc] sm:$0xf] (!%p284_p3)  ;;  %vm997_vm3 = vcmask (!%p284_p3), 1041408  }
   0xc   : > { %5732 = vmatprep.mubr.msk.bf16.mxu0 (!%p284_p3), %vm6578_vm1, %v6577_v2  ;;  %5738 = vmatprep.mubr.msk.bf16.mxu1 (!%p284_p3), %vm6578_vm1, %v6577_v2  ;;  %v546_v7 = vsel (!%p284_p3), %vm403_vm0, %v5112_v5, 0  ;;  %v615_v9 = vsel (!%p284_p3), %vm403_vm0, %v5123_v6, 0  ;;  %v5134_v10 = vld [vmem:[%s7431_s2 + $0x10] sm:$0xf] (!%p284_p3)  ;;  %v5145_v11 = vld [vmem:[%s7431_s2 + $0x14] sm:$0xf] (!%p284_p3) }
   0xd   : > { %5742 = vmatprep.subr.bf16.mxu0 (!%p284_p3), %v6577_v2  ;;  %5748 = vmatprep.subr.bf16.mxu1 (!%p284_p3), %v6577_v2  ;;  %v684_v12 = vsel (!%p284_p3), %vm403_vm0, %v5134_v10, 0  ;;  %v753_v13 = vsel (!%p284_p3), %vm403_vm0, %v5145_v11, 0  ;;  %v5156_v14 = vld [vmem:[%s7431_s2 + $0x18] sm:$0xf] (!%p284_p3)  ;;  %v5167_v15 = vld [vmem:[%s7431_s2 + $0x1c] sm:$0xf] (!%p284_p3) }
   0xe   : > { %v822_v16 = vsel (!%p284_p3), %vm403_vm0, %v5156_v14, 0  ;;  %v891_v17 = vsel (!%p284_p3), %vm403_vm0, %v5167_v15, 0  ;;  %v971_v18 = vld [vmem:[%s7433_s4] sm:$0x3] (!%p284_p3)  ;;  %s370_s20 = ssub.s32 (!%p284_p3), 0, %s6559_s24  ;;  %p369_p7 = scmp.lt.s32.totalorder (!%p284_p3), %s6559_s24, 0 }
   0xf   : > { %v6735_v19 = vsel (!%p284_p3), %vm997_vm3, %v971_v18, 0  ;;  %s5092_s21 = smin.u32 (!%p284_p3), %s6559_s24, %s370_s20  ;;  %v6759_v22 = vld [vmem:[%s7432_s3] ss:$0 sm:$0xff] (!%p284_p3)  ;;  %vm468_vm4 = vcmask (!%p284_p3), 26624   ;;  %vm469_vm5 = vsmask.f32 (!%p284_p3), 2304 }
  0x10   : > { %s7450_s25 = smov (!%p336_p5, %s6563_s25), 1  ;;  %s7452_s12 = smov (!%p338_p6, %s335_s12), 3  ;;  %vm465_vm6 = vcmask 27648   ;;  %vm6770_vm7 = vmand %vm468_vm4, %vm469_vm5  ;;  %v5180_v62 = vld [vmem:[%s7433_s4 + $0x2] sm:$0x3]  ;;  %vm993_vm8 = vcmask 31744  }
  0x11   : > { %s5084_s13 = sshll.u32 %s7450_s25, 3  ;;  %s5087_s14 = sshll.u32 %s7450_s25, 6  ;;  %vm1516_vm9 = vsmask.f32 7424  ;;  %vm2075_vm10 = vcmask 1045504  }
  0x12   : > { %s5083_s15 = sshll.u32 %s7452_s12, 1  ;;  %s5086_s18 = sshll.u32 %s7452_s12, 4  ;;  %vm2621_vm11 = vsmask.f32 5376 }
  0x13   : > { %s342_s19 = sadd.s32 %s5084_s13, %s5083_s15  ;;  %s6678_s22 = sadd.s32 %s5087_s14, %s5086_s18 }
  0x14   : > { %s5085_s23 = sshll.u32 %s342_s19, 2  ;;  %s5088_s9 = sshll.u32 %s6678_s22, 2 }
  0x15   : > { %s344_s10 = scalar_lea.vmem %s7429_s0, %s5085_s23  ;;  %s372_s23 = sand.u32 1, %s5092_s21  }
  0x16   : > { %v6444_v8 = vld [vmem:[%s344_s10] sm:$0xff]   ;;  %s373_s8 = ssub.s32 0, %s372_s23  ;;  %s6750_s12 = scalar_lea.vmem %s7430_s1, %s5088_s9 }
  0x17   : > { %5733 = vmatmul.mubr.msk.bf16.vlgmr.msra.gmra.mrb[0].mxu0 %vm399_vm2, %v6444_v8  ;;  %5739 = vmatmul.mubr.msk.bf16.vlgmr.msra.gmra.mrb[0].mxu1 %vm399_vm2, %v6444_v8  ;;  %s7454_s8 = smov (!%p369_p7, %s373_s8), %s372_s23  ;;  %v5548_v20 = vld [vmem:[%s6750_s12] sm:$0xff]   ;;  %v5579_v21 = vld [vmem:[%s6750_s12 + $0x8] sm:$0xff]   ;;  %v5580_v41 = vld [vmem:[%s6750_s12 + $0x10] sm:$0xff]   ;;  %p381_p9 = scmp.eq.s32.totalorder %s6559_s24, 0 }
  0x18   : > { %5743 = vmatpush3.bf16.msra.mxu0 %v546_v7  ;;  %5749 = vmatpush3.bf16.msra.mxu1 %v615_v9  ;;  %p5094_p8 = scmp.lt.s32.totalorder %s7454_s8, 0  ;;  %s379_s10 = sadd.s32 2, %s7454_s8  ;;  %v5549_v23 = vunpack.c.l.bf16 %v5548_v20  ;;  %v5553_v24 = vunpack.c.l.bf16 %v5579_v21  ;;  %v5550_v31 = vunpack.c.h.bf16 %v5548_v20  ;;  %v5554_v32 = vunpack.c.h.bf16 %v5579_v21  ;;  %v5581_v42 = vld [vmem:[%s6750_s12 + $0x18] sm:$0xff]   ;;  %v5583_v21 = vld [vmem:[%s6750_s12 + $0x28] sm:$0xff]  }
  0x19   : > { %5744 = vmatprep.mubr.msk.bf16.mxu0 %vm6578_vm1, %v6577_v2  ;;  %5750 = vmatprep.mubr.msk.bf16.mxu1 %vm6578_vm1, %v6577_v2  ;;  %v5557_v50 = vunpack.c.l.bf16 %v5580_v41  ;;  %v5561_v51 = vunpack.c.l.bf16 %v5581_v42  ;;  %v5558_v58 = vunpack.c.h.bf16 %v5580_v41  ;;  %v5562_v59 = vunpack.c.h.bf16 %v5581_v42  ;;  %s7282_s11 = scalar_lea.vmem %s7436_s7, %s5088_s9 }
  0x1a   : > { %5754 = vmatprep.subr.bf16.mxu0 %v6577_v2  ;;  %5760 = vmatprep.subr.bf16.mxu1 %v6577_v2  ;;  %s7456_s10 = smov (!%p5094_p8, %s379_s10), %s7454_s8 }
  0x1b   : > { %s5515_s15 = smul.u32 96, %s7456_s10  ;;  %s382_s13 = ssub.s32 1, %s7456_s10 }
  0x1c   : > { %s7458_s10 = smov (!%p381_p9, %s7456_s10), %s382_s13 }
  0x1d   : > { %s6774_s16 = scalar_lea.vmem [#allocation2], %s5515_s15  ;;  %s5538_s24 = smul.u32 96, %s7458_s10 }
  0x1e   : > { %v471_v48 = vld [vmem:[%s6774_s16 + $0x8] sm:$0x7]  ;;  %v5110_v49 = vld [vmem:[%s6774_s16 + $0x14] sm:$0x7]  ;;  %v5132_v20 = vld [vmem:[%s6774_s16 + $0x2c] sm:$0x7] }
  0x1f   : > { %5745 = vmatmul.mubr.msk.bf16.vlgmr.msra.gmra.mrb[4].mxu0 %vm399_vm2, %v6444_v8  ;;  %5751 = vmatmul.mubr.msk.bf16.vlgmr.msra.gmra.mrb[4].mxu1 %vm399_vm2, %v6444_v8  ;;  %s6962_s17 = scalar_lea.vmem [#allocation2], %s5538_s24 }
  0x20   : > { %5755 = vmatpush3.bf16.msra.mxu0 %v684_v12  ;;  %5761 = vmatpush3.bf16.msra.mxu1 %v753_v13  ;;  %v5582_v12 = vld [vmem:[%s6750_s12 + $0x20] sm:$0xff]   ;;  %v6801_v13 = vsel %vm997_vm3, %v5180_v62, 0 }
  0x21   : > { %5756 = vmatprep.mubr.msk.bf16.mxu0 %vm6578_vm1, %v6577_v2  ;;  %5762 = vmatprep.mubr.msk.bf16.mxu1 %vm6578_vm1, %v6577_v2 }
  0x22   : > { %5766 = vmatprep.subr.bf16.mxu0 %v6577_v2  ;;  %5772 = vmatprep.subr.bf16.mxu1 %v6577_v2 }
  0x27   : > { %5757 = vmatmul.mubr.msk.bf16.vlgmr.msra.gmra.mrb[8].mxu0 %vm399_vm2, %v6444_v8  ;;  %5763 = vmatmul.mubr.msk.bf16.vlgmr.msra.gmra.mrb[8].mxu1 %vm399_vm2, %v6444_v8 }
  0x28   : > { %5767 = vmatpush3.bf16.msra.mxu0 %v822_v16  ;;  %5773 = vmatpush3.bf16.msra.mxu1 %v891_v17  ;;  %v5121_v17 = vld [vmem:[%s6774_s16 + $0x20] sm:$0x7] }
  0x29   : > { %5768 = vmatprep.mubr.msk.bf16.mxu0 %vm6578_vm1, %v6577_v2  ;;  %5774 = vmatprep.mubr.msk.bf16.mxu1 %vm6578_vm1, %v6577_v2 }
  0x2a   : > { %5778 = vmatprep.subr.bf16.mxu0 %v6577_v2  ;;  %5826 = vmatprep.subr.bf16.mxu1 %v6577_v2 }
  0x2f   : > { %5769 = vmatmul.mubr.msk.bf16.vlgmr.msra.gmra.mrb[12].mxu0 %vm399_vm2, %v6444_v8  ;;  %5775 = vmatmul.mubr.msk.bf16.vlgmr.msra.gmra.mrb[12].mxu1 %vm399_vm2, %v6444_v8 }
  0x30   : > { %5780 = vmatprep.mubr.msk.bf16.mxu0 %vm6578_vm1, %v6577_v2  ;;  %5828 = vmatprep.mubr.msk.bf16.mxu1 %vm6578_vm1, %v6577_v2 }
  0x31   : > { %5779 = vmatpush3.bf16.msra.mxu0 %v6735_v19  ;;  %5827 = vmatpush3.bf16.msra.mxu1 %v6735_v19 }
  0x32   : > { %5784 = vmatprep.subr.bf16.mxu0 %v6577_v2  ;;  %5832 = vmatprep.subr.bf16.mxu1 %v6577_v2 }
  0xea   : > { %v441_v25 = vpop.f32.mrb[0].mxu0  ;;  %v513_v26 = vpop.f32.mrb[0].mxu1 }
  0xeb   : > { %v442_v27 = vadd.f32 %v6759_v22, %v441_v25  ;;  %v514_v28 = vadd.f32 %v6759_v22, %v513_v26  ;;  %v5734_v29 = vpop.f32.mrb[1].mxu0  ;;  %v5740_v30 = vpop.f32.mrb[1].mxu1 }
  0xec   : > { %v444_v33 = vpop.f32.mrb[2].mxu0  ;;  %v516_v34 = vpop.f32.mrb[2].mxu1  ;;  %v5569_v30 = vunpack.c.l.bf16 %v5583_v21 }
  0xed   : > { %v452_v35 = vadd.f32 %v5549_v23, %v442_v27  ;;  %v525_v36 = vadd.f32 %v5553_v24, %v514_v28  ;;  %v445_v37 = vadd.f32 %v6759_v22, %v444_v33  ;;  %v517_v38 = vadd.f32 %v6759_v22, %v516_v34  ;;  %v5735_v39 = vpop.f32.mrb[3].mxu0  ;;  %v5741_v40 = vpop.f32.mrb[3].mxu1 }
  0xee   : > { %v5565_v23 = vunpack.c.l.bf16 %v5582_v12 }
  0xef   : > { %v5513_v43 = vpack.c.bf16 %v452_v35, %v452_v35  ;;  %v5516_v44 = vpack.c.bf16 %v525_v36, %v525_v36  ;;  %v453_v45 = vadd.f32 %v5550_v31, %v445_v37  ;;  %v526_v46 = vadd.f32 %v5554_v32, %v517_v38 }
  0xf0   : > { %v5566_v37 = vunpack.c.h.bf16 %v5582_v12 }
  0xf1   : > { %466 = vst.msk [vmem:[%s6774_s16] sm:$0xf] %vm465_vm6, %v5513_v43  ;;  %5108 = vst.msk [vmem:[%s6774_s16 + $0xc] sm:$0xf] %vm465_vm6, %v5516_v44  ;;  %v454_v52 = vpack.c.bf16 %v453_v45, %v452_v35  ;;  %v5514_v53 = vpack.c.bf16 %v453_v45, %v453_v45  ;;  %v527_v54 = vpack.c.bf16 %v526_v46, %v525_v36  ;;  %v5570_v45 = vunpack.c.h.bf16 %v5583_v21 }
  0xf2   : > { %v5517_v55 = vpack.c.bf16 %v526_v46, %v526_v46  ;;  %v582_v56 = vpop.f32.mrb[4].mxu0  ;;  %v651_v57 = vpop.f32.mrb[4].mxu1 }
  0xf3   : > { %467 = vst.msk [vmem:[%s6774_s16 + $0x4] sm:$0xf] %vm465_vm6, %v5514_v53  ;;  %v472_v60 = vsel %vm6770_vm7, %v454_v52, %v471_v48  ;;  %v541_v61 = vsel %vm6770_vm7, %v527_v54, %v5110_v49  ;;  %v583_v63 = vadd.f32 %v6759_v22, %v582_v56  ;;  %v5746_v0 = vpop.f32.mrb[5].mxu0  ;;  %v652_v1 = vadd.f32 %v6759_v22, %v651_v57  ;;  %v5752_v3 = vpop.f32.mrb[5].mxu1  ;;  %v5143_v54 = vld [vmem:[%s6774_s16 + $0x38] sm:$0x7] }
  0xf4   : > { %5109 = vst.msk [vmem:[%s6774_s16 + $0x10] sm:$0xf] %vm465_vm6, %v5517_v55  ;;  %473 = vst [vmem:[%s6774_s16 + $0x8] sm:$0x7] %v472_v60  ;;  %v585_v4 = vpop.f32.mrb[6].mxu0  ;;  %v654_v5 = vpop.f32.mrb[6].mxu1 }
  0xf5   : > { %5111 = vst [vmem:[%s6774_s16 + $0x14] sm:$0x7] %v541_v61  ;;  %v594_v6 = vadd.f32 %v5557_v50, %v583_v63  ;;  %v663_v7 = vadd.f32 %v5561_v51, %v652_v1  ;;  %v586_v8 = vadd.f32 %v6759_v22, %v585_v4  ;;  %v655_v9 = vadd.f32 %v6759_v22, %v654_v5  ;;  %v5747_v10 = vpop.f32.mrb[7].mxu0  ;;  %v5753_v11 = vpop.f32.mrb[7].mxu1  ;;  %v5584_v51 = vld [vmem:[%s6750_s12 + $0x30] sm:$0xff]   ;;  %v5585_v57 = vld [vmem:[%s6750_s12 + $0x38] sm:$0xff]  }
  0xf6   : > { %v5154_v0 = vld [vmem:[%s6774_s16 + $0x44] sm:$0x7]  ;;  %v5573_v1 = vunpack.c.l.bf16 %v5584_v51  ;;  %v5577_v5 = vunpack.c.l.bf16 %v5585_v57 }
  0xf7   : > { %v5518_v14 = vpack.c.bf16 %v594_v6, %v594_v6  ;;  %v5520_v15 = vpack.c.bf16 %v663_v7, %v663_v7  ;;  %v595_v16 = vadd.f32 %v5558_v58, %v586_v8  ;;  %v664_v18 = vadd.f32 %v5562_v59, %v655_v9 }
  0xf9   : > { %5119 = vst.msk [vmem:[%s6774_s16 + $0x18] sm:$0xf] %vm465_vm6, %v5518_v14  ;;  %5130 = vst.msk [vmem:[%s6774_s16 + $0x24] sm:$0xf] %vm465_vm6, %v5520_v15  ;;  %v596_v24 = vpack.c.bf16 %v595_v16, %v594_v6  ;;  %v5519_v25 = vpack.c.bf16 %v595_v16, %v595_v16  ;;  %v665_v26 = vpack.c.bf16 %v664_v18, %v663_v7  ;;  %v5574_v6 = vunpack.c.h.bf16 %v5584_v51  ;;  %v5181_v7 = vld [vmem:[%s7433_s4 + $0x4] sm:$0x3] }
  0xfa   : > { %v5521_v27 = vpack.c.bf16 %v664_v18, %v664_v18  ;;  %v6445_v28 = vld [vmem:[%s6774_s16] sm:$0xff]   ;;  %v720_v29 = vpop.f32.mrb[8].mxu0  ;;  %v789_v36 = vpop.f32.mrb[8].mxu1 }
  0xfb   : > { %v6446_v31 = vld [vmem:[%s6774_s16 + $0xc] sm:$0xff]   ;;  %5120 = vst.msk [vmem:[%s6774_s16 + $0x1c] sm:$0xf] %vm465_vm6, %v5519_v25  ;;  %v610_v32 = vsel %vm6770_vm7, %v596_v24, %v5121_v17  ;;  %v679_v33 = vsel %vm6770_vm7, %v665_v26, %v5132_v20  ;;  %v721_v34 = vadd.f32 %v6759_v22, %v720_v29  ;;  %v5758_v35 = vpop.f32.mrb[9].mxu0  ;;  %5781 = vmatmul.mubr.msk.bf16.vlgmr.msra.gmra.mrb[16].mxu0 %vm993_vm8, %v6445_v28  ;;  %v6448_v38 = vld [vmem:[%s6774_s16] sm:$0xff]   ;;  %v5764_v44 = vpop.f32.mrb[9].mxu1  ;;  %v5578_v25 = vunpack.c.h.bf16 %v5585_v57 }
  0xfc   : > { %5131 = vst.msk [vmem:[%s6774_s16 + $0x28] sm:$0xf] %vm465_vm6, %v5521_v27  ;;  %5122 = vst [vmem:[%s6774_s16 + $0x20] sm:$0x7] %v610_v32  ;;  %v790_v39 = vadd.f32 %v6759_v22, %v789_v36  ;;  %v723_v40 = vpop.f32.mrb[10].mxu0  ;;  %5785 = vmatpush3.bf16.msra.mxu0 %v6801_v13  ;;  %5829 = vmatmul.mubr.msk.bf16.vlgmr.msra.gmra.mrb[16].mxu1 %vm993_vm8, %v6446_v31  ;;  %v1520_v48 = vshll.u32 %v6448_v38, 16 }
  0xfd   : > { %5133 = vst [vmem:[%s6774_s16 + $0x2c] sm:$0x7] %v679_v33  ;;  %v6449_v41 = vld [vmem:[%s6774_s16 + $0x8] ss:$0 sps:$4 sm:$0x11]   ;;  %v732_v42 = vadd.f32 %v5565_v23, %v721_v34  ;;  %v724_v43 = vadd.f32 %v6759_v22, %v723_v40  ;;  %v5759_v46 = vpop.f32.mrb[11].mxu0  ;;  %5833 = vmatpush3.bf16.msra.mxu1 %v6801_v13  ;;  %5786 = vmatprep.mubr.msk.bf16.mxu0 %vm6578_vm1, %v6577_v2 }
  0xfe   : > { %v801_v49 = vadd.f32 %v5569_v30, %v790_v39  ;;  %v792_v50 = vpop.f32.mrb[10].mxu1  ;;  %5790 = vmatprep.subr.bf16.mxu0 %v6577_v2  ;;  %5834 = vmatprep.mubr.msk.bf16.mxu1 %vm6578_vm1, %v6577_v2  ;;  %v1522_v58 = vrot.slane %v1520_v48, 1  ;;  %v1525_v59 = vshll.u32 %v6449_v41, 16  ;;  %v1518_v3 = vshrl.u32 %v6448_v38, 16  ;;  %v6447_v27 = vld [vmem:[%s6774_s16 + $0xc] sm:$0xff]  }
  0xff   : > { %v5522_v52 = vpack.c.bf16 %v732_v42, %v732_v42  ;;  %v733_v53 = vadd.f32 %v5566_v37, %v724_v43  ;;  %v793_v55 = vadd.f32 %v6759_v22, %v792_v50  ;;  %v5765_v56 = vpop.f32.mrb[11].mxu1  ;;  %5838 = vmatprep.subr.bf16.mxu1 %v6577_v2  ;;  %v6863_v28 = vsel %vm997_vm3, %v5181_v7, 0  ;;  %v5165_v37 = vld [vmem:[%s6774_s16 + $0x50] sm:$0x7]  ;;  %v5176_v40 = vld [vmem:[%s6774_s16 + $0x5c] sm:$0x7] }
 0x100   : > { %v5524_v60 = vpack.c.bf16 %v801_v49, %v801_v49  ;;  %v1523_v15 = vor.u32 %v1522_v58, %v1518_v3  ;;  %v1527_v16 = vrot.slane %v1525_v59, 1 }
 0x101   : > { %5141 = vst.msk [vmem:[%s6774_s16 + $0x30] sm:$0xf] %vm465_vm6, %v5522_v52  ;;  %v734_v61 = vpack.c.bf16 %v733_v53, %v732_v42  ;;  %v5523_v62 = vpack.c.bf16 %v733_v53, %v733_v53  ;;  %v802_v63 = vadd.f32 %v5570_v45, %v793_v55  ;;  %v5182_v45 = vld [vmem:[%s7433_s4 + $0x6] sm:$0x3]  ;;  %v5183_v55 = vld [vmem:[%s7433_s4 + $0x8] sm:$0x3] }
 0x102   : > { %5152 = vst.msk [vmem:[%s6774_s16 + $0x3c] sm:$0xf] %vm465_vm6, %v5524_v60  ;;  %v858_v4 = vpop.f32.mrb[12].mxu0  ;;  %v927_v14 = vpop.f32.mrb[12].mxu1  ;;  %v1528_v35 = vsel %vm1516_vm9, %v1523_v15, %v1527_v16  ;;  %v6453_v46 = vld [vmem:[%s6774_s16 + $0x18] sm:$0xff]   ;;  %v6919_v59 = vsel %vm997_vm3, %v5183_v55, 0 }
 0x103   : > { %5142 = vst.msk [vmem:[%s6774_s16 + $0x34] sm:$0xf] %vm465_vm6, %v5523_v62  ;;  %v748_v8 = vsel %vm6770_vm7, %v734_v61, %v5143_v54  ;;  %v803_v9 = vpack.c.bf16 %v802_v63, %v801_v49  ;;  %v5525_v10 = vpack.c.bf16 %v802_v63, %v802_v63  ;;  %v859_v11 = vadd.f32 %v6759_v22, %v858_v4  ;;  %v5770_v12 = vpop.f32.mrb[13].mxu0  ;;  %v5776_v24 = vpop.f32.mrb[13].mxu1  ;;  %v6450_v48 = vld [vmem:[%s6774_s16 + $0x18] sm:$0xff]   ;;  %v6451_v50 = vld [vmem:[%s6774_s16 + $0x24] sm:$0xff]  }
 0x104   : > { %5144 = vst [vmem:[%s6774_s16 + $0x38] sm:$0x7] %v748_v8  ;;  %v928_v17 = vadd.f32 %v6759_v22, %v927_v14  ;;  %v861_v18 = vpop.f32.mrb[14].mxu0  ;;  %v930_v30 = vpop.f32.mrb[14].mxu1  ;;  %v6900_v49 = vsel %vm997_vm3, %v5182_v45, 0  ;;  %v1642_v52 = vshll.u32 %v6453_v46, 16 }
 0x105   : > { %5153 = vst.msk [vmem:[%s6774_s16 + $0x40] sm:$0xf] %vm465_vm6, %v5525_v10  ;;  %v817_v20 = vsel %vm6770_vm7, %v803_v9, %v5154_v0  ;;  %v870_v21 = vadd.f32 %v5573_v1, %v859_v11  ;;  %v862_v23 = vadd.f32 %v6759_v22, %v861_v18  ;;  %v5771_v26 = vpop.f32.mrb[15].mxu0  ;;  %v931_v33 = vadd.f32 %v6759_v22, %v930_v30  ;;  %v5777_v34 = vpop.f32.mrb[15].mxu1  ;;  %v6452_v58 = vld [vmem:[%s6774_s16 + $0x24] sm:$0xff]  }
 0x106   : > { %5155 = vst [vmem:[%s6774_s16 + $0x44] sm:$0x7] %v817_v20  ;;  %v939_v29 = vadd.f32 %v5577_v5, %v928_v17  ;;  %v6454_v51 = vld [vmem:[%s6774_s16 + $0x20] ss:$0 sps:$4 sm:$0x11]   ;;  %v1640_v47 = vshrl.u32 %v6453_v46, 16 }
 0x107   : > { %v5526_v31 = vpack.c.bf16 %v870_v21, %v870_v21  ;;  %v871_v32 = vadd.f32 %v5574_v6, %v862_v23  ;;  %5787 = vmatmul.mubr.msk.bf16.vlgmr.msra.gmra.mrb[16].mxu0 %vm993_vm8, %v6447_v27  ;;  %v940_v22 = vadd.f32 %v5578_v25, %v931_v33  ;;  %v1644_v53 = vrot.slane %v1642_v52, 1  ;;  %v5184_v61 = vld [vmem:[%s7433_s4 + $0xa] sm:$0x3]  ;;  %v5185_v8 = vld [vmem:[%s7433_s4 + $0xc] sm:$0x3]  ;;  %v6465_v33 = vld [vmem:[%s6774_s16 + $0x18] sm:$0xff]  }
 0x108   : > { %v5528_v36 = vpack.c.bf16 %v939_v29, %v939_v29  ;;  %5791 = vmatpush3.bf16.msra.mxu0 %v6863_v28  ;;  %5835 = vmatmul.mubr.msk.bf16.vlgmr.msra.gmra.mrb[16].mxu1 %vm993_vm8, %v1528_v35  ;;  %v1647_v54 = vshll.u32 %v6454_v51, 16  ;;  %v6940_v0 = vsel %vm997_vm3, %v5184_v61, 0  ;;  %v6960_v12 = vsel %vm997_vm3, %v5185_v8, 0  ;;  %v5186_v15 = vld [vmem:[%s7433_s4 + $0xe] sm:$0x3]  ;;  %v6466_v34 = vld [vmem:[%s6774_s16 + $0x24] sm:$0xff]  }
 0x109   : > { %5163 = vst.msk [vmem:[%s6774_s16 + $0x48] sm:$0xf] %vm465_vm6, %v5526_v31  ;;  %v872_v38 = vpack.c.bf16 %v871_v32, %v870_v21  ;;  %v5527_v39 = vpack.c.bf16 %v871_v32, %v871_v32  ;;  %5839 = vmatpush3.bf16.msra.mxu1 %v6863_v28  ;;  %5792 = vmatprep.mubr.msk.bf16.mxu0 %vm6578_vm1, %v6577_v2  ;;  %v6981_v18 = vsel %vm997_vm3, %v5186_v15, 0  ;;  %v6468_v32 = vld [vmem:[%s6774_s16 + $0x18] sm:$0xff]   ;;  %v6472_v45 = vld [vmem:[%s6774_s16 + $0xc] sm:$0xfc]  }
 0x10a   : > { %5174 = vst.msk [vmem:[%s6774_s16 + $0x54] sm:$0xf] %vm465_vm6, %v5528_v36  ;;  %5796 = vmatprep.subr.bf16.mxu0 %v6577_v2  ;;  %5840 = vmatprep.mubr.msk.bf16.mxu1 %vm6578_vm1, %v6577_v2  ;;  %v941_v42 = vpack.c.bf16 %v940_v22, %v939_v29  ;;  %v5529_v43 = vpack.c.bf16 %v940_v22, %v940_v22  ;;  %v1649_v57 = vrot.slane %v1647_v54, 1  ;;  %v6458_v62 = vld [vmem:[%s6774_s16 + $0x30] sm:$0xff]   ;;  %v2495_v36 = vshll.u32 %v6468_v32, 16 }
 0x10b   : > { %5164 = vst.msk [vmem:[%s6774_s16 + $0x4c] sm:$0xf] %vm465_vm6, %v5527_v39  ;;  %v886_v41 = vsel %vm6770_vm7, %v872_v38, %v5165_v37  ;;  %5844 = vmatprep.subr.bf16.mxu1 %v6577_v2  ;;  %v1645_v56 = vor.u32 %v1644_v53, %v1640_v47  ;;  %v6455_v63 = vld [vmem:[%s6774_s16 + $0x30] sm:$0xff]   ;;  %v6459_v3 = vld [vmem:[%s6774_s16 + $0x38] ss:$0 sps:$4 sm:$0x11]  }
 0x10c   : > { %5166 = vst [vmem:[%s6774_s16 + $0x50] sm:$0x7] %v886_v41  ;;  %5175 = vst.msk [vmem:[%s6774_s16 + $0x58] sm:$0xf] %vm465_vm6, %v5529_v43  ;;  %v955_v44 = vsel %vm6770_vm7, %v941_v42, %v5176_v40  ;;  %v6456_v1 = vld [vmem:[%s6774_s16 + $0x3c] sm:$0xff]   ;;  %v1764_v4 = vshll.u32 %v6458_v62, 16 }
 0x10d   : > { %5177 = vst [vmem:[%s6774_s16 + $0x5c] sm:$0x7] %v955_v44  ;;  %v1650_v60 = vsel %vm1516_vm9, %v1645_v56, %v1649_v57  ;;  %v1769_v5 = vshll.u32 %v6459_v3, 16  ;;  %v1762_v6 = vshrl.u32 %v6458_v62, 16  ;;  %v6457_v11 = vld [vmem:[%s6774_s16 + $0x3c] sm:$0xff]   ;;  %v2493_v37 = vshrl.u32 %v6468_v32, 16 }
 0x10e   : > { %v1766_v7 = vrot.slane %v1764_v4, 1  ;;  %v6469_v35 = vld [vmem:[%s6774_s16 + $0x20] ss:$0 sps:$4 sm:$0x11]   ;;  %v2497_v38 = vrot.slane %v2495_v36, 1  ;;  %v6467_v41 = vld [vmem:[%s6774_s16 + $0x24] sm:$0xff]  }
 0x10f   : > { %v1771_v9 = vrot.slane %v1769_v5, 1  ;;  %v2500_v39 = vshll.u32 %v6469_v35, 16  ;;  %v6470_v43 = vld [vmem:[%s6774_s16] sm:$0xfc]   ;;  %v2561_v51 = vrot.slane %v6472_v45, 2 }
 0x110   : > { %v1767_v10 = vor.u32 %v1766_v7, %v1762_v6  ;;  %v2498_v22 = vor.u32 %v2497_v38, %v2493_v37  ;;  %v6471_v44 = vld [vmem:[%s6774_s16 + $0x8] ss:$0 sps:$4 sm:$0x33]   ;;  %v6473_v46 = vld [vmem:[%s6774_s16 + $0x14] ss:$0 sps:$4 sm:$0x33]  }
 0x111   : > { %v2502_v40 = vrot.slane %v2500_v39, 1  ;;  %v2562_v52 = vrot.slane %v6473_v46, 2  ;;  %v6476_v47 = vld [vmem:[%s6774_s16] sm:$0xfc]   ;;  %v6474_v61 = vld [vmem:[%s6774_s16 + $0xc] sm:$0xfc]  }
 0x112   : > { %v1772_v14 = vsel %vm1516_vm9, %v1767_v10, %v1771_v9  ;;  %v6463_v16 = vld [vmem:[%s6774_s16 + $0x48] sm:$0xff]   ;;  %v2623_v56 = vshrl.u32 %v6476_v47, 16  ;;  %v2626_v57 = vshll.u32 %v6476_v47, 16  ;;  %v6475_v62 = vld [vmem:[%s6774_s16 + $0x14] ss:$0 sps:$4 sm:$0x33]  }
 0x113   : > { %5793 = vmatmul.mubr.msk.bf16.vlgmr.msra.gmra.mrb[16].mxu0 %vm993_vm8, %v6450_v48  ;;  %v6460_v17 = vld [vmem:[%s6774_s16 + $0x48] sm:$0xff]   ;;  %v6461_v20 = vld [vmem:[%s6774_s16 + $0x54] sm:$0xff]   ;;  %v6464_v21 = vld [vmem:[%s6774_s16 + $0x50] ss:$0 sps:$4 sm:$0x11]   ;;  %v1886_v23 = vshll.u32 %v6463_v16, 16  ;;  %v2503_v42 = vsel %vm1516_vm9, %v2498_v22, %v2502_v40  ;;  %v2563_v55 = vsel %vm2075_vm10, %v2561_v51, %v2562_v52 }
 0x114   : > { %5797 = vmatpush3.bf16.msra.mxu0 %v6900_v49  ;;  %5841 = vmatmul.mubr.msk.bf16.vlgmr.msra.gmra.mrb[16].mxu1 %vm993_vm8, %v6451_v50  ;;  %v1884_v24 = vshrl.u32 %v6463_v16, 16  ;;  %v1891_v26 = vshll.u32 %v6464_v21, 16  ;;  %v6462_v30 = vld [vmem:[%s6774_s16 + $0x54] sm:$0xff]   ;;  %v2076_v48 = vrot.slane %v6470_v43, 2  ;;  %v2077_v50 = vrot.slane %v6471_v44, 2 }
 0x115   : > { %5845 = vmatpush3.bf16.msra.mxu1 %v6900_v49  ;;  %5798 = vmatprep.mubr.msk.bf16.mxu0 %vm6578_vm1, %v6577_v2  ;;  %v1888_v25 = vrot.slane %v1886_v23, 1  ;;  %v6477_v53 = vld [vmem:[%s6774_s16 + $0x8] ss:$0 sps:$4 sm:$0x77]   ;;  %v2136_v5 = vrot.slane %v6474_v61, 2  ;;  %v2137_v6 = vrot.slane %v6475_v62, 2 }
 0x116   : > { %5802 = vmatprep.subr.bf16.mxu0 %v6577_v2  ;;  %5846 = vmatprep.mubr.msk.bf16.mxu1 %vm6578_vm1, %v6577_v2  ;;  %v1893_v29 = vrot.slane %v1891_v26, 1  ;;  %v2078_v54 = vsel %vm2075_vm10, %v2076_v48, %v2077_v50  ;;  %v6479_v15 = vld [vmem:[%s6774_s16 + $0x54] sm:$0xff]   ;;  %v6482_v16 = vld [vmem:[%s6774_s16 + $0x50] ss:$0 sps:$4 sm:$0x11]  }
 0x117   : > { %5850 = vmatprep.subr.bf16.mxu1 %v6577_v2  ;;  %v1889_v27 = vor.u32 %v1888_v25, %v1884_v24  ;;  %v2138_v9 = vsel %vm2075_vm10, %v2136_v5, %v2137_v6  ;;  %v2757_v23 = vshll.u32 %v6482_v16, 16  ;;  %v6480_v26 = vld [vmem:[%s6774_s16 + $0x54] sm:$0xff]   ;;  %v6486_v32 = vld [vmem:[%s6774_s16 + $0x44] ss:$0 sps:$4 sm:$0x33]   ;;  %v6493_v6 = vld [vmem:[%s6774_s16 + $0x3c] sm:$0xff]  }
 0x118   : > { %v2819_v36 = vrot.slane %v6486_v32, 2  ;;  %v6489_v37 = vld [vmem:[%s6774_s16 + $0x30] sm:$0xfc]   ;;  %v6490_v38 = vld [vmem:[%s6774_s16 + $0x38] ss:$0 sps:$4 sm:$0x77]  }
 0x119   : > { %v1894_v31 = vsel %vm1516_vm9, %v1889_v27, %v1893_v29  ;;  %v2759_v25 = vrot.slane %v2757_v23, 1  ;;  %v6483_v29 = vld [vmem:[%s6774_s16 + $0x30] sm:$0xfc]   ;;  %v2879_v40 = vshrl.u32 %v6489_v37, 16  ;;  %v2890_v43 = vshll.u32 %v6490_v38, 16 }
 0x11a   : > { %v6487_v44 = vld [vmem:[%s6774_s16 + $0x3c] sm:$0xfc]   ;;  %v6488_v45 = vld [vmem:[%s6774_s16 + $0x44] ss:$0 sps:$4 sm:$0x33]   ;;  %v6498_v23 = vld [vmem:[%s6774_s16 + $0x54] sm:$0xff]  }
 0x11b   : > { %v2881_v46 = vrot.slane %v2879_v40, 2  ;;  %v2892_v51 = vrot.slane %v2890_v43, 3  ;;  %v2362_v52 = vrot.slane %v6487_v44, 2  ;;  %v2363_v47 = vrot.slane %v6488_v45, 2 }
 0x11c   : > { %v6495_v61 = vld [vmem:[%s6774_s16 + $0x38] ss:$0 sps:$4 sm:$0x11]   ;;  %v6510_v40 = vld [vmem:[%s6962_s17 + $0x20] ss:$0 sps:$4 sm:$0x11]  }
 0x11d   : > { %v3849_v44 = vshll.u32 %v6510_v40, 16 }
 0x11f   : > { %5799 = vmatmul.mubr.msk.bf16.vlgmr.msra.gmra.mrb[16].mxu0 %vm993_vm8, %v6452_v58  ;;  %v2631_v58 = vshrl.u32 %v6477_v53, 16 }
 0x120   : > { %5803 = vmatpush3.bf16.msra.mxu0 %v6919_v59  ;;  %5847 = vmatmul.mubr.msk.bf16.vlgmr.msra.gmra.mrb[16].mxu1 %vm993_vm8, %v1650_v60  ;;  %v2634_v60 = vshll.u32 %v6477_v53, 16 }
 0x121   : > { %5851 = vmatpush3.bf16.msra.mxu1 %v6919_v59  ;;  %5804 = vmatprep.mubr.msk.bf16.mxu0 %vm6578_vm1, %v6577_v2  ;;  %v2633_v3 = vrot.slane %v2631_v58, 2  ;;  %v6491_v58 = vld [vmem:[%s6774_s16 + $0x30] sm:$0xff]  }
 0x122   : > { %5808 = vmatprep.subr.bf16.mxu0 %v6577_v2  ;;  %5852 = vmatprep.mubr.msk.bf16.mxu1 %vm6578_vm1, %v6577_v2  ;;  %v2636_v4 = vrot.slane %v2634_v60, 3  ;;  %v6492_v60 = vld [vmem:[%s6774_s16 + $0x3c] sm:$0xff]  }
 0x123   : > { %5856 = vmatprep.subr.bf16.mxu1 %v6577_v2 }
 0x124   : > { %v2637_v8 = vor.u32 %v2636_v4, %v2633_v3  ;;  %v3483_v3 = vshll.u32 %v6495_v61, 16  ;;  %v6516_v61 = vld [vmem:[%s6774_s16 + $0x30] sm:$0xfc]  }
 0x126   : > { %v3485_v5 = vrot.slane %v3483_v3, 1  ;;  %v4033_v3 = vrot.slane %v6516_v61, 2 }
 0x12b   : > { %5805 = vmatmul.mubr.msk.bf16.vlgmr.msra.gmra.mrb[16].mxu0 %vm993_vm8, %v6455_v63  ;;  %v2625_v63 = vrot.slane %v2623_v56, 2 }
 0x12c   : > { %5809 = vmatpush3.bf16.msra.mxu0 %v6940_v0  ;;  %5853 = vmatmul.mubr.msk.bf16.vlgmr.msra.gmra.mrb[16].mxu1 %vm993_vm8, %v6456_v1  ;;  %v2628_v1 = vrot.slane %v2626_v57, 3  ;;  %v6494_v57 = vld [vmem:[%s6774_s16 + $0x30] sm:$0xff]  }
 0x12d   : > { %5857 = vmatpush3.bf16.msra.mxu1 %v6940_v0  ;;  %5810 = vmatprep.mubr.msk.bf16.mxu0 %vm6578_vm1, %v6577_v2  ;;  %v3478_v62 = vshll.u32 %v6494_v57, 16 }
 0x12e   : > { %5814 = vmatprep.subr.bf16.mxu0 %v6577_v2  ;;  %5858 = vmatprep.mubr.msk.bf16.mxu1 %vm6578_vm1, %v6577_v2  ;;  %v2629_v7 = vor.u32 %v2628_v1, %v2625_v63  ;;  %v3476_v63 = vshrl.u32 %v6494_v57, 16 }
 0x12f   : > { %5862 = vmatprep.subr.bf16.mxu1 %v6577_v2  ;;  %v3480_v1 = vrot.slane %v3478_v62, 1  ;;  %v6517_v62 = vld [vmem:[%s6774_s16 + $0x38] ss:$0 sps:$4 sm:$0x33]  }
 0x130   : > { %v2638_v10 = vsel %vm2621_vm11, %v2629_v7, %v2637_v8  ;;  %v6499_v8 = vld [vmem:[%s6774_s16 + $0x48] sm:$0xff]  }
 0x131   : > { %v3481_v4 = vor.u32 %v3480_v1, %v3476_v63  ;;  %v6518_v63 = vld [vmem:[%s6774_s16 + $0x3c] sm:$0xfc]   ;;  %v6519_v1 = vld [vmem:[%s6774_s16 + $0x44] ss:$0 sps:$4 sm:$0x33]  }
 0x133   : > { %v3486_v7 = vsel %vm1516_vm9, %v3481_v4, %v3485_v5  ;;  %v4034_v4 = vrot.slane %v6517_v62, 2  ;;  %v7260_v5 = vld [vmem:[%s7434_s5] ss:$0 sm:$0xff] }
 0x137   : > { %5811 = vmatmul.mubr.msk.bf16.vlgmr.msra.gmra.mrb[16].mxu0 %vm993_vm8, %v6457_v11  ;;  %v6481_v11 = vld [vmem:[%s6774_s16 + $0x48] sm:$0xff]  }
 0x138   : > { %5815 = vmatpush3.bf16.msra.mxu0 %v6960_v12  ;;  %5859 = vmatmul.mubr.msk.bf16.vlgmr.msra.gmra.mrb[16].mxu1 %vm993_vm8, %v1772_v14  ;;  %v6478_v14 = vld [vmem:[%s6774_s16 + $0x48] sm:$0xff]  }
 0x139   : > { %5863 = vmatpush3.bf16.msra.mxu1 %v6960_v12  ;;  %5816 = vmatprep.mubr.msk.bf16.mxu0 %vm6578_vm1, %v6577_v2 }
 0x13a   : > { %5820 = vmatprep.subr.bf16.mxu0 %v6577_v2  ;;  %5864 = vmatprep.mubr.msk.bf16.mxu1 %vm6578_vm1, %v6577_v2 }
 0x13b   : > { %5868 = vmatprep.subr.bf16.mxu1 %v6577_v2 }
 0x143   : > { %5817 = vmatmul.mubr.msk.bf16.vlgmr.msra.gmra.mrb[16].mxu0 %vm993_vm8, %v6460_v17  ;;  %v2752_v17 = vshll.u32 %v6481_v11, 16 }
 0x144   : > { %5821 = vmatpush3.bf16.msra.mxu0 %v6981_v18  ;;  %5865 = vmatmul.mubr.msk.bf16.vlgmr.msra.gmra.mrb[16].mxu1 %vm993_vm8, %v6461_v20  ;;  %v2750_v20 = vshrl.u32 %v6481_v11, 16  ;;  %v6500_v11 = vld [vmem:[%s6774_s16 + $0x50] ss:$0 sps:$4 sm:$0x11]  }
 0x145   : > { %5869 = vmatpush3.bf16.msra.mxu1 %v6981_v18  ;;  %5822 = vmatprep.mubr.msk.bf16.mxu0 %vm6578_vm1, %v6577_v2  ;;  %v2754_v21 = vrot.slane %v2752_v17, 1  ;;  %v3605_v17 = vshll.u32 %v6500_v11, 16 }
 0x146   : > { %5870 = vmatprep.mubr.msk.bf16.mxu1 %vm6578_vm1, %v6577_v2  ;;  %5874 = vmatprep.subr.bf16.mxu0 %v6577_v2 }
 0x147   : > { %5922 = vmatprep.subr.bf16.mxu1 %v6577_v2  ;;  %v2755_v24 = vor.u32 %v2754_v21, %v2750_v20  ;;  %v3607_v21 = vrot.slane %v3605_v17, 1 }
 0x149   : > { %v2760_v27 = vsel %vm1516_vm9, %v2755_v24, %v2759_v25  ;;  %v6504_v25 = vld [vmem:[%s6962_s17] sm:$0xff]  }
 0x14f   : > { %5823 = vmatmul.mubr.msk.bf16.vlgmr.msra.gmra.mrb[16].mxu0 %vm993_vm8, %v6462_v30  ;;  %v6484_v30 = vld [vmem:[%s6774_s16 + $0x38] ss:$0 sps:$4 sm:$0x33]  }
 0x150   : > { %5871 = vmatmul.mubr.msk.bf16.vlgmr.msra.gmra.mrb[16].mxu1 %vm993_vm8, %v1894_v31  ;;  %5875 = vmatpush3.bf16.msra.mxu0 %v6735_v19  ;;  %v6485_v31 = vld [vmem:[%s6774_s16 + $0x3c] sm:$0xfc]  }
 0x151   : > { %5923 = vmatpush3.bf16.msra.mxu1 %v6735_v19  ;;  %5876 = vmatprep.mubr.msk.bf16.mxu0 %vm6578_vm1, %v6577_v2  ;;  %v2818_v35 = vrot.slane %v6485_v31, 2 }
 0x152   : > { %5880 = vmatprep.subr.bf16.mxu0 %v6577_v2  ;;  %5924 = vmatprep.mubr.msk.bf16.mxu1 %vm6578_vm1, %v6577_v2 }
 0x153   : > { %5928 = vmatprep.subr.bf16.mxu1 %v6577_v2  ;;  %v2820_v22 = vsel %vm2075_vm10, %v2818_v35, %v2819_v36  ;;  %v6503_v36 = vld [vmem:[%s6962_s17 + $0xc] sm:$0xff]  }
 0x157   : > { %5877 = vmatmul.mubr.msk.bf16.vlgmr.msra.gmra.mrb[20].mxu0 %vm993_vm8, %v6465_v33  ;;  %v2302_v33 = vrot.slane %v6483_v29, 2  ;;  %v6505_v29 = vld [vmem:[%s6962_s17 + $0x8] ss:$0 sps:$4 sm:$0x11]  }
 0x158   : > { %5881 = vmatpush3.bf16.msra.mxu0 %v6801_v13  ;;  %5925 = vmatmul.mubr.msk.bf16.vlgmr.msra.gmra.mrb[20].mxu1 %vm993_vm8, %v6466_v34  ;;  %v2303_v34 = vrot.slane %v6484_v30, 2  ;;  %v3722_v30 = vshll.u32 %v6504_v25, 16  ;;  %v3727_v32 = vshll.u32 %v6505_v29, 16 }
 0x159   : > { %5929 = vmatpush3.bf16.msra.mxu1 %v6801_v13  ;;  %5882 = vmatprep.mubr.msk.bf16.mxu0 %vm6578_vm1, %v6577_v2 }
 0x15a   : > { %5886 = vmatprep.subr.bf16.mxu0 %v6577_v2  ;;  %5930 = vmatprep.mubr.msk.bf16.mxu1 %vm6578_vm1, %v6577_v2  ;;  %v2304_v39 = vsel %vm2075_vm10, %v2302_v33, %v2303_v34  ;;  %v3724_v31 = vrot.slane %v3722_v30, 1  ;;  %v3720_v33 = vshrl.u32 %v6504_v25, 16  ;;  %v3729_v35 = vrot.slane %v3727_v32, 1 }
 0x15b   : > { %5934 = vmatprep.subr.bf16.mxu1 %v6577_v2 }
 0x15c   : > { %v3725_v34 = vor.u32 %v3724_v31, %v3720_v33 }
 0x163   : > { %5883 = vmatmul.mubr.msk.bf16.vlgmr.msra.gmra.mrb[20].mxu0 %vm993_vm8, %v6467_v41  ;;  %v2882_v41 = vshll.u32 %v6489_v37, 16  ;;  %v3730_v37 = vsel %vm1516_vm9, %v3725_v34, %v3729_v35 }
 0x164   : > { %5887 = vmatpush3.bf16.msra.mxu0 %v6863_v28  ;;  %5931 = vmatmul.mubr.msk.bf16.vlgmr.msra.gmra.mrb[20].mxu1 %vm993_vm8, %v2503_v42  ;;  %v2887_v42 = vshrl.u32 %v6490_v38, 16  ;;  %v6509_v38 = vld [vmem:[%s6962_s17 + $0x18] sm:$0xff]  }
 0x165   : > { %5935 = vmatpush3.bf16.msra.mxu1 %v6863_v28  ;;  %5888 = vmatprep.mubr.msk.bf16.mxu0 %vm6578_vm1, %v6577_v2  ;;  %v2884_v48 = vrot.slane %v2882_v41, 3  ;;  %v3844_v41 = vshll.u32 %v6509_v38, 16 }
 0x166   : > { %5892 = vmatprep.subr.bf16.mxu0 %v6577_v2  ;;  %5936 = vmatprep.mubr.msk.bf16.mxu1 %vm6578_vm1, %v6577_v2  ;;  %v2889_v50 = vrot.slane %v2887_v42, 2  ;;  %v3842_v42 = vshrl.u32 %v6509_v38, 16 }
 0x167   : > { %5940 = vmatprep.subr.bf16.mxu1 %v6577_v2  ;;  %v2885_v53 = vor.u32 %v2884_v48, %v2881_v46  ;;  %v3846_v43 = vrot.slane %v3844_v41, 1  ;;  %v3851_v46 = vrot.slane %v3849_v44, 1  ;;  %v6508_v48 = vld [vmem:[%s6962_s17 + $0x24] sm:$0xff]   ;;  %v6520_v44 = vld [vmem:[%s6774_s16 + $0x3c] sm:$0xfc]  }
 0x169   : > { %v3847_v45 = vor.u32 %v3846_v43, %v3842_v42 }
 0x16f   : > { %5889 = vmatmul.mubr.msk.bf16.vlgmr.msra.gmra.mrb[20].mxu0 %vm993_vm8, %v2078_v54  ;;  %v2893_v54 = vor.u32 %v2892_v51, %v2889_v50  ;;  %v3852_v50 = vsel %vm1516_vm9, %v3847_v45, %v3851_v46  ;;  %v6514_v51 = vld [vmem:[%s6774_s16 + $0x48] sm:$0xff]   ;;  %v6521_v45 = vld [vmem:[%s6774_s16 + $0x44] ss:$0 sps:$4 sm:$0x33]  }
 0x170   : > { %5893 = vmatpush3.bf16.msra.mxu0 %v6900_v49  ;;  %5937 = vmatmul.mubr.msk.bf16.vlgmr.msra.gmra.mrb[20].mxu1 %vm993_vm8, %v2563_v55  ;;  %v2364_v55 = vsel %vm2075_vm10, %v2362_v52, %v2363_v47  ;;  %v6511_v52 = vld [vmem:[%s6774_s16 + $0x48] sm:$0xff]   ;;  %v6512_v47 = vld [vmem:[%s6774_s16 + $0x54] sm:$0xff]  }
 0x171   : > { %5941 = vmatpush3.bf16.msra.mxu1 %v6900_v49  ;;  %5894 = vmatprep.mubr.msk.bf16.mxu0 %vm6578_vm1, %v6577_v2  ;;  %v2894_v56 = vsel %vm2621_vm11, %v2885_v53, %v2893_v54  ;;  %v6515_v53 = vld [vmem:[%s6774_s16 + $0x50] ss:$0 sps:$4 sm:$0x11]   ;;  %v4452_v54 = vshll.u32 %v6514_v51, 16 }
 0x172   : > { %5898 = vmatprep.subr.bf16.mxu0 %v6577_v2  ;;  %5942 = vmatprep.mubr.msk.bf16.mxu1 %vm6578_vm1, %v6577_v2 }
 0x173   : > { %5946 = vmatprep.subr.bf16.mxu1 %v6577_v2 }
 0x17b   : > { %5895 = vmatmul.mubr.msk.bf16.vlgmr.msra.gmra.mrb[20].mxu0 %vm993_vm8, %v2138_v9  ;;  %v6496_v9 = vld [vmem:[%s6774_s16 + $0x48] sm:$0xff]  }
 0x17c   : > { %5899 = vmatpush3.bf16.msra.mxu0 %v6919_v59  ;;  %5943 = vmatmul.mubr.msk.bf16.vlgmr.msra.gmra.mrb[20].mxu1 %vm993_vm8, %v2638_v10  ;;  %v6497_v10 = vld [vmem:[%s6774_s16 + $0x54] sm:$0xff]  }
 0x17d   : > { %5947 = vmatpush3.bf16.msra.mxu1 %v6919_v59  ;;  %5900 = vmatprep.mubr.msk.bf16.mxu0 %vm6578_vm1, %v6577_v2 }
 0x17e   : > { %5904 = vmatprep.subr.bf16.mxu0 %v6577_v2  ;;  %5948 = vmatprep.mubr.msk.bf16.mxu1 %vm6578_vm1, %v6577_v2 }
 0x17f   : > { %5952 = vmatprep.subr.bf16.mxu1 %v6577_v2 }
 0x187   : > { %5901 = vmatmul.mubr.msk.bf16.vlgmr.msra.gmra.mrb[20].mxu0 %vm993_vm8, %v6478_v14  ;;  %v3600_v14 = vshll.u32 %v6499_v8, 16 }
 0x188   : > { %5905 = vmatpush3.bf16.msra.mxu0 %v6940_v0  ;;  %5949 = vmatmul.mubr.msk.bf16.vlgmr.msra.gmra.mrb[20].mxu1 %vm993_vm8, %v6479_v15  ;;  %v3598_v15 = vshrl.u32 %v6499_v8, 16  ;;  %v7266_v8 = vld [vmem:[%s7435_s6] ss:$0 sm:$0xff] }
 0x189   : > { %5953 = vmatpush3.bf16.msra.mxu1 %v6940_v0  ;;  %5906 = vmatprep.mubr.msk.bf16.mxu0 %vm6578_vm1, %v6577_v2  ;;  %v3602_v16 = vrot.slane %v3600_v14, 1 }
 0x18a   : > { %5910 = vmatprep.subr.bf16.mxu0 %v6577_v2  ;;  %5954 = vmatprep.mubr.msk.bf16.mxu1 %vm6578_vm1, %v6577_v2 }
 0x18b   : > { %5958 = vmatprep.subr.bf16.mxu1 %v6577_v2  ;;  %v3603_v20 = vor.u32 %v3602_v16, %v3598_v15 }
 0x18d   : > { %v3608_v24 = vsel %vm1516_vm9, %v3603_v20, %v3607_v21  ;;  %v4035_v21 = vsel %vm2075_vm10, %v4033_v3, %v4034_v4  ;;  %v6529_v4 = vld [vmem:[%s6962_s17] sm:$0xfc]  }
 0x193   : > { %5907 = vmatmul.mubr.msk.bf16.vlgmr.msra.gmra.mrb[20].mxu0 %vm993_vm8, %v6480_v26  ;;  %v6501_v26 = vld [vmem:[%s6962_s17] sm:$0xff]  }
 0x194   : > { %5911 = vmatpush3.bf16.msra.mxu0 %v6960_v12  ;;  %5955 = vmatmul.mubr.msk.bf16.vlgmr.msra.gmra.mrb[20].mxu1 %vm993_vm8, %v2760_v27  ;;  %v6502_v27 = vld [vmem:[%s6962_s17 + $0xc] sm:$0xff]  }
 0x195   : > { %5959 = vmatpush3.bf16.msra.mxu1 %v6960_v12  ;;  %5912 = vmatprep.mubr.msk.bf16.mxu0 %vm6578_vm1, %v6577_v2 }
 0x196   : > { %5916 = vmatprep.subr.bf16.mxu0 %v6577_v2  ;;  %5960 = vmatprep.mubr.msk.bf16.mxu1 %vm6578_vm1, %v6577_v2 }
 0x197   : > { %5964 = vmatprep.subr.bf16.mxu1 %v6577_v2 }
 0x19f   : > { %5913 = vmatmul.mubr.msk.bf16.vlgmr.msra.gmra.mrb[20].mxu0 %vm993_vm8, %v2304_v39  ;;  %v6506_v39 = vld [vmem:[%s6962_s17 + $0x18] sm:$0xff]  }
 0x1a0   : > { %5917 = vmatpush3.bf16.msra.mxu0 %v6981_v18  ;;  %5961 = vmatmul.mubr.msk.bf16.vlgmr.msra.gmra.mrb[20].mxu1 %vm993_vm8, %v2820_v22  ;;  %v6507_v22 = vld [vmem:[%s6962_s17 + $0x24] sm:$0xff]  }
 0x1a1   : > { %5965 = vmatpush3.bf16.msra.mxu1 %v6981_v18  ;;  %5918 = vmatprep.mubr.msk.bf16.mxu0 %vm6578_vm1, %v6577_v2 }
 0x1a2   : > { %5966 = vmatprep.mubr.msk.bf16.mxu1 %vm6578_vm1, %v6577_v2  ;;  %5970 = vmatprep.subr.bf16.mxu0 %v6577_v2 }
 0x1a3   : > { %6018 = vmatprep.subr.bf16.mxu1 %v6577_v2 }
 0x1ab   : > { %5919 = vmatmul.mubr.msk.bf16.vlgmr.msra.gmra.mrb[20].mxu0 %vm993_vm8, %v2364_v55  ;;  %v4454_v55 = vrot.slane %v4452_v54, 1 }
 0x1ac   : > { %5967 = vmatmul.mubr.msk.bf16.vlgmr.msra.gmra.mrb[20].mxu1 %vm993_vm8, %v2894_v56  ;;  %5971 = vmatpush3.bf16.msra.mxu0 %v6735_v19  ;;  %v4457_v56 = vshll.u32 %v6515_v53, 16 }
 0x1ad   : > { %6019 = vmatpush3.bf16.msra.mxu1 %v6735_v19  ;;  %5972 = vmatprep.mubr.msk.bf16.mxu0 %vm6578_vm1, %v6577_v2 }
 0x1ae   : > { %5976 = vmatprep.subr.bf16.mxu0 %v6577_v2  ;;  %6020 = vmatprep.mubr.msk.bf16.mxu1 %vm6578_vm1, %v6577_v2 }
 0x1af   : > { %6024 = vmatprep.subr.bf16.mxu1 %v6577_v2 }
 0x1b3   : > { %5973 = vmatmul.mubr.msk.bf16.vlgmr.msra.gmra.mrb[24].mxu0 %vm993_vm8, %v6491_v58  ;;  %v4459_v58 = vrot.slane %v4457_v56, 1  ;;  %v6527_v56 = vld [vmem:[%s6962_s17 + $0x18] sm:$0xff]  }
 0x1b4   : > { %5977 = vmatpush3.bf16.msra.mxu0 %v6801_v13  ;;  %6021 = vmatmul.mubr.msk.bf16.vlgmr.msra.gmra.mrb[24].mxu1 %vm993_vm8, %v6492_v60  ;;  %v6513_v60 = vld [vmem:[%s6774_s16 + $0x54] sm:$0xff]  }
 0x1b5   : > { %6025 = vmatpush3.bf16.msra.mxu1 %v6801_v13  ;;  %5978 = vmatprep.mubr.msk.bf16.mxu0 %vm6578_vm1, %v6577_v2 }
 0x1b6   : > { %5982 = vmatprep.subr.bf16.mxu0 %v6577_v2  ;;  %6026 = vmatprep.mubr.msk.bf16.mxu1 %vm6578_vm1, %v6577_v2 }
 0x1b7   : > { %6030 = vmatprep.subr.bf16.mxu1 %v6577_v2 }
 0x1bf   : > { %5979 = vmatmul.mubr.msk.bf16.vlgmr.msra.gmra.mrb[24].mxu0 %vm993_vm8, %v6493_v6  ;;  %v4518_v6 = vrot.slane %v6518_v63, 2 }
 0x1c0   : > { %5983 = vmatpush3.bf16.msra.mxu0 %v6863_v28  ;;  %6027 = vmatmul.mubr.msk.bf16.vlgmr.msra.gmra.mrb[24].mxu1 %vm993_vm8, %v3486_v7  ;;  %v4519_v7 = vrot.slane %v6519_v1, 2 }
 0x1c1   : > { %6031 = vmatpush3.bf16.msra.mxu1 %v6863_v28  ;;  %5984 = vmatprep.mubr.msk.bf16.mxu0 %vm6578_vm1, %v6577_v2 }
 0x1c2   : > { %5988 = vmatprep.subr.bf16.mxu0 %v6577_v2  ;;  %6032 = vmatprep.mubr.msk.bf16.mxu1 %vm6578_vm1, %v6577_v2 }
 0x1c3   : > { %6036 = vmatprep.subr.bf16.mxu1 %v6577_v2 }
 0x1cb   : > { %5985 = vmatmul.mubr.msk.bf16.vlgmr.msra.gmra.mrb[24].mxu0 %vm993_vm8, %v6496_v9 }
 0x1cc   : > { %5989 = vmatpush3.bf16.msra.mxu0 %v6900_v49  ;;  %6033 = vmatmul.mubr.msk.bf16.vlgmr.msra.gmra.mrb[24].mxu1 %vm993_vm8, %v6497_v10  ;;  %v6523_v10 = vld [vmem:[%s6774_s16 + $0x38] ss:$0 sps:$4 sm:$0x77]  }
 0x1cd   : > { %6037 = vmatpush3.bf16.msra.mxu1 %v6900_v49  ;;  %5990 = vmatprep.mubr.msk.bf16.mxu0 %vm6578_vm1, %v6577_v2  ;;  %v4587_v34 = vshrl.u32 %v6523_v10, 16 }
 0x1ce   : > { %5994 = vmatprep.subr.bf16.mxu0 %v6577_v2  ;;  %6038 = vmatprep.mubr.msk.bf16.mxu1 %vm6578_vm1, %v6577_v2 }
 0x1cf   : > { %6042 = vmatprep.subr.bf16.mxu1 %v6577_v2 }
 0x1d7   : > { %5991 = vmatmul.mubr.msk.bf16.vlgmr.msra.gmra.mrb[24].mxu0 %vm993_vm8, %v6498_v23  ;;  %v4520_v23 = vsel %vm2075_vm10, %v4518_v6, %v4519_v7  ;;  %v6530_v6 = vld [vmem:[%s6962_s17 + $0x8] ss:$0 sps:$4 sm:$0x33]   ;;  %v6531_v7 = vld [vmem:[%s6962_s17 + $0xc] sm:$0xfc]  }
 0x1d8   : > { %5995 = vmatpush3.bf16.msra.mxu0 %v6919_v59  ;;  %6039 = vmatmul.mubr.msk.bf16.vlgmr.msra.gmra.mrb[24].mxu1 %vm993_vm8, %v3608_v24 }
 0x1d9   : > { %6043 = vmatpush3.bf16.msra.mxu1 %v6919_v59  ;;  %5996 = vmatprep.mubr.msk.bf16.mxu0 %vm6578_vm1, %v6577_v2 }
 0x1da   : > { %6000 = vmatprep.subr.bf16.mxu0 %v6577_v2  ;;  %6044 = vmatprep.mubr.msk.bf16.mxu1 %vm6578_vm1, %v6577_v2 }
 0x1db   : > { %6048 = vmatprep.subr.bf16.mxu1 %v6577_v2 }
 0x1e3   : > { %5997 = vmatmul.mubr.msk.bf16.vlgmr.msra.gmra.mrb[24].mxu0 %vm993_vm8, %v6501_v26 }
 0x1e4   : > { %6001 = vmatpush3.bf16.msra.mxu0 %v6940_v0  ;;  %6045 = vmatmul.mubr.msk.bf16.vlgmr.msra.gmra.mrb[24].mxu1 %vm993_vm8, %v6502_v27 }
 0x1e5   : > { %6049 = vmatpush3.bf16.msra.mxu1 %v6940_v0  ;;  %6002 = vmatprep.mubr.msk.bf16.mxu0 %vm6578_vm1, %v6577_v2 }
 0x1e6   : > { %6006 = vmatprep.subr.bf16.mxu0 %v6577_v2  ;;  %6050 = vmatprep.mubr.msk.bf16.mxu1 %vm6578_vm1, %v6577_v2 }
 0x1e7   : > { %6054 = vmatprep.subr.bf16.mxu1 %v6577_v2 }
 0x1ef   : > { %6003 = vmatmul.mubr.msk.bf16.vlgmr.msra.gmra.mrb[24].mxu0 %vm993_vm8, %v6503_v36 }
 0x1f0   : > { %6007 = vmatpush3.bf16.msra.mxu0 %v6960_v12  ;;  %6051 = vmatmul.mubr.msk.bf16.vlgmr.msra.gmra.mrb[24].mxu1 %vm993_vm8, %v3730_v37  ;;  %v4590_v37 = vshll.u32 %v6523_v10, 16  ;;  %v4260_v10 = vrot.slane %v6530_v6, 2 }
 0x1f1   : > { %6055 = vmatpush3.bf16.msra.mxu1 %v6960_v12  ;;  %6008 = vmatprep.mubr.msk.bf16.mxu0 %vm6578_vm1, %v6577_v2 }
 0x1f2   : > { %6012 = vmatprep.subr.bf16.mxu0 %v6577_v2  ;;  %6056 = vmatprep.mubr.msk.bf16.mxu1 %vm6578_vm1, %v6577_v2 }
 0x1f3   : > { %6060 = vmatprep.subr.bf16.mxu1 %v6577_v2 }
 0x1fb   : > { %6009 = vmatmul.mubr.msk.bf16.vlgmr.msra.gmra.mrb[24].mxu0 %vm993_vm8, %v6506_v39 }
 0x1fc   : > { %6013 = vmatpush3.bf16.msra.mxu0 %v6981_v18  ;;  %6057 = vmatmul.mubr.msk.bf16.vlgmr.msra.gmra.mrb[24].mxu1 %vm993_vm8, %v6507_v22 }
 0x1fd   : > { %6061 = vmatpush3.bf16.msra.mxu1 %v6981_v18  ;;  %6014 = vmatprep.mubr.msk.bf16.mxu0 %vm6578_vm1, %v6577_v2 }
 0x1fe   : > { %6062 = vmatprep.mubr.msk.bf16.mxu1 %vm6578_vm1, %v6577_v2  ;;  %6066 = vmatprep.subr.bf16.mxu0 %v6577_v2 }
 0x1ff   : > { %6114 = vmatprep.subr.bf16.mxu1 %v6577_v2 }
 0x207   : > { %6015 = vmatmul.mubr.msk.bf16.vlgmr.msra.gmra.mrb[24].mxu0 %vm993_vm8, %v6508_v48 }
 0x208   : > { %6063 = vmatmul.mubr.msk.bf16.vlgmr.msra.gmra.mrb[24].mxu1 %vm993_vm8, %v3852_v50  ;;  %6067 = vmatpush3.bf16.msra.mxu0 %v6735_v19  ;;  %v4589_v50 = vrot.slane %v4587_v34, 2 }
 0x209   : > { %6115 = vmatpush3.bf16.msra.mxu1 %v6735_v19  ;;  %6068 = vmatprep.mubr.msk.bf16.mxu0 %vm6578_vm1, %v6577_v2  ;;  %v4450_v19 = vshrl.u32 %v6514_v51, 16  ;;  %v4592_v51 = vrot.slane %v4590_v37, 3 }
 0x20a   : > { %6072 = vmatprep.subr.bf16.mxu0 %v6577_v2  ;;  %6116 = vmatprep.mubr.msk.bf16.mxu1 %vm6578_vm1, %v6577_v2 }
 0x20b   : > { %6120 = vmatprep.subr.bf16.mxu1 %v6577_v2  ;;  %v4455_v57 = vor.u32 %v4454_v55, %v4450_v19  ;;  %v4593_v54 = vor.u32 %v4592_v51, %v4589_v50 }
 0x20f   : > { %6069 = vmatmul.mubr.msk.bf16.vlgmr.msra.gmra.mrb[28].mxu0 %vm993_vm8, %v6511_v52  ;;  %v4093_v52 = vrot.slane %v6520_v44, 2 }
 0x210   : > { %6073 = vmatpush3.bf16.msra.mxu0 %v6801_v13  ;;  %6117 = vmatmul.mubr.msk.bf16.vlgmr.msra.gmra.mrb[28].mxu1 %vm993_vm8, %v6512_v47  ;;  %v4094_v47 = vrot.slane %v6521_v45, 2 }
 0x211   : > { %6121 = vmatpush3.bf16.msra.mxu1 %v6801_v13  ;;  %6074 = vmatprep.mubr.msk.bf16.mxu0 %vm6578_vm1, %v6577_v2  ;;  %v4460_v13 = vsel %vm1516_vm9, %v4455_v57, %v4459_v58  ;;  %v6524_v57 = vld [vmem:[%s6962_s17 + $0x18] sm:$0xff]   ;;  %v6525_v58 = vld [vmem:[%s6962_s17 + $0x24] sm:$0xff]  }
 0x212   : > { %6078 = vmatprep.subr.bf16.mxu0 %v6577_v2  ;;  %6122 = vmatprep.mubr.msk.bf16.mxu1 %vm6578_vm1, %v6577_v2  ;;  %v4095_v19 = vsel %vm2075_vm10, %v4093_v52, %v4094_v47 }
 0x213   : > { %6126 = vmatprep.subr.bf16.mxu1 %v6577_v2 }
 0x21b   : > { %6075 = vmatmul.mubr.msk.bf16.vlgmr.msra.gmra.mrb[28].mxu0 %vm993_vm8, %v6513_v60  ;;  %v6528_v60 = vld [vmem:[%s6962_s17 + $0x20] ss:$0 sps:$4 sm:$0x11]  }
 0x21c   : > { %6079 = vmatpush3.bf16.msra.mxu0 %v6863_v28  ;;  %6123 = vmatmul.mubr.msk.bf16.vlgmr.msra.gmra.mrb[28].mxu1 %vm993_vm8, %v4460_v13  ;;  %v4708_v13 = vshll.u32 %v6527_v56, 16  ;;  %v4713_v62 = vshll.u32 %v6528_v60, 16 }
 0x21d   : > { %6127 = vmatpush3.bf16.msra.mxu1 %v6863_v28  ;;  %6080 = vmatprep.mubr.msk.bf16.mxu0 %vm6578_vm1, %v6577_v2  ;;  %v6522_v28 = vld [vmem:[%s6774_s16 + $0x30] sm:$0xfc]  }
 0x21e   : > { %6084 = vmatprep.subr.bf16.mxu0 %v6577_v2  ;;  %6128 = vmatprep.mubr.msk.bf16.mxu1 %vm6578_vm1, %v6577_v2  ;;  %v4579_v24 = vshrl.u32 %v6522_v28, 16  ;;  %v4582_v30 = vshll.u32 %v6522_v28, 16  ;;  %v4710_v61 = vrot.slane %v4708_v13, 1  ;;  %v4715_v1 = vrot.slane %v4713_v62, 1 }
 0x21f   : > { %6132 = vmatprep.subr.bf16.mxu1 %v6577_v2  ;;  %v6532_v28 = vld [vmem:[%s6962_s17 + $0x14] ss:$0 sps:$4 sm:$0x33]  }
 0x220   : > { %v4581_v46 = vrot.slane %v4579_v24, 2  ;;  %v4584_v48 = vrot.slane %v4582_v30, 3 }
 0x222   : > { %v1427_v9 = vpop.f32.mrb[16].mxu0  ;;  %v4585_v53 = vor.u32 %v4584_v48, %v4581_v46 }
 0x223   : > { %v6162_v11 = vadd.f32 %v7260_v5, %v1427_v9  ;;  %v1932_v14 = vpop.f32.mrb[16].mxu1  ;;  %v5824_v15 = vpop.f32.mrb[17].mxu0  ;;  %v4259_v9 = vrot.slane %v6529_v4, 2 }
 0x224   : > { %v6164_v16 = vadd.f32 %v7260_v5, %v1932_v14  ;;  %v5872_v17 = vpop.f32.mrb[17].mxu1  ;;  %v1430_v20 = vpop.f32.mrb[18].mxu0  ;;  %v4594_v55 = vsel %vm2621_vm11, %v4585_v53, %v4593_v54  ;;  %v4775_v14 = vrot.slane %v6532_v28, 2  ;;  %v6536_v15 = vld [vmem:[%s6962_s17 + $0x8] ss:$0 sps:$4 sm:$0x77]  }
 0x225   : > { %vm1436_vm12 = vcmp.ge.f32.partialorder %v6162_v11, 0.0  ;;  %v1438_v25 = vmul.f32 %v6162_v11, %v7266_v8  ;;  %v6163_v26 = vadd.f32 %v7260_v5, %v1430_v20  ;;  %v1935_v27 = vpop.f32.mrb[18].mxu1  ;;  %v5825_v29 = vpop.f32.mrb[19].mxu0  ;;  %v4846_v24 = vshll.u32 %v6536_v15, 16 }
 0x226   : > { %vm1941_vm13 = vcmp.ge.f32.partialorder %v6164_v16, 0.0  ;;  %v1943_v31 = vmul.f32 %v6164_v16, %v7266_v8  ;;  %v6165_v32 = vadd.f32 %v7260_v5, %v1935_v27  ;;  %v5873_v33 = vpop.f32.mrb[19].mxu1 }
 0x227   : > { %v1440_v35 = vsel %vm1436_vm12, %v6162_v11, %v1438_v25  ;;  %vm1437_vm14 = vcmp.ge.f32.partialorder %v6163_v26, 0.0  ;;  %v1439_v36 = vmul.f32 %v6163_v26, %v7266_v8  ;;  %6081 = vmatmul.mubr.msk.bf16.vlgmr.msra.gmra.mrb[28].mxu0 %vm993_vm8, %v4035_v21  ;;  %v4774_v11 = vrot.slane %v6531_v7, 2  ;;  %v6533_v25 = vld [vmem:[%s6962_s17 + $0xc] sm:$0xfc]  }
 0x228   : > { %v5530_v38 = vpack.c.bf16 %v1440_v35, %v1440_v35  ;;  %v1945_v39 = vsel %vm1941_vm13, %v6164_v16, %v1943_v31  ;;  %vm1942_vm15 = vcmp.ge.f32.partialorder %v6165_v32, 0.0  ;;  %v1944_v22 = vmul.f32 %v6165_v32, %v7266_v8  ;;  %6085 = vmatpush3.bf16.msra.mxu0 %v6900_v49  ;;  %6129 = vmatmul.mubr.msk.bf16.vlgmr.msra.gmra.mrb[28].mxu1 %vm993_vm8, %v4520_v23 }
 0x229   : > { %v5532_v40 = vpack.c.bf16 %v1945_v39, %v1945_v39  ;;  %v1441_v41 = vsel %vm1437_vm14, %v6163_v26, %v1439_v36  ;;  %6133 = vmatpush3.bf16.msra.mxu1 %v6900_v49  ;;  %6086 = vmatprep.mubr.msk.bf16.mxu0 %vm6578_vm1, %v6577_v2  ;;  %v4261_v16 = vsel %vm2075_vm10, %v4259_v9, %v4260_v10  ;;  %v4843_v23 = vshrl.u32 %v6536_v15, 16  ;;  %v6534_v26 = vld [vmem:[%s6962_s17 + $0x14] ss:$0 sps:$4 sm:$0x33]  }
 0x22a   : > { %1450 = vst.msk [vmem:[%s7282_s11] sm:$0xf] %vm465_vm6, %v5530_v38  ;;  %v5531_v42 = vpack.c.bf16 %v1441_v41, %v1441_v41  ;;  %v1946_v43 = vsel %vm1942_vm15, %v6165_v32, %v1944_v22  ;;  %6090 = vmatprep.subr.bf16.mxu0 %v6577_v2  ;;  %6134 = vmatprep.mubr.msk.bf16.mxu1 %vm6578_vm1, %v6577_v2  ;;  %v4848_v31 = vrot.slane %v4846_v24, 3  ;;  %v4319_v32 = vrot.slane %v6533_v25, 2 }
 0x22b   : > { %5258 = vst.msk [vmem:[%s7282_s11 + $0x8] sm:$0xf] %vm465_vm6, %v5532_v40  ;;  %v5533_v49 = vpack.c.bf16 %v1946_v43, %v1946_v43  ;;  %6138 = vmatprep.subr.bf16.mxu1 %v6577_v2  ;;  %v4776_v17 = vsel %vm2075_vm10, %v4774_v11, %v4775_v14  ;;  %v4845_v30 = vrot.slane %v4843_v23, 2  ;;  %v4320_v33 = vrot.slane %v6534_v26, 2 }
 0x22c   : > { %1451 = vst.msk [vmem:[%s7282_s11 + $0x4] sm:$0xf] %vm465_vm6, %v5531_v42 }
 0x22d   : > { %5259 = vst.msk [vmem:[%s7282_s11 + $0xc] sm:$0xf] %vm465_vm6, %v5533_v49  ;;  %v4849_v35 = vor.u32 %v4848_v31, %v4845_v30  ;;  %v4321_v36 = vsel %vm2075_vm10, %v4319_v32, %v4320_v33 }
 0x233   : > { %6087 = vmatmul.mubr.msk.bf16.vlgmr.msra.gmra.mrb[28].mxu0 %vm993_vm8, %v4095_v19 }
 0x234   : > { %6091 = vmatpush3.bf16.msra.mxu0 %v6919_v59  ;;  %6135 = vmatmul.mubr.msk.bf16.vlgmr.msra.gmra.mrb[28].mxu1 %vm993_vm8, %v4594_v55 }
 0x235   : > { %6139 = vmatpush3.bf16.msra.mxu1 %v6919_v59  ;;  %6092 = vmatprep.mubr.msk.bf16.mxu0 %vm6578_vm1, %v6577_v2  ;;  %v4706_v59 = vshrl.u32 %v6527_v56, 16 }
 0x236   : > { %6096 = vmatprep.subr.bf16.mxu0 %v6577_v2  ;;  %6140 = vmatprep.mubr.msk.bf16.mxu1 %vm6578_vm1, %v6577_v2 }
 0x237   : > { %6144 = vmatprep.subr.bf16.mxu1 %v6577_v2  ;;  %v4711_v63 = vor.u32 %v4710_v61, %v4706_v59 }
 0x239   : > { %v4716_v3 = vsel %vm1516_vm9, %v4711_v63, %v4715_v1 }
 0x23f   : > { %6093 = vmatmul.mubr.msk.bf16.vlgmr.msra.gmra.mrb[28].mxu0 %vm993_vm8, %v6524_v57 }
 0x240   : > { %6097 = vmatpush3.bf16.msra.mxu0 %v6940_v0  ;;  %6141 = vmatmul.mubr.msk.bf16.vlgmr.msra.gmra.mrb[28].mxu1 %vm993_vm8, %v6525_v58 }
 0x241   : > { %6145 = vmatpush3.bf16.msra.mxu1 %v6940_v0  ;;  %6098 = vmatprep.mubr.msk.bf16.mxu0 %vm6578_vm1, %v6577_v2  ;;  %v6526_v0 = vld [vmem:[%s6962_s17 + $0x24] sm:$0xff]  }
 0x242   : > { %6102 = vmatprep.subr.bf16.mxu0 %v6577_v2  ;;  %6146 = vmatprep.mubr.msk.bf16.mxu1 %vm6578_vm1, %v6577_v2 }
 0x243   : > { %6150 = vmatprep.subr.bf16.mxu1 %v6577_v2 }
 0x24b   : > { %6099 = vmatmul.mubr.msk.bf16.vlgmr.msra.gmra.mrb[28].mxu0 %vm993_vm8, %v6526_v0 }
 0x24c   : > { %6103 = vmatpush3.bf16.msra.mxu0 %v6960_v12  ;;  %6147 = vmatmul.mubr.msk.bf16.vlgmr.msra.gmra.mrb[28].mxu1 %vm993_vm8, %v4716_v3 }
 0x24d   : > { %6151 = vmatpush3.bf16.msra.mxu1 %v6960_v12  ;;  %6104 = vmatprep.mubr.msk.bf16.mxu0 %vm6578_vm1, %v6577_v2  ;;  %v6535_v12 = vld [vmem:[%s6962_s17] sm:$0xfc]  }
 0x24e   : > { %6108 = vmatprep.subr.bf16.mxu0 %v6577_v2  ;;  %6152 = vmatprep.mubr.msk.bf16.mxu1 %vm6578_vm1, %v6577_v2  ;;  %v4835_v20 = vshrl.u32 %v6535_v12, 16  ;;  %v4838_v21 = vshll.u32 %v6535_v12, 16 }
 0x24f   : > { %6156 = vmatprep.subr.bf16.mxu1 %v6577_v2 }
 0x250   : > { %v4837_v27 = vrot.slane %v4835_v20, 2  ;;  %v4840_v29 = vrot.slane %v4838_v21, 3 }
 0x252   : > { %v4841_v34 = vor.u32 %v4840_v29, %v4837_v27 }
 0x257   : > { %6105 = vmatmul.mubr.msk.bf16.vlgmr.msra.gmra.mrb[28].mxu0 %vm993_vm8, %v4261_v16 }
 0x258   : > { %6109 = vmatpush3.bf16.msra.mxu0 %v6981_v18  ;;  %6153 = vmatmul.mubr.msk.bf16.vlgmr.msra.gmra.mrb[28].mxu1 %vm993_vm8, %v4776_v17 }
 0x259   : > { %6157 = vmatpush3.bf16.msra.mxu1 %v6981_v18  ;;  %6110 = vmatprep.mubr.msk.bf16.mxu0 %vm6578_vm1, %v6577_v2  ;;  %v4850_v18 = vsel %vm2621_vm11, %v4841_v34, %v4849_v35 }
 0x25a   : > { %6158 = vmatprep.mubr.msk.bf16.mxu1 %vm6578_vm1, %v6577_v2 }
 0x263   : > { %6111 = vmatmul.mubr.msk.bf16.vlgmr.msra.gmra.mrb[28].mxu0 %vm993_vm8, %v4321_v36 }
 0x264   : > { %6159 = vmatmul.mubr.msk.bf16.vlgmr.msra.gmra.mrb[28].mxu1 %vm993_vm8, %v4850_v18 }
 0x27e   : > { %v2402_v37 = vpop.f32.mrb[20].mxu0 }
 0x27f   : > { %v6166_v2 = vadd.f32 %v7260_v5, %v2402_v37  ;;  %v2932_v38 = vpop.f32.mrb[20].mxu1  ;;  %v5920_v39 = vpop.f32.mrb[21].mxu0 }
 0x280   : > { %v6168_v22 = vadd.f32 %v7260_v5, %v2932_v38  ;;  %v5968_v40 = vpop.f32.mrb[21].mxu1  ;;  %v2405_v41 = vpop.f32.mrb[22].mxu0 }
 0x281   : > { %vm2411_vm0 = vcmp.ge.f32.partialorder %v6166_v2, 0.0  ;;  %v2413_v42 = vmul.f32 %v6166_v2, %v7266_v8  ;;  %v6167_v43 = vadd.f32 %v7260_v5, %v2405_v41  ;;  %v2935_v44 = vpop.f32.mrb[22].mxu1  ;;  %v5921_v45 = vpop.f32.mrb[23].mxu0 }
 0x282   : > { %vm2941_vm1 = vcmp.ge.f32.partialorder %v6168_v22, 0.0  ;;  %v2943_v46 = vmul.f32 %v6168_v22, %v7266_v8  ;;  %v6169_v49 = vadd.f32 %v7260_v5, %v2935_v44  ;;  %v5969_v48 = vpop.f32.mrb[23].mxu1 }
 0x283   : > { %v2415_v50 = vsel %vm2411_vm0, %v6166_v2, %v2413_v42  ;;  %vm2412_vm2 = vcmp.ge.f32.partialorder %v6167_v43, 0.0  ;;  %v2414_v51 = vmul.f32 %v6167_v43, %v7266_v8 }
 0x284   : > { %v5534_v52 = vpack.c.bf16 %v2415_v50, %v2415_v50  ;;  %v2945_v47 = vsel %vm2941_vm1, %v6168_v22, %v2943_v46  ;;  %vm2942_vm3 = vcmp.ge.f32.partialorder %v6169_v49, 0.0  ;;  %v2944_v53 = vmul.f32 %v6169_v49, %v7266_v8 }
 0x285   : > { %v5536_v54 = vpack.c.bf16 %v2945_v47, %v2945_v47  ;;  %v2416_v19 = vsel %vm2412_vm2, %v6167_v43, %v2414_v51 }
 0x286   : > { %5299 = vst.msk [vmem:[%s7282_s11 + $0x10] sm:$0xf] %vm465_vm6, %v5534_v52  ;;  %v5535_v55 = vpack.c.bf16 %v2416_v19, %v2416_v19  ;;  %v2946_v56 = vsel %vm2942_vm3, %v6169_v49, %v2944_v53 }
 0x287   : > { %5344 = vst.msk [vmem:[%s7282_s11 + $0x18] sm:$0xf] %vm465_vm6, %v5536_v54  ;;  %v5537_v57 = vpack.c.bf16 %v2946_v56, %v2946_v56 }
 0x288   : > { %5300 = vst.msk [vmem:[%s7282_s11 + $0x14] sm:$0xf] %vm465_vm6, %v5535_v55 }
 0x289   : > { %5345 = vst.msk [vmem:[%s7282_s11 + $0x1c] sm:$0xf] %vm465_vm6, %v5537_v57 }
 0x2da   : > { %v3385_v58 = vpop.f32.mrb[24].mxu0 }
 0x2db   : > { %v6170_v60 = vadd.f32 %v7260_v5, %v3385_v58  ;;  %v3890_v13 = vpop.f32.mrb[24].mxu1  ;;  %v6016_v59 = vpop.f32.mrb[25].mxu0 }
 0x2dc   : > { %v6172_v61 = vadd.f32 %v7260_v5, %v3890_v13  ;;  %v6064_v62 = vpop.f32.mrb[25].mxu1  ;;  %v3388_v63 = vpop.f32.mrb[26].mxu0 }
 0x2dd   : > { %vm3394_vm4 = vcmp.ge.f32.partialorder %v6170_v60, 0.0  ;;  %v3396_v1 = vmul.f32 %v6170_v60, %v7266_v8  ;;  %v6171_v0 = vadd.f32 %v7260_v5, %v3388_v63  ;;  %v3893_v3 = vpop.f32.mrb[26].mxu1  ;;  %v6017_v4 = vpop.f32.mrb[27].mxu0 }
 0x2de   : > { %vm3899_vm5 = vcmp.ge.f32.partialorder %v6172_v61, 0.0  ;;  %v3901_v6 = vmul.f32 %v6172_v61, %v7266_v8  ;;  %v6173_v7 = vadd.f32 %v7260_v5, %v3893_v3  ;;  %v6065_v28 = vpop.f32.mrb[27].mxu1 }
 0x2df   : > { %v3398_v9 = vsel %vm3394_vm4, %v6170_v60, %v3396_v1  ;;  %vm3395_vm7 = vcmp.ge.f32.partialorder %v6171_v0, 0.0  ;;  %v3397_v10 = vmul.f32 %v6171_v0, %v7266_v8 }
 0x2e0   : > { %v5539_v11 = vpack.c.bf16 %v3398_v9, %v3398_v9  ;;  %v3903_v14 = vsel %vm3899_vm5, %v6172_v61, %v3901_v6  ;;  %vm3900_vm8 = vcmp.ge.f32.partialorder %v6173_v7, 0.0  ;;  %v3902_v12 = vmul.f32 %v6173_v7, %v7266_v8 }
 0x2e1   : > { %v5541_v15 = vpack.c.bf16 %v3903_v14, %v3903_v14  ;;  %v3399_v16 = vsel %vm3395_vm7, %v6171_v0, %v3397_v10 }
 0x2e2   : > { %5382 = vst.msk [vmem:[%s7282_s11 + $0x20] sm:$0xf] %vm465_vm6, %v5539_v11  ;;  %v5540_v17 = vpack.c.bf16 %v3399_v16, %v3399_v16  ;;  %v3904_v20 = vsel %vm3900_vm8, %v6173_v7, %v3902_v12 }
 0x2e3   : > { %5423 = vst.msk [vmem:[%s7282_s11 + $0x28] sm:$0xf] %vm465_vm6, %v5541_v15  ;;  %v5542_v21 = vpack.c.bf16 %v3904_v20, %v3904_v20 }
 0x2e4   : > { %5383 = vst.msk [vmem:[%s7282_s11 + $0x24] sm:$0xf] %vm465_vm6, %v5540_v17 }
 0x2e5   : > { %5424 = vst.msk [vmem:[%s7282_s11 + $0x2c] sm:$0xf] %vm465_vm6, %v5542_v21 }
 0x336   : > { %v4359_v23 = vpop.f32.mrb[28].mxu0 }
 0x337   : > { %v6174_v24 = vadd.f32 %v7260_v5, %v4359_v23  ;;  %v4888_v25 = vpop.f32.mrb[28].mxu1  ;;  %v6112_v26 = vpop.f32.mrb[29].mxu0 }
 0x338   : > { %v6176_v27 = vadd.f32 %v7260_v5, %v4888_v25  ;;  %v6160_v29 = vpop.f32.mrb[29].mxu1  ;;  %v4362_v30 = vpop.f32.mrb[30].mxu0 }
 0x339   : > { %vm4368_vm9 = vcmp.ge.f32.partialorder %v6174_v24, 0.0  ;;  %v4370_v31 = vmul.f32 %v6174_v24, %v7266_v8  ;;  %v6175_v32 = vadd.f32 %v7260_v5, %v4362_v30  ;;  %v4891_v33 = vpop.f32.mrb[30].mxu1  ;;  %v6113_v34 = vpop.f32.mrb[31].mxu0 }
 0x33a   : > { %vm4897_vm10 = vcmp.ge.f32.partialorder %v6176_v27, 0.0  ;;  %v4899_v35 = vmul.f32 %v6176_v27, %v7266_v8  ;;  %v6177_v36 = vadd.f32 %v7260_v5, %v4891_v33  ;;  %v6161_v18 = vpop.f32.mrb[31].mxu1 }
 0x33b   : > { %v4372_v37 = vsel %vm4368_vm9, %v6174_v24, %v4370_v31  ;;  %vm4369_vm11 = vcmp.ge.f32.partialorder %v6175_v32, 0.0  ;;  %v4371_v2 = vmul.f32 %v6175_v32, %v7266_v8 }
 0x33c   : > { %v5543_v38 = vpack.c.bf16 %v4372_v37, %v4372_v37  ;;  %v4901_v39 = vsel %vm4897_vm10, %v6176_v27, %v4899_v35  ;;  %vm4898_vm12 = vcmp.ge.f32.partialorder %v6177_v36, 0.0  ;;  %v4900_v22 = vmul.f32 %v6177_v36, %v7266_v8 }
 0x33d   : > { %v5545_v40 = vpack.c.bf16 %v4901_v39, %v4901_v39  ;;  %v4373_v41 = vsel %vm4369_vm11, %v6175_v32, %v4371_v2 }
 0x33e   : > { %5464 = vst.msk [vmem:[%s7282_s11 + $0x30] sm:$0xf] %vm465_vm6, %v5543_v38  ;;  %v5544_v42 = vpack.c.bf16 %v4373_v41, %v4373_v41  ;;  %v4902_v43 = vsel %vm4898_vm12, %v6177_v36, %v4900_v22 }
 0x33f   : > { %5509 = vst.msk [vmem:[%s7282_s11 + $0x38] sm:$0xf] %vm465_vm6, %v5545_v40  ;;  %v5546_v5 = vpack.c.bf16 %v4902_v43, %v4902_v43 }
 0x340   : > { %5465 = vst.msk [vmem:[%s7282_s11 + $0x34] sm:$0xf] %vm465_vm6, %v5544_v42 }
 0x341   : > { %5510 = vst.msk [vmem:[%s7282_s11 + $0x3c] sm:$0xf] %vm465_vm6, %v5546_v5 }
 0x342 PF: > { %s17_s28 = sadd.s32 1, %s6575_s28   ;;  %s7439_s24 = smov %s6567_s26 }
 0x343   : > { %p14_p10 = scmp.ge.s32.totalorder %s17_s28, 10   ;;  %s7440_s25 = smov %s6571_s27 }
 0x344   : > { %s7441_s26 = smov %s7444_s29  ;;  %s7442_s27 = smov %s7448_s30 }
 0x345   :  { %16 = sbr.rel (!%p14_p10) target bundleno = 3 (0x3), region = 121 }

</bundles_post_ra>
